<compile_context>
chip_gen: v6e
topology: v6e:2x2x1
jax: 0.10.0
libtpu: 0.0.40
codegen_flags: <defaults>
</compile_context>

<pallas_src>
import functools

import jax
import jax.numpy as jnp
from jax.experimental import pallas as pl
from jax.experimental.pallas import tpu as pltpu


# ----------------------------------------------------------------------------
# Fused kernel: all GRU layers + final Linear
# ----------------------------------------------------------------------------
def encoder_kernel(x_ref, *refs, hidden, num_layers, seq_len):
    """Fused Encoder forward.

    Ref layout (after x_ref):
      per layer l (4 refs each):
        w_ih: (3, Din_l, H)   gate-stacked input weights  (gate order r, z, n)
        w_hh: (3, H, H)       gate-stacked recurrent weights
        b_ih: (3, 1, H)       gate-stacked input biases
        b_hh: (3, 1, H)       gate-stacked recurrent biases
      fc_w: (H, Dz)
      fc_b: (1, Dz)
      out_ref: (B, Dz)
      seq_ref: (B, T, H)  VMEM scratch holding the current layer's output seq
    """
    H = hidden
    T = seq_len
    B = x_ref.shape[0]

    n_layer_refs = 4 * num_layers
    layer_refs = refs[:n_layer_refs]
    fc_w_ref = refs[n_layer_refs]
    fc_b_ref = refs[n_layer_refs + 1]
    out_ref = refs[n_layer_refs + 2]
    seq_ref = refs[n_layer_refs + 3]

    h = jnp.zeros((B, H), jnp.float32)

    for layer in range(num_layers):
        w_ih_ref, w_hh_ref, b_ih_ref, b_hh_ref = layer_refs[4 * layer:4 * layer + 4]

        if layer == 0:
            inp = x_ref[...].astype(jnp.float32)      # (B, T, Din)
            reverse = True                            # fold torch.flip(x, [1])
        else:
            inp = seq_ref[...]                        # (B, T, H), fully written
            reverse = False

        # --- bulk input-to-hidden matmuls (no sequential dependence) -------
        gi = []
        for g in range(3):
            gi_g = jnp.einsum(
                "btd,dh->bth", inp, w_ih_ref[g],
                preferred_element_type=jnp.float32,
            ) + b_ih_ref[g]                           # (B, T, H)
            gi.append(gi_g)
        gi_r, gi_z, gi_n = gi

        whh_r = w_hh_ref[0]
        whh_z = w_hh_ref[1]
        whh_n = w_hh_ref[2]
        bhh_r = b_hh_ref[0]
        bhh_z = b_hh_ref[1]
        bhh_n = b_hh_ref[2]

        is_last = layer == num_layers - 1
        h = jnp.zeros((B, H), jnp.float32)

        # T is small and static -> fully unrolled serial recurrence.
        # TODO(synk): for T >~ 16 switch to lax.fori_loop(..., unroll=True)
        # over chunks to bound vreg live ranges.
        for t in range(T):
            ti = (T - 1 - t) if reverse else t
            gir = gi_r[:, ti, :]
            giz = gi_z[:, ti, :]
            gin = gi_n[:, ti, :]
            ghr = jnp.dot(h, whh_r, preferred_element_type=jnp.float32) + bhh_r
            ghz = jnp.dot(h, whh_z, preferred_element_type=jnp.float32) + bhh_z
            ghn = jnp.dot(h, whh_n, preferred_element_type=jnp.float32) + bhh_n
            r = jax.nn.sigmoid(gir + ghr)
            z = jax.nn.sigmoid(giz + ghz)
            n = jnp.tanh(gin + r * ghn)
            h = (1.0 - z) * n + z * h
            if not is_last:
                # VMEM-only sequence for the next layer (never hits HBM).
                seq_ref[:, t, :] = h

    # Final Linear on the top layer's last hidden state.
    out_ref[...] = (
        jnp.dot(h, fc_w_ref[...], preferred_element_type=jnp.float32)
        + fc_b_ref[...]
    ).astype(out_ref.dtype)


# ----------------------------------------------------------------------------
# Wrapper (single pallas_call)
# ----------------------------------------------------------------------------
def _full_spec(arr):
    nd = arr.ndim
    return pl.BlockSpec(arr.shape, lambda i, _n=nd: (0,) * _n)


def encoder_forward(x, params, hidden):
    """Equivalent of Encoder.forward(x); x is (B, T, dim_x + dim_z)."""
    B, T, Din = x.shape
    num_layers = len(params["layers"])
    Dz = params["fc_w_t"].shape[1]

    inputs = [x]
    in_specs = [_full_spec(x)]
    for layer in params["layers"]:
        for name in ("w_ih", "w_hh", "b_ih", "b_hh"):
            arr = layer[name]
            inputs.append(arr)
            in_specs.append(_full_spec(arr))
    for name in ("fc_w_t", "fc_b"):
        arr = params[name]
        inputs.append(arr)
        in_specs.append(_full_spec(arr))

    kernel = functools.partial(
        encoder_kernel, hidden=hidden, num_layers=num_layers, seq_len=T)

    return pl.pallas_call(
        kernel,
        out_shape=jax.ShapeDtypeStruct((B, Dz), jnp.float32),
        grid=(1,),
        in_specs=in_specs,
        out_specs=pl.BlockSpec((B, Dz), lambda i: (0, 0)),
        scratch_shapes=[pltpu.VMEM((B, T, hidden), jnp.float32)],
        compiler_params=pltpu.CompilerParams(
            dimension_semantics=("arbitrary",)),
    )(*inputs)


# ----------------------------------------------------------------------------
# Deterministic parameter init (PyTorch-style uniform(-1/sqrt(H), 1/sqrt(H)))
# Weights are generated in PyTorch layout (3H, Din) with gate order (r, z, n),
# then repacked into per-gate stacked slabs for the kernel.
# ----------------------------------------------------------------------------
def init_params(key, input_size, hidden, num_layers, dim_z):
    k = 1.0 / (hidden ** 0.5)
    params = {"layers": []}
    for layer in range(num_layers):
        din = input_size if layer == 0 else hidden
        key, k1, k2, k3, k4 = jax.random.split(key, 5)
        w_ih = jax.random.uniform(k1, (3 * hidden, din), jnp.float32, -k, k)
        w_hh = jax.random.uniform(k2, (3 * hidden, hidden), jnp.float32, -k, k)
        b_ih = jax.random.uniform(k3, (3 * hidden,), jnp.float32, -k, k)
        b_hh = jax.random.uniform(k4, (3 * hidden,), jnp.float32, -k, k)
        params["layers"].append({
            "w_ih": jnp.transpose(w_ih.reshape(3, hidden, din), (0, 2, 1)),     # (3, din, H)
            "w_hh": jnp.transpose(w_hh.reshape(3, hidden, hidden), (0, 2, 1)),  # (3, H, H)
            "b_ih": b_ih.reshape(3, 1, hidden),                                 # (3, 1, H)
            "b_hh": b_hh.reshape(3, 1, hidden),                                 # (3, 1, H)
        })
    key, k5, k6 = jax.random.split(key, 3)
    fc_w = jax.random.uniform(k5, (dim_z, hidden), jnp.float32, -k, k)
    fc_b = jax.random.uniform(k6, (dim_z,), jnp.float32, -k, k)
    params["fc_w_t"] = fc_w.T                 # (H, dim_z)
    params["fc_b"] = fc_b[None, :]            # (1, dim_z)
    return params


# ----------------------------------------------------------------------------
# Pure-JAX reference (same math, no Pallas) for self-check
# ----------------------------------------------------------------------------
def encoder_reference(x, params, hidden):
    x = jnp.flip(x, axis=1)
    B, T, _ = x.shape
    h_seq = x
    for layer in params["layers"]:
        w_ih, w_hh = layer["w_ih"], layer["w_hh"]
        b_ih, b_hh = layer["b_ih"], layer["b_hh"]
        h = jnp.zeros((B, hidden), jnp.float32)
        outs = []
        for t in range(T):
            xt = h_seq[:, t, :]
            gir = xt @ w_ih[0] + b_ih[0]
            giz = xt @ w_ih[1] + b_ih[1]
            gin = xt @ w_ih[2] + b_ih[2]
            ghr = h @ w_hh[0] + b_hh[0]
            ghz = h @ w_hh[1] + b_hh[1]
            ghn = h @ w_hh[2] + b_hh[2]
            r = jax.nn.sigmoid(gir + ghr)
            z = jax.nn.sigmoid(giz + ghz)
            n = jnp.tanh(gin + r * ghn)
            h = (1.0 - z) * n + z * h
            outs.append(h)
        h_seq = jnp.stack(outs, axis=1)
    return h_seq[:, -1, :] @ params["fc_w_t"] + params["fc_b"]


# ----------------------------------------------------------------------------
if __name__ == "__main__":
    # config: dim_x=5, dim_z=3 -> GRU input_size=8; n_hidden_encode=32;
    #         n_layers_encode=2; batch=2; seq_len=8
    dim_x, dim_z = 5, 3
    input_size = dim_x + dim_z
    hidden = 32
    num_layers = 2
    B, T = 2, 8

    key = jax.random.PRNGKey(0)
    key, pkey, xkey = jax.random.split(key, 3)
    params = init_params(pkey, input_size, hidden, num_layers, dim_z)
    x = jax.random.normal(xkey, (B, T, input_size), jnp.float32)

    out = encoder_forward(x, params, hidden)
    out = jax.block_until_ready(out)

    ref = encoder_reference(x, params, hidden)
    assert out.shape == (B, dim_z)
    assert jnp.allclose(out, ref, atol=1e-5, rtol=1e-5)

    print("KERNEL_OK")
</pallas_src>

<mosaic_0001>
module attributes {stable_mosaic.version = 11 : i64} {
  func.func @encoder_kernel(%arg0: i32, %arg1: memref<2x8x8xf32, #tpu.memory_space<vmem>>, %arg2: memref<3x8x32xf32, #tpu.memory_space<vmem>>, %arg3: memref<3x32x32xf32, #tpu.memory_space<vmem>>, %arg4: memref<3x1x32xf32, #tpu.memory_space<vmem>>, %arg5: memref<3x1x32xf32, #tpu.memory_space<vmem>>, %arg6: memref<3x32x32xf32, #tpu.memory_space<vmem>>, %arg7: memref<3x32x32xf32, #tpu.memory_space<vmem>>, %arg8: memref<3x1x32xf32, #tpu.memory_space<vmem>>, %arg9: memref<3x1x32xf32, #tpu.memory_space<vmem>>, %arg10: memref<32x3xf32, #tpu.memory_space<vmem>>, %arg11: memref<1x3xf32, #tpu.memory_space<vmem>>, %arg12: memref<2x3xf32, #tpu.memory_space<vmem>>, %arg13: memref<2x8x32xf32, #tpu.memory_space<vmem>>) attributes {dimension_semantics = [#tpu.dimension_semantics<arbitrary>], iteration_bounds = array<i64: 1>, scalar_prefetch = 0 : i64, scratch_operands = 1 : i64, tpu.core_type = #tpu.core_type<tc>, window_params = [{pipeline_mode = #tpu.pipeline_mode<synchronous>, transform_indices = @transform_0, window_bounds = array<i64: 2, 8, 8>}, {pipeline_mode = #tpu.pipeline_mode<synchronous>, transform_indices = @transform_1, window_bounds = array<i64: 3, 8, 32>}, {pipeline_mode = #tpu.pipeline_mode<synchronous>, transform_indices = @transform_2, window_bounds = array<i64: 3, 32, 32>}, {pipeline_mode = #tpu.pipeline_mode<synchronous>, transform_indices = @transform_3, window_bounds = array<i64: 3, 1, 32>}, {pipeline_mode = #tpu.pipeline_mode<synchronous>, transform_indices = @transform_4, window_bounds = array<i64: 3, 1, 32>}, {pipeline_mode = #tpu.pipeline_mode<synchronous>, transform_indices = @transform_5, window_bounds = array<i64: 3, 32, 32>}, {pipeline_mode = #tpu.pipeline_mode<synchronous>, transform_indices = @transform_6, window_bounds = array<i64: 3, 32, 32>}, {pipeline_mode = #tpu.pipeline_mode<synchronous>, transform_indices = @transform_7, window_bounds = array<i64: 3, 1, 32>}, {pipeline_mode = #tpu.pipeline_mode<synchronous>, transform_indices = @transform_8, window_bounds = array<i64: 3, 1, 32>}, {pipeline_mode = #tpu.pipeline_mode<synchronous>, transform_indices = @transform_9, window_bounds = array<i64: 32, 3>}, {pipeline_mode = #tpu.pipeline_mode<synchronous>, transform_indices = @transform_10, window_bounds = array<i64: 1, 3>}, {pipeline_mode = #tpu.pipeline_mode<synchronous>, transform_indices = @transform_11, window_bounds = array<i64: 2, 3>}]} {
    %c0 = arith.constant 0 : index
    %c0_0 = arith.constant 0 : index
    %c0_1 = arith.constant 0 : index
    %0 = vector.load %arg1[%c0, %c0_0, %c0_1] : memref<2x8x8xf32, #tpu.memory_space<vmem>>, vector<2x8x8xf32>
    %c0_2 = arith.constant 0 : index
    %c0_3 = arith.constant 0 : index
    %c0_4 = arith.constant 0 : index
    %1 = vector.load %arg2[%c0_2, %c0_3, %c0_4] : memref<3x8x32xf32, #tpu.memory_space<vmem>>, vector<1x8x32xf32>
    %2 = vector.shape_cast %1 : vector<1x8x32xf32> to vector<8x32xf32>
    "tpu.trace_start"() <{level = 10 : i32, message = "btd,dh->bth"}> : () -> ()
    %cst = arith.constant dense<0.000000e+00> : vector<2x8x32xf32>
    %3 = tpu.matmul %0, %2, %cst {dimension_numbers = #tpu.dot_dimension_numbers<[2], [0], [0, 1], [1], [0, 0, 0, 1, 1, 1], [], []>} : vector<2x8x8xf32>, vector<8x32xf32>, vector<2x8x32xf32> -> vector<2x8x32xf32>
    "tpu.trace_stop"() : () -> ()
    %c0_5 = arith.constant 0 : index
    %c0_6 = arith.constant 0 : index
    %c0_7 = arith.constant 0 : index
    %4 = vector.load %arg4[%c0_5, %c0_6, %c0_7] : memref<3x1x32xf32, #tpu.memory_space<vmem>>, vector<1x1x32xf32>
    %5 = vector.shape_cast %4 : vector<1x1x32xf32> to vector<1x32xf32>
    %6 = vector.shape_cast %5 : vector<1x32xf32> to vector<1x1x32xf32>
    %7 = vector.broadcast %6 : vector<1x1x32xf32> to vector<2x8x32xf32>
    %8 = arith.addf %3, %7 : vector<2x8x32xf32>
    %c1 = arith.constant 1 : index
    %c0_8 = arith.constant 0 : index
    %c0_9 = arith.constant 0 : index
    %9 = vector.load %arg2[%c1, %c0_8, %c0_9] : memref<3x8x32xf32, #tpu.memory_space<vmem>>, vector<1x8x32xf32>
    %10 = vector.shape_cast %9 : vector<1x8x32xf32> to vector<8x32xf32>
    "tpu.trace_start"() <{level = 10 : i32, message = "btd,dh->bth"}> : () -> ()
    %cst_10 = arith.constant dense<0.000000e+00> : vector<2x8x32xf32>
    %11 = tpu.matmul %0, %10, %cst_10 {dimension_numbers = #tpu.dot_dimension_numbers<[2], [0], [0, 1], [1], [0, 0, 0, 1, 1, 1], [], []>} : vector<2x8x8xf32>, vector<8x32xf32>, vector<2x8x32xf32> -> vector<2x8x32xf32>
    "tpu.trace_stop"() : () -> ()
    %c1_11 = arith.constant 1 : index
    %c0_12 = arith.constant 0 : index
    %c0_13 = arith.constant 0 : index
    %12 = vector.load %arg4[%c1_11, %c0_12, %c0_13] : memref<3x1x32xf32, #tpu.memory_space<vmem>>, vector<1x1x32xf32>
    %13 = vector.shape_cast %12 : vector<1x1x32xf32> to vector<1x32xf32>
    %14 = vector.shape_cast %13 : vector<1x32xf32> to vector<1x1x32xf32>
    %15 = vector.broadcast %14 : vector<1x1x32xf32> to vector<2x8x32xf32>
    %16 = arith.addf %11, %15 : vector<2x8x32xf32>
    %c2 = arith.constant 2 : index
    %c0_14 = arith.constant 0 : index
    %c0_15 = arith.constant 0 : index
    %17 = vector.load %arg2[%c2, %c0_14, %c0_15] : memref<3x8x32xf32, #tpu.memory_space<vmem>>, vector<1x8x32xf32>
    %18 = vector.shape_cast %17 : vector<1x8x32xf32> to vector<8x32xf32>
    "tpu.trace_start"() <{level = 10 : i32, message = "btd,dh->bth"}> : () -> ()
    %cst_16 = arith.constant dense<0.000000e+00> : vector<2x8x32xf32>
    %19 = tpu.matmul %0, %18, %cst_16 {dimension_numbers = #tpu.dot_dimension_numbers<[2], [0], [0, 1], [1], [0, 0, 0, 1, 1, 1], [], []>} : vector<2x8x8xf32>, vector<8x32xf32>, vector<2x8x32xf32> -> vector<2x8x32xf32>
    "tpu.trace_stop"() : () -> ()
    %c2_17 = arith.constant 2 : index
    %c0_18 = arith.constant 0 : index
    %c0_19 = arith.constant 0 : index
    %20 = vector.load %arg4[%c2_17, %c0_18, %c0_19] : memref<3x1x32xf32, #tpu.memory_space<vmem>>, vector<1x1x32xf32>
    %21 = vector.shape_cast %20 : vector<1x1x32xf32> to vector<1x32xf32>
    %22 = vector.shape_cast %21 : vector<1x32xf32> to vector<1x1x32xf32>
    %23 = vector.broadcast %22 : vector<1x1x32xf32> to vector<2x8x32xf32>
    %24 = arith.addf %19, %23 : vector<2x8x32xf32>
    %c0_20 = arith.constant 0 : index
    %c0_21 = arith.constant 0 : index
    %c0_22 = arith.constant 0 : index
    %25 = vector.load %arg3[%c0_20, %c0_21, %c0_22] : memref<3x32x32xf32, #tpu.memory_space<vmem>>, vector<1x32x32xf32>
    %26 = vector.shape_cast %25 : vector<1x32x32xf32> to vector<32x32xf32>
    %c1_23 = arith.constant 1 : index
    %c0_24 = arith.constant 0 : index
    %c0_25 = arith.constant 0 : index
    %27 = vector.load %arg3[%c1_23, %c0_24, %c0_25] : memref<3x32x32xf32, #tpu.memory_space<vmem>>, vector<1x32x32xf32>
    %28 = vector.shape_cast %27 : vector<1x32x32xf32> to vector<32x32xf32>
    %c2_26 = arith.constant 2 : index
    %c0_27 = arith.constant 0 : index
    %c0_28 = arith.constant 0 : index
    %29 = vector.load %arg3[%c2_26, %c0_27, %c0_28] : memref<3x32x32xf32, #tpu.memory_space<vmem>>, vector<1x32x32xf32>
    %30 = vector.shape_cast %29 : vector<1x32x32xf32> to vector<32x32xf32>
    %c0_29 = arith.constant 0 : index
    %c0_30 = arith.constant 0 : index
    %c0_31 = arith.constant 0 : index
    %31 = vector.load %arg5[%c0_29, %c0_30, %c0_31] : memref<3x1x32xf32, #tpu.memory_space<vmem>>, vector<1x1x32xf32>
    %32 = vector.shape_cast %31 : vector<1x1x32xf32> to vector<1x32xf32>
    %c1_32 = arith.constant 1 : index
    %c0_33 = arith.constant 0 : index
    %c0_34 = arith.constant 0 : index
    %33 = vector.load %arg5[%c1_32, %c0_33, %c0_34] : memref<3x1x32xf32, #tpu.memory_space<vmem>>, vector<1x1x32xf32>
    %34 = vector.shape_cast %33 : vector<1x1x32xf32> to vector<1x32xf32>
    %c2_35 = arith.constant 2 : index
    %c0_36 = arith.constant 0 : index
    %c0_37 = arith.constant 0 : index
    %35 = vector.load %arg5[%c2_35, %c0_36, %c0_37] : memref<3x1x32xf32, #tpu.memory_space<vmem>>, vector<1x1x32xf32>
    %36 = vector.shape_cast %35 : vector<1x1x32xf32> to vector<1x32xf32>
    %cst_38 = arith.constant 0.000000e+00 : f32
    %37 = vector.broadcast %cst_38 : f32 to vector<2x32xf32>
    %38 = vector.extract_strided_slice %8 {offsets = [0, 7, 0], sizes = [2, 1, 32], strides = [1, 1, 1]} : vector<2x8x32xf32> to vector<2x1x32xf32>
    %39 = vector.shape_cast %38 : vector<2x1x32xf32> to vector<2x32xf32>
    %40 = vector.extract_strided_slice %16 {offsets = [0, 7, 0], sizes = [2, 1, 32], strides = [1, 1, 1]} : vector<2x8x32xf32> to vector<2x1x32xf32>
    %41 = vector.shape_cast %40 : vector<2x1x32xf32> to vector<2x32xf32>
    %42 = vector.extract_strided_slice %24 {offsets = [0, 7, 0], sizes = [2, 1, 32], strides = [1, 1, 1]} : vector<2x8x32xf32> to vector<2x1x32xf32>
    %43 = vector.shape_cast %42 : vector<2x1x32xf32> to vector<2x32xf32>
    %cst_39 = arith.constant dense<0.000000e+00> : vector<2x32xf32>
    %44 = tpu.matmul %37, %26, %cst_39 {dimension_numbers = #tpu.dot_dimension_numbers<[1], [0], [0], [1], [0, 0, 1, 1], [], []>} : vector<2x32xf32>, vector<32x32xf32>, vector<2x32xf32> -> vector<2x32xf32>
    %45 = vector.broadcast %32 : vector<1x32xf32> to vector<2x32xf32>
    %46 = arith.addf %44, %45 : vector<2x32xf32>
    %cst_40 = arith.constant dense<0.000000e+00> : vector<2x32xf32>
    %47 = tpu.matmul %37, %28, %cst_40 {dimension_numbers = #tpu.dot_dimension_numbers<[1], [0], [0], [1], [0, 0, 1, 1], [], []>} : vector<2x32xf32>, vector<32x32xf32>, vector<2x32xf32> -> vector<2x32xf32>
    %48 = vector.broadcast %34 : vector<1x32xf32> to vector<2x32xf32>
    %49 = arith.addf %47, %48 : vector<2x32xf32>
    %cst_41 = arith.constant dense<0.000000e+00> : vector<2x32xf32>
    %50 = tpu.matmul %37, %30, %cst_41 {dimension_numbers = #tpu.dot_dimension_numbers<[1], [0], [0], [1], [0, 0, 1, 1], [], []>} : vector<2x32xf32>, vector<32x32xf32>, vector<2x32xf32> -> vector<2x32xf32>
    %51 = vector.broadcast %36 : vector<1x32xf32> to vector<2x32xf32>
    %52 = arith.addf %50, %51 : vector<2x32xf32>
    %53 = arith.addf %39, %46 : vector<2x32xf32>
    %54 = arith.negf %53 : vector<2x32xf32>
    %55 = math.exp %54 : vector<2x32xf32>
    %cst_42 = arith.constant 1.000000e+00 : f32
    %56 = vector.broadcast %cst_42 : f32 to vector<2x32xf32>
    %57 = arith.addf %56, %55 : vector<2x32xf32>
    %58 = arith.divf %56, %57 : vector<2x32xf32>
    %59 = arith.addf %41, %49 : vector<2x32xf32>
    %60 = arith.negf %59 : vector<2x32xf32>
    %61 = math.exp %60 : vector<2x32xf32>
    %cst_43 = arith.constant 1.000000e+00 : f32
    %62 = vector.broadcast %cst_43 : f32 to vector<2x32xf32>
    %63 = arith.addf %62, %61 : vector<2x32xf32>
    %64 = arith.divf %62, %63 : vector<2x32xf32>
    %65 = arith.mulf %58, %52 : vector<2x32xf32>
    %66 = arith.addf %43, %65 : vector<2x32xf32>
    %67 = math.tanh %66 : vector<2x32xf32>
    %cst_44 = arith.constant 1.000000e+00 : f32
    %68 = vector.broadcast %cst_44 : f32 to vector<2x32xf32>
    %69 = arith.subf %68, %64 : vector<2x32xf32>
    %70 = arith.mulf %69, %67 : vector<2x32xf32>
    %71 = arith.mulf %64, %37 : vector<2x32xf32>
    %72 = arith.addf %70, %71 : vector<2x32xf32>
    %c0_45 = arith.constant 0 : index
    %c0_46 = arith.constant 0 : index
    %c0_47 = arith.constant 0 : index
    %73 = vector.load %arg13[%c0_45, %c0_46, %c0_47] : memref<2x8x32xf32, #tpu.memory_space<vmem>>, vector<2x1x32xf32>
    %74 = vector.shape_cast %73 : vector<2x1x32xf32> to vector<2x32xf32>
    %75 = vector.shape_cast %72 : vector<2x32xf32> to vector<2x1x32xf32>
    tpu.vector_store %arg13[%c0_45, %c0_46, %c0_47], %75 {strides = array<i32>} : memref<2x8x32xf32, #tpu.memory_space<vmem>>, vector<2x1x32xf32>,
    %76 = vector.extract_strided_slice %8 {offsets = [0, 6, 0], sizes = [2, 1, 32], strides = [1, 1, 1]} : vector<2x8x32xf32> to vector<2x1x32xf32>
    %77 = vector.shape_cast %76 : vector<2x1x32xf32> to vector<2x32xf32>
    %78 = vector.extract_strided_slice %16 {offsets = [0, 6, 0], sizes = [2, 1, 32], strides = [1, 1, 1]} : vector<2x8x32xf32> to vector<2x1x32xf32>
    %79 = vector.shape_cast %78 : vector<2x1x32xf32> to vector<2x32xf32>
    %80 = vector.extract_strided_slice %24 {offsets = [0, 6, 0], sizes = [2, 1, 32], strides = [1, 1, 1]} : vector<2x8x32xf32> to vector<2x1x32xf32>
    %81 = vector.shape_cast %80 : vector<2x1x32xf32> to vector<2x32xf32>
    %cst_48 = arith.constant dense<0.000000e+00> : vector<2x32xf32>
    %82 = tpu.matmul %72, %26, %cst_48 {dimension_numbers = #tpu.dot_dimension_numbers<[1], [0], [0], [1], [0, 0, 1, 1], [], []>} : vector<2x32xf32>, vector<32x32xf32>, vector<2x32xf32> -> vector<2x32xf32>
    %83 = vector.broadcast %32 : vector<1x32xf32> to vector<2x32xf32>
    %84 = arith.addf %82, %83 : vector<2x32xf32>
    %cst_49 = arith.constant dense<0.000000e+00> : vector<2x32xf32>
    %85 = tpu.matmul %72, %28, %cst_49 {dimension_numbers = #tpu.dot_dimension_numbers<[1], [0], [0], [1], [0, 0, 1, 1], [], []>} : vector<2x32xf32>, vector<32x32xf32>, vector<2x32xf32> -> vector<2x32xf32>
    %86 = vector.broadcast %34 : vector<1x32xf32> to vector<2x32xf32>
    %87 = arith.addf %85, %86 : vector<2x32xf32>
    %cst_50 = arith.constant dense<0.000000e+00> : vector<2x32xf32>
    %88 = tpu.matmul %72, %30, %cst_50 {dimension_numbers = #tpu.dot_dimension_numbers<[1], [0], [0], [1], [0, 0, 1, 1], [], []>} : vector<2x32xf32>, vector<32x32xf32>, vector<2x32xf32> -> vector<2x32xf32>
    %89 = vector.broadcast %36 : vector<1x32xf32> to vector<2x32xf32>
    %90 = arith.addf %88, %89 : vector<2x32xf32>
    %91 = arith.addf %77, %84 : vector<2x32xf32>
    %92 = arith.negf %91 : vector<2x32xf32>
    %93 = math.exp %92 : vector<2x32xf32>
    %cst_51 = arith.constant 1.000000e+00 : f32
    %94 = vector.broadcast %cst_51 : f32 to vector<2x32xf32>
    %95 = arith.addf %94, %93 : vector<2x32xf32>
    %96 = arith.divf %94, %95 : vector<2x32xf32>
    %97 = arith.addf %79, %87 : vector<2x32xf32>
    %98 = arith.negf %97 : vector<2x32xf32>
    %99 = math.exp %98 : vector<2x32xf32>
    %cst_52 = arith.constant 1.000000e+00 : f32
    %100 = vector.broadcast %cst_52 : f32 to vector<2x32xf32>
    %101 = arith.addf %100, %99 : vector<2x32xf32>
    %102 = arith.divf %100, %101 : vector<2x32xf32>
    %103 = arith.mulf %96, %90 : vector<2x32xf32>
    %104 = arith.addf %81, %103 : vector<2x32xf32>
    %105 = math.tanh %104 : vector<2x32xf32>
    %cst_53 = arith.constant 1.000000e+00 : f32
    %106 = vector.broadcast %cst_53 : f32 to vector<2x32xf32>
    %107 = arith.subf %106, %102 : vector<2x32xf32>
    %108 = arith.mulf %107, %105 : vector<2x32xf32>
    %109 = arith.mulf %102, %72 : vector<2x32xf32>
    %110 = arith.addf %108, %109 : vector<2x32xf32>
    %c0_54 = arith.constant 0 : index
    %c1_55 = arith.constant 1 : index
    %c0_56 = arith.constant 0 : index
    %111 = vector.load %arg13[%c0_54, %c1_55, %c0_56] : memref<2x8x32xf32, #tpu.memory_space<vmem>>, vector<2x1x32xf32>
    %112 = vector.shape_cast %111 : vector<2x1x32xf32> to vector<2x32xf32>
    %113 = vector.shape_cast %110 : vector<2x32xf32> to vector<2x1x32xf32>
    tpu.vector_store %arg13[%c0_54, %c1_55, %c0_56], %113 {strides = array<i32>} : memref<2x8x32xf32, #tpu.memory_space<vmem>>, vector<2x1x32xf32>,
    %114 = vector.extract_strided_slice %8 {offsets = [0, 5, 0], sizes = [2, 1, 32], strides = [1, 1, 1]} : vector<2x8x32xf32> to vector<2x1x32xf32>
    %115 = vector.shape_cast %114 : vector<2x1x32xf32> to vector<2x32xf32>
    %116 = vector.extract_strided_slice %16 {offsets = [0, 5, 0], sizes = [2, 1, 32], strides = [1, 1, 1]} : vector<2x8x32xf32> to vector<2x1x32xf32>
    %117 = vector.shape_cast %116 : vector<2x1x32xf32> to vector<2x32xf32>
    %118 = vector.extract_strided_slice %24 {offsets = [0, 5, 0], sizes = [2, 1, 32], strides = [1, 1, 1]} : vector<2x8x32xf32> to vector<2x1x32xf32>
    %119 = vector.shape_cast %118 : vector<2x1x32xf32> to vector<2x32xf32>
    %cst_57 = arith.constant dense<0.000000e+00> : vector<2x32xf32>
    %120 = tpu.matmul %110, %26, %cst_57 {dimension_numbers = #tpu.dot_dimension_numbers<[1], [0], [0], [1], [0, 0, 1, 1], [], []>} : vector<2x32xf32>, vector<32x32xf32>, vector<2x32xf32> -> vector<2x32xf32>
    %121 = vector.broadcast %32 : vector<1x32xf32> to vector<2x32xf32>
    %122 = arith.addf %120, %121 : vector<2x32xf32>
    %cst_58 = arith.constant dense<0.000000e+00> : vector<2x32xf32>
    %123 = tpu.matmul %110, %28, %cst_58 {dimension_numbers = #tpu.dot_dimension_numbers<[1], [0], [0], [1], [0, 0, 1, 1], [], []>} : vector<2x32xf32>, vector<32x32xf32>, vector<2x32xf32> -> vector<2x32xf32>
    %124 = vector.broadcast %34 : vector<1x32xf32> to vector<2x32xf32>
    %125 = arith.addf %123, %124 : vector<2x32xf32>
    %cst_59 = arith.constant dense<0.000000e+00> : vector<2x32xf32>
    %126 = tpu.matmul %110, %30, %cst_59 {dimension_numbers = #tpu.dot_dimension_numbers<[1], [0], [0], [1], [0, 0, 1, 1], [], []>} : vector<2x32xf32>, vector<32x32xf32>, vector<2x32xf32> -> vector<2x32xf32>
    %127 = vector.broadcast %36 : vector<1x32xf32> to vector<2x32xf32>
    %128 = arith.addf %126, %127 : vector<2x32xf32>
    %129 = arith.addf %115, %122 : vector<2x32xf32>
    %130 = arith.negf %129 : vector<2x32xf32>
    %131 = math.exp %130 : vector<2x32xf32>
    %cst_60 = arith.constant 1.000000e+00 : f32
    %132 = vector.broadcast %cst_60 : f32 to vector<2x32xf32>
    %133 = arith.addf %132, %131 : vector<2x32xf32>
    %134 = arith.divf %132, %133 : vector<2x32xf32>
    %135 = arith.addf %117, %125 : vector<2x32xf32>
    %136 = arith.negf %135 : vector<2x32xf32>
    %137 = math.exp %136 : vector<2x32xf32>
    %cst_61 = arith.constant 1.000000e+00 : f32
    %138 = vector.broadcast %cst_61 : f32 to vector<2x32xf32>
    %139 = arith.addf %138, %137 : vector<2x32xf32>
    %140 = arith.divf %138, %139 : vector<2x32xf32>
    %141 = arith.mulf %134, %128 : vector<2x32xf32>
    %142 = arith.addf %119, %141 : vector<2x32xf32>
    %143 = math.tanh %142 : vector<2x32xf32>
    %cst_62 = arith.constant 1.000000e+00 : f32
    %144 = vector.broadcast %cst_62 : f32 to vector<2x32xf32>
    %145 = arith.subf %144, %140 : vector<2x32xf32>
    %146 = arith.mulf %145, %143 : vector<2x32xf32>
    %147 = arith.mulf %140, %110 : vector<2x32xf32>
    %148 = arith.addf %146, %147 : vector<2x32xf32>
    %c0_63 = arith.constant 0 : index
    %c2_64 = arith.constant 2 : index
    %c0_65 = arith.constant 0 : index
    %149 = vector.load %arg13[%c0_63, %c2_64, %c0_65] : memref<2x8x32xf32, #tpu.memory_space<vmem>>, vector<2x1x32xf32>
    %150 = vector.shape_cast %149 : vector<2x1x32xf32> to vector<2x32xf32>
    %151 = vector.shape_cast %148 : vector<2x32xf32> to vector<2x1x32xf32>
    tpu.vector_store %arg13[%c0_63, %c2_64, %c0_65], %151 {strides = array<i32>} : memref<2x8x32xf32, #tpu.memory_space<vmem>>, vector<2x1x32xf32>,
    %152 = vector.extract_strided_slice %8 {offsets = [0, 4, 0], sizes = [2, 1, 32], strides = [1, 1, 1]} : vector<2x8x32xf32> to vector<2x1x32xf32>
    %153 = vector.shape_cast %152 : vector<2x1x32xf32> to vector<2x32xf32>
    %154 = vector.extract_strided_slice %16 {offsets = [0, 4, 0], sizes = [2, 1, 32], strides = [1, 1, 1]} : vector<2x8x32xf32> to vector<2x1x32xf32>
    %155 = vector.shape_cast %154 : vector<2x1x32xf32> to vector<2x32xf32>
    %156 = vector.extract_strided_slice %24 {offsets = [0, 4, 0], sizes = [2, 1, 32], strides = [1, 1, 1]} : vector<2x8x32xf32> to vector<2x1x32xf32>
    %157 = vector.shape_cast %156 : vector<2x1x32xf32> to vector<2x32xf32>
    %cst_66 = arith.constant dense<0.000000e+00> : vector<2x32xf32>
    %158 = tpu.matmul %148, %26, %cst_66 {dimension_numbers = #tpu.dot_dimension_numbers<[1], [0], [0], [1], [0, 0, 1, 1], [], []>} : vector<2x32xf32>, vector<32x32xf32>, vector<2x32xf32> -> vector<2x32xf32>
    %159 = vector.broadcast %32 : vector<1x32xf32> to vector<2x32xf32>
    %160 = arith.addf %158, %159 : vector<2x32xf32>
    %cst_67 = arith.constant dense<0.000000e+00> : vector<2x32xf32>
    %161 = tpu.matmul %148, %28, %cst_67 {dimension_numbers = #tpu.dot_dimension_numbers<[1], [0], [0], [1], [0, 0, 1, 1], [], []>} : vector<2x32xf32>, vector<32x32xf32>, vector<2x32xf32> -> vector<2x32xf32>
    %162 = vector.broadcast %34 : vector<1x32xf32> to vector<2x32xf32>
    %163 = arith.addf %161, %162 : vector<2x32xf32>
    %cst_68 = arith.constant dense<0.000000e+00> : vector<2x32xf32>
    %164 = tpu.matmul %148, %30, %cst_68 {dimension_numbers = #tpu.dot_dimension_numbers<[1], [0], [0], [1], [0, 0, 1, 1], [], []>} : vector<2x32xf32>, vector<32x32xf32>, vector<2x32xf32> -> vector<2x32xf32>
    %165 = vector.broadcast %36 : vector<1x32xf32> to vector<2x32xf32>
    %166 = arith.addf %164, %165 : vector<2x32xf32>
    %167 = arith.addf %153, %160 : vector<2x32xf32>
    %168 = arith.negf %167 : vector<2x32xf32>
    %169 = math.exp %168 : vector<2x32xf32>
    %cst_69 = arith.constant 1.000000e+00 : f32
    %170 = vector.broadcast %cst_69 : f32 to vector<2x32xf32>
    %171 = arith.addf %170, %169 : vector<2x32xf32>
    %172 = arith.divf %170, %171 : vector<2x32xf32>
    %173 = arith.addf %155, %163 : vector<2x32xf32>
    %174 = arith.negf %173 : vector<2x32xf32>
    %175 = math.exp %174 : vector<2x32xf32>
    %cst_70 = arith.constant 1.000000e+00 : f32
    %176 = vector.broadcast %cst_70 : f32 to vector<2x32xf32>
    %177 = arith.addf %176, %175 : vector<2x32xf32>
    %178 = arith.divf %176, %177 : vector<2x32xf32>
    %179 = arith.mulf %172, %166 : vector<2x32xf32>
    %180 = arith.addf %157, %179 : vector<2x32xf32>
    %181 = math.tanh %180 : vector<2x32xf32>
    %cst_71 = arith.constant 1.000000e+00 : f32
    %182 = vector.broadcast %cst_71 : f32 to vector<2x32xf32>
    %183 = arith.subf %182, %178 : vector<2x32xf32>
    %184 = arith.mulf %183, %181 : vector<2x32xf32>
    %185 = arith.mulf %178, %148 : vector<2x32xf32>
    %186 = arith.addf %184, %185 : vector<2x32xf32>
    %c0_72 = arith.constant 0 : index
    %c3 = arith.constant 3 : index
    %c0_73 = arith.constant 0 : index
    %187 = vector.load %arg13[%c0_72, %c3, %c0_73] : memref<2x8x32xf32, #tpu.memory_space<vmem>>, vector<2x1x32xf32>
    %188 = vector.shape_cast %187 : vector<2x1x32xf32> to vector<2x32xf32>
    %189 = vector.shape_cast %186 : vector<2x32xf32> to vector<2x1x32xf32>
    tpu.vector_store %arg13[%c0_72, %c3, %c0_73], %189 {strides = array<i32>} : memref<2x8x32xf32, #tpu.memory_space<vmem>>, vector<2x1x32xf32>,
    %190 = vector.extract_strided_slice %8 {offsets = [0, 3, 0], sizes = [2, 1, 32], strides = [1, 1, 1]} : vector<2x8x32xf32> to vector<2x1x32xf32>
    %191 = vector.shape_cast %190 : vector<2x1x32xf32> to vector<2x32xf32>
    %192 = vector.extract_strided_slice %16 {offsets = [0, 3, 0], sizes = [2, 1, 32], strides = [1, 1, 1]} : vector<2x8x32xf32> to vector<2x1x32xf32>
    %193 = vector.shape_cast %192 : vector<2x1x32xf32> to vector<2x32xf32>
    %194 = vector.extract_strided_slice %24 {offsets = [0, 3, 0], sizes = [2, 1, 32], strides = [1, 1, 1]} : vector<2x8x32xf32> to vector<2x1x32xf32>
    %195 = vector.shape_cast %194 : vector<2x1x32xf32> to vector<2x32xf32>
    %cst_74 = arith.constant dense<0.000000e+00> : vector<2x32xf32>
    %196 = tpu.matmul %186, %26, %cst_74 {dimension_numbers = #tpu.dot_dimension_numbers<[1], [0], [0], [1], [0, 0, 1, 1], [], []>} : vector<2x32xf32>, vector<32x32xf32>, vector<2x32xf32> -> vector<2x32xf32>
    %197 = vector.broadcast %32 : vector<1x32xf32> to vector<2x32xf32>
    %198 = arith.addf %196, %197 : vector<2x32xf32>
    %cst_75 = arith.constant dense<0.000000e+00> : vector<2x32xf32>
    %199 = tpu.matmul %186, %28, %cst_75 {dimension_numbers = #tpu.dot_dimension_numbers<[1], [0], [0], [1], [0, 0, 1, 1], [], []>} : vector<2x32xf32>, vector<32x32xf32>, vector<2x32xf32> -> vector<2x32xf32>
    %200 = vector.broadcast %34 : vector<1x32xf32> to vector<2x32xf32>
    %201 = arith.addf %199, %200 : vector<2x32xf32>
    %cst_76 = arith.constant dense<0.000000e+00> : vector<2x32xf32>
    %202 = tpu.matmul %186, %30, %cst_76 {dimension_numbers = #tpu.dot_dimension_numbers<[1], [0], [0], [1], [0, 0, 1, 1], [], []>} : vector<2x32xf32>, vector<32x32xf32>, vector<2x32xf32> -> vector<2x32xf32>
    %203 = vector.broadcast %36 : vector<1x32xf32> to vector<2x32xf32>
    %204 = arith.addf %202, %203 : vector<2x32xf32>
    %205 = arith.addf %191, %198 : vector<2x32xf32>
    %206 = arith.negf %205 : vector<2x32xf32>
    %207 = math.exp %206 : vector<2x32xf32>
    %cst_77 = arith.constant 1.000000e+00 : f32
    %208 = vector.broadcast %cst_77 : f32 to vector<2x32xf32>
    %209 = arith.addf %208, %207 : vector<2x32xf32>
    %210 = arith.divf %208, %209 : vector<2x32xf32>
    %211 = arith.addf %193, %201 : vector<2x32xf32>
    %212 = arith.negf %211 : vector<2x32xf32>
    %213 = math.exp %212 : vector<2x32xf32>
    %cst_78 = arith.constant 1.000000e+00 : f32
    %214 = vector.broadcast %cst_78 : f32 to vector<2x32xf32>
    %215 = arith.addf %214, %213 : vector<2x32xf32>
    %216 = arith.divf %214, %215 : vector<2x32xf32>
    %217 = arith.mulf %210, %204 : vector<2x32xf32>
    %218 = arith.addf %195, %217 : vector<2x32xf32>
    %219 = math.tanh %218 : vector<2x32xf32>
    %cst_79 = arith.constant 1.000000e+00 : f32
    %220 = vector.broadcast %cst_79 : f32 to vector<2x32xf32>
    %221 = arith.subf %220, %216 : vector<2x32xf32>
    %222 = arith.mulf %221, %219 : vector<2x32xf32>
    %223 = arith.mulf %216, %186 : vector<2x32xf32>
    %224 = arith.addf %222, %223 : vector<2x32xf32>
    %c0_80 = arith.constant 0 : index
    %c4 = arith.constant 4 : index
    %c0_81 = arith.constant 0 : index
    %225 = vector.load %arg13[%c0_80, %c4, %c0_81] : memref<2x8x32xf32, #tpu.memory_space<vmem>>, vector<2x1x32xf32>
    %226 = vector.shape_cast %225 : vector<2x1x32xf32> to vector<2x32xf32>
    %227 = vector.shape_cast %224 : vector<2x32xf32> to vector<2x1x32xf32>
    tpu.vector_store %arg13[%c0_80, %c4, %c0_81], %227 {strides = array<i32>} : memref<2x8x32xf32, #tpu.memory_space<vmem>>, vector<2x1x32xf32>,
    %228 = vector.extract_strided_slice %8 {offsets = [0, 2, 0], sizes = [2, 1, 32], strides = [1, 1, 1]} : vector<2x8x32xf32> to vector<2x1x32xf32>
    %229 = vector.shape_cast %228 : vector<2x1x32xf32> to vector<2x32xf32>
    %230 = vector.extract_strided_slice %16 {offsets = [0, 2, 0], sizes = [2, 1, 32], strides = [1, 1, 1]} : vector<2x8x32xf32> to vector<2x1x32xf32>
    %231 = vector.shape_cast %230 : vector<2x1x32xf32> to vector<2x32xf32>
    %232 = vector.extract_strided_slice %24 {offsets = [0, 2, 0], sizes = [2, 1, 32], strides = [1, 1, 1]} : vector<2x8x32xf32> to vector<2x1x32xf32>
    %233 = vector.shape_cast %232 : vector<2x1x32xf32> to vector<2x32xf32>
    %cst_82 = arith.constant dense<0.000000e+00> : vector<2x32xf32>
    %234 = tpu.matmul %224, %26, %cst_82 {dimension_numbers = #tpu.dot_dimension_numbers<[1], [0], [0], [1], [0, 0, 1, 1], [], []>} : vector<2x32xf32>, vector<32x32xf32>, vector<2x32xf32> -> vector<2x32xf32>
    %235 = vector.broadcast %32 : vector<1x32xf32> to vector<2x32xf32>
    %236 = arith.addf %234, %235 : vector<2x32xf32>
    %cst_83 = arith.constant dense<0.000000e+00> : vector<2x32xf32>
    %237 = tpu.matmul %224, %28, %cst_83 {dimension_numbers = #tpu.dot_dimension_numbers<[1], [0], [0], [1], [0, 0, 1, 1], [], []>} : vector<2x32xf32>, vector<32x32xf32>, vector<2x32xf32> -> vector<2x32xf32>
    %238 = vector.broadcast %34 : vector<1x32xf32> to vector<2x32xf32>
    %239 = arith.addf %237, %238 : vector<2x32xf32>
    %cst_84 = arith.constant dense<0.000000e+00> : vector<2x32xf32>
    %240 = tpu.matmul %224, %30, %cst_84 {dimension_numbers = #tpu.dot_dimension_numbers<[1], [0], [0], [1], [0, 0, 1, 1], [], []>} : vector<2x32xf32>, vector<32x32xf32>, vector<2x32xf32> -> vector<2x32xf32>
    %241 = vector.broadcast %36 : vector<1x32xf32> to vector<2x32xf32>
    %242 = arith.addf %240, %241 : vector<2x32xf32>
    %243 = arith.addf %229, %236 : vector<2x32xf32>
    %244 = arith.negf %243 : vector<2x32xf32>
    %245 = math.exp %244 : vector<2x32xf32>
    %cst_85 = arith.constant 1.000000e+00 : f32
    %246 = vector.broadcast %cst_85 : f32 to vector<2x32xf32>
    %247 = arith.addf %246, %245 : vector<2x32xf32>
    %248 = arith.divf %246, %247 : vector<2x32xf32>
    %249 = arith.addf %231, %239 : vector<2x32xf32>
    %250 = arith.negf %249 : vector<2x32xf32>
    %251 = math.exp %250 : vector<2x32xf32>
    %cst_86 = arith.constant 1.000000e+00 : f32
    %252 = vector.broadcast %cst_86 : f32 to vector<2x32xf32>
    %253 = arith.addf %252, %251 : vector<2x32xf32>
    %254 = arith.divf %252, %253 : vector<2x32xf32>
    %255 = arith.mulf %248, %242 : vector<2x32xf32>
    %256 = arith.addf %233, %255 : vector<2x32xf32>
    %257 = math.tanh %256 : vector<2x32xf32>
    %cst_87 = arith.constant 1.000000e+00 : f32
    %258 = vector.broadcast %cst_87 : f32 to vector<2x32xf32>
    %259 = arith.subf %258, %254 : vector<2x32xf32>
    %260 = arith.mulf %259, %257 : vector<2x32xf32>
    %261 = arith.mulf %254, %224 : vector<2x32xf32>
    %262 = arith.addf %260, %261 : vector<2x32xf32>
    %c0_88 = arith.constant 0 : index
    %c5 = arith.constant 5 : index
    %c0_89 = arith.constant 0 : index
    %263 = vector.load %arg13[%c0_88, %c5, %c0_89] : memref<2x8x32xf32, #tpu.memory_space<vmem>>, vector<2x1x32xf32>
    %264 = vector.shape_cast %263 : vector<2x1x32xf32> to vector<2x32xf32>
    %265 = vector.shape_cast %262 : vector<2x32xf32> to vector<2x1x32xf32>
    tpu.vector_store %arg13[%c0_88, %c5, %c0_89], %265 {strides = array<i32>} : memref<2x8x32xf32, #tpu.memory_space<vmem>>, vector<2x1x32xf32>,
    %266 = vector.extract_strided_slice %8 {offsets = [0, 1, 0], sizes = [2, 1, 32], strides = [1, 1, 1]} : vector<2x8x32xf32> to vector<2x1x32xf32>
    %267 = vector.shape_cast %266 : vector<2x1x32xf32> to vector<2x32xf32>
    %268 = vector.extract_strided_slice %16 {offsets = [0, 1, 0], sizes = [2, 1, 32], strides = [1, 1, 1]} : vector<2x8x32xf32> to vector<2x1x32xf32>
    %269 = vector.shape_cast %268 : vector<2x1x32xf32> to vector<2x32xf32>
    %270 = vector.extract_strided_slice %24 {offsets = [0, 1, 0], sizes = [2, 1, 32], strides = [1, 1, 1]} : vector<2x8x32xf32> to vector<2x1x32xf32>
    %271 = vector.shape_cast %270 : vector<2x1x32xf32> to vector<2x32xf32>
    %cst_90 = arith.constant dense<0.000000e+00> : vector<2x32xf32>
    %272 = tpu.matmul %262, %26, %cst_90 {dimension_numbers = #tpu.dot_dimension_numbers<[1], [0], [0], [1], [0, 0, 1, 1], [], []>} : vector<2x32xf32>, vector<32x32xf32>, vector<2x32xf32> -> vector<2x32xf32>
    %273 = vector.broadcast %32 : vector<1x32xf32> to vector<2x32xf32>
    %274 = arith.addf %272, %273 : vector<2x32xf32>
    %cst_91 = arith.constant dense<0.000000e+00> : vector<2x32xf32>
    %275 = tpu.matmul %262, %28, %cst_91 {dimension_numbers = #tpu.dot_dimension_numbers<[1], [0], [0], [1], [0, 0, 1, 1], [], []>} : vector<2x32xf32>, vector<32x32xf32>, vector<2x32xf32> -> vector<2x32xf32>
    %276 = vector.broadcast %34 : vector<1x32xf32> to vector<2x32xf32>
    %277 = arith.addf %275, %276 : vector<2x32xf32>
    %cst_92 = arith.constant dense<0.000000e+00> : vector<2x32xf32>
    %278 = tpu.matmul %262, %30, %cst_92 {dimension_numbers = #tpu.dot_dimension_numbers<[1], [0], [0], [1], [0, 0, 1, 1], [], []>} : vector<2x32xf32>, vector<32x32xf32>, vector<2x32xf32> -> vector<2x32xf32>
    %279 = vector.broadcast %36 : vector<1x32xf32> to vector<2x32xf32>
    %280 = arith.addf %278, %279 : vector<2x32xf32>
    %281 = arith.addf %267, %274 : vector<2x32xf32>
    %282 = arith.negf %281 : vector<2x32xf32>
    %283 = math.exp %282 : vector<2x32xf32>
    %cst_93 = arith.constant 1.000000e+00 : f32
    %284 = vector.broadcast %cst_93 : f32 to vector<2x32xf32>
    %285 = arith.addf %284, %283 : vector<2x32xf32>
    %286 = arith.divf %284, %285 : vector<2x32xf32>
    %287 = arith.addf %269, %277 : vector<2x32xf32>
    %288 = arith.negf %287 : vector<2x32xf32>
    %289 = math.exp %288 : vector<2x32xf32>
    %cst_94 = arith.constant 1.000000e+00 : f32
    %290 = vector.broadcast %cst_94 : f32 to vector<2x32xf32>
    %291 = arith.addf %290, %289 : vector<2x32xf32>
    %292 = arith.divf %290, %291 : vector<2x32xf32>
    %293 = arith.mulf %286, %280 : vector<2x32xf32>
    %294 = arith.addf %271, %293 : vector<2x32xf32>
    %295 = math.tanh %294 : vector<2x32xf32>
    %cst_95 = arith.constant 1.000000e+00 : f32
    %296 = vector.broadcast %cst_95 : f32 to vector<2x32xf32>
    %297 = arith.subf %296, %292 : vector<2x32xf32>
    %298 = arith.mulf %297, %295 : vector<2x32xf32>
    %299 = arith.mulf %292, %262 : vector<2x32xf32>
    %300 = arith.addf %298, %299 : vector<2x32xf32>
    %c0_96 = arith.constant 0 : index
    %c6 = arith.constant 6 : index
    %c0_97 = arith.constant 0 : index
    %301 = vector.load %arg13[%c0_96, %c6, %c0_97] : memref<2x8x32xf32, #tpu.memory_space<vmem>>, vector<2x1x32xf32>
    %302 = vector.shape_cast %301 : vector<2x1x32xf32> to vector<2x32xf32>
    %303 = vector.shape_cast %300 : vector<2x32xf32> to vector<2x1x32xf32>
    tpu.vector_store %arg13[%c0_96, %c6, %c0_97], %303 {strides = array<i32>} : memref<2x8x32xf32, #tpu.memory_space<vmem>>, vector<2x1x32xf32>,
    %304 = vector.extract_strided_slice %8 {offsets = [0, 0, 0], sizes = [2, 1, 32], strides = [1, 1, 1]} : vector<2x8x32xf32> to vector<2x1x32xf32>
    %305 = vector.shape_cast %304 : vector<2x1x32xf32> to vector<2x32xf32>
    %306 = vector.extract_strided_slice %16 {offsets = [0, 0, 0], sizes = [2, 1, 32], strides = [1, 1, 1]} : vector<2x8x32xf32> to vector<2x1x32xf32>
    %307 = vector.shape_cast %306 : vector<2x1x32xf32> to vector<2x32xf32>
    %308 = vector.extract_strided_slice %24 {offsets = [0, 0, 0], sizes = [2, 1, 32], strides = [1, 1, 1]} : vector<2x8x32xf32> to vector<2x1x32xf32>
    %309 = vector.shape_cast %308 : vector<2x1x32xf32> to vector<2x32xf32>
    %cst_98 = arith.constant dense<0.000000e+00> : vector<2x32xf32>
    %310 = tpu.matmul %300, %26, %cst_98 {dimension_numbers = #tpu.dot_dimension_numbers<[1], [0], [0], [1], [0, 0, 1, 1], [], []>} : vector<2x32xf32>, vector<32x32xf32>, vector<2x32xf32> -> vector<2x32xf32>
    %311 = vector.broadcast %32 : vector<1x32xf32> to vector<2x32xf32>
    %312 = arith.addf %310, %311 : vector<2x32xf32>
    %cst_99 = arith.constant dense<0.000000e+00> : vector<2x32xf32>
    %313 = tpu.matmul %300, %28, %cst_99 {dimension_numbers = #tpu.dot_dimension_numbers<[1], [0], [0], [1], [0, 0, 1, 1], [], []>} : vector<2x32xf32>, vector<32x32xf32>, vector<2x32xf32> -> vector<2x32xf32>
    %314 = vector.broadcast %34 : vector<1x32xf32> to vector<2x32xf32>
    %315 = arith.addf %313, %314 : vector<2x32xf32>
    %cst_100 = arith.constant dense<0.000000e+00> : vector<2x32xf32>
    %316 = tpu.matmul %300, %30, %cst_100 {dimension_numbers = #tpu.dot_dimension_numbers<[1], [0], [0], [1], [0, 0, 1, 1], [], []>} : vector<2x32xf32>, vector<32x32xf32>, vector<2x32xf32> -> vector<2x32xf32>
    %317 = vector.broadcast %36 : vector<1x32xf32> to vector<2x32xf32>
    %318 = arith.addf %316, %317 : vector<2x32xf32>
    %319 = arith.addf %305, %312 : vector<2x32xf32>
    %320 = arith.negf %319 : vector<2x32xf32>
    %321 = math.exp %320 : vector<2x32xf32>
    %cst_101 = arith.constant 1.000000e+00 : f32
    %322 = vector.broadcast %cst_101 : f32 to vector<2x32xf32>
    %323 = arith.addf %322, %321 : vector<2x32xf32>
    %324 = arith.divf %322, %323 : vector<2x32xf32>
    %325 = arith.addf %307, %315 : vector<2x32xf32>
    %326 = arith.negf %325 : vector<2x32xf32>
    %327 = math.exp %326 : vector<2x32xf32>
    %cst_102 = arith.constant 1.000000e+00 : f32
    %328 = vector.broadcast %cst_102 : f32 to vector<2x32xf32>
    %329 = arith.addf %328, %327 : vector<2x32xf32>
    %330 = arith.divf %328, %329 : vector<2x32xf32>
    %331 = arith.mulf %324, %318 : vector<2x32xf32>
    %332 = arith.addf %309, %331 : vector<2x32xf32>
    %333 = math.tanh %332 : vector<2x32xf32>
    %cst_103 = arith.constant 1.000000e+00 : f32
    %334 = vector.broadcast %cst_103 : f32 to vector<2x32xf32>
    %335 = arith.subf %334, %330 : vector<2x32xf32>
    %336 = arith.mulf %335, %333 : vector<2x32xf32>
    %337 = arith.mulf %330, %300 : vector<2x32xf32>
    %338 = arith.addf %336, %337 : vector<2x32xf32>
    %c0_104 = arith.constant 0 : index
    %c7 = arith.constant 7 : index
    %c0_105 = arith.constant 0 : index
    %339 = vector.load %arg13[%c0_104, %c7, %c0_105] : memref<2x8x32xf32, #tpu.memory_space<vmem>>, vector<2x1x32xf32>
    %340 = vector.shape_cast %339 : vector<2x1x32xf32> to vector<2x32xf32>
    %341 = vector.shape_cast %338 : vector<2x32xf32> to vector<2x1x32xf32>
    tpu.vector_store %arg13[%c0_104, %c7, %c0_105], %341 {strides = array<i32>} : memref<2x8x32xf32, #tpu.memory_space<vmem>>, vector<2x1x32xf32>,
    %c0_106 = arith.constant 0 : index
    %c0_107 = arith.constant 0 : index
    %c0_108 = arith.constant 0 : index
    %342 = vector.load %arg13[%c0_106, %c0_107, %c0_108] : memref<2x8x32xf32, #tpu.memory_space<vmem>>, vector<2x8x32xf32>
    %c0_109 = arith.constant 0 : index
    %c0_110 = arith.constant 0 : index
    %c0_111 = arith.constant 0 : index
    %343 = vector.load %arg6[%c0_109, %c0_110, %c0_111] : memref<3x32x32xf32, #tpu.memory_space<vmem>>, vector<1x32x32xf32>
    %344 = vector.shape_cast %343 : vector<1x32x32xf32> to vector<32x32xf32>
    "tpu.trace_start"() <{level = 10 : i32, message = "btd,dh->bth"}> : () -> ()
    %cst_112 = arith.constant dense<0.000000e+00> : vector<2x8x32xf32>
    %345 = tpu.matmul %342, %344, %cst_112 {dimension_numbers = #tpu.dot_dimension_numbers<[2], [0], [0, 1], [1], [0, 0, 0, 1, 1, 1], [], []>} : vector<2x8x32xf32>, vector<32x32xf32>, vector<2x8x32xf32> -> vector<2x8x32xf32>
    "tpu.trace_stop"() : () -> ()
    %c0_113 = arith.constant 0 : index
    %c0_114 = arith.constant 0 : index
    %c0_115 = arith.constant 0 : index
    %346 = vector.load %arg8[%c0_113, %c0_114, %c0_115] : memref<3x1x32xf32, #tpu.memory_space<vmem>>, vector<1x1x32xf32>
    %347 = vector.shape_cast %346 : vector<1x1x32xf32> to vector<1x32xf32>
    %348 = vector.shape_cast %347 : vector<1x32xf32> to vector<1x1x32xf32>
    %349 = vector.broadcast %348 : vector<1x1x32xf32> to vector<2x8x32xf32>
    %350 = arith.addf %345, %349 : vector<2x8x32xf32>
    %c1_116 = arith.constant 1 : index
    %c0_117 = arith.constant 0 : index
    %c0_118 = arith.constant 0 : index
    %351 = vector.load %arg6[%c1_116, %c0_117, %c0_118] : memref<3x32x32xf32, #tpu.memory_space<vmem>>, vector<1x32x32xf32>
    %352 = vector.shape_cast %351 : vector<1x32x32xf32> to vector<32x32xf32>
    "tpu.trace_start"() <{level = 10 : i32, message = "btd,dh->bth"}> : () -> ()
    %cst_119 = arith.constant dense<0.000000e+00> : vector<2x8x32xf32>
    %353 = tpu.matmul %342, %352, %cst_119 {dimension_numbers = #tpu.dot_dimension_numbers<[2], [0], [0, 1], [1], [0, 0, 0, 1, 1, 1], [], []>} : vector<2x8x32xf32>, vector<32x32xf32>, vector<2x8x32xf32> -> vector<2x8x32xf32>
    "tpu.trace_stop"() : () -> ()
    %c1_120 = arith.constant 1 : index
    %c0_121 = arith.constant 0 : index
    %c0_122 = arith.constant 0 : index
    %354 = vector.load %arg8[%c1_120, %c0_121, %c0_122] : memref<3x1x32xf32, #tpu.memory_space<vmem>>, vector<1x1x32xf32>
    %355 = vector.shape_cast %354 : vector<1x1x32xf32> to vector<1x32xf32>
    %356 = vector.shape_cast %355 : vector<1x32xf32> to vector<1x1x32xf32>
    %357 = vector.broadcast %356 : vector<1x1x32xf32> to vector<2x8x32xf32>
    %358 = arith.addf %353, %357 : vector<2x8x32xf32>
    %c2_123 = arith.constant 2 : index
    %c0_124 = arith.constant 0 : index
    %c0_125 = arith.constant 0 : index
    %359 = vector.load %arg6[%c2_123, %c0_124, %c0_125] : memref<3x32x32xf32, #tpu.memory_space<vmem>>, vector<1x32x32xf32>
    %360 = vector.shape_cast %359 : vector<1x32x32xf32> to vector<32x32xf32>
    "tpu.trace_start"() <{level = 10 : i32, message = "btd,dh->bth"}> : () -> ()
    %cst_126 = arith.constant dense<0.000000e+00> : vector<2x8x32xf32>
    %361 = tpu.matmul %342, %360, %cst_126 {dimension_numbers = #tpu.dot_dimension_numbers<[2], [0], [0, 1], [1], [0, 0, 0, 1, 1, 1], [], []>} : vector<2x8x32xf32>, vector<32x32xf32>, vector<2x8x32xf32> -> vector<2x8x32xf32>
    "tpu.trace_stop"() : () -> ()
    %c2_127 = arith.constant 2 : index
    %c0_128 = arith.constant 0 : index
    %c0_129 = arith.constant 0 : index
    %362 = vector.load %arg8[%c2_127, %c0_128, %c0_129] : memref<3x1x32xf32, #tpu.memory_space<vmem>>, vector<1x1x32xf32>
    %363 = vector.shape_cast %362 : vector<1x1x32xf32> to vector<1x32xf32>
    %364 = vector.shape_cast %363 : vector<1x32xf32> to vector<1x1x32xf32>
    %365 = vector.broadcast %364 : vector<1x1x32xf32> to vector<2x8x32xf32>
    %366 = arith.addf %361, %365 : vector<2x8x32xf32>
    %c0_130 = arith.constant 0 : index
    %c0_131 = arith.constant 0 : index
    %c0_132 = arith.constant 0 : index
    %367 = vector.load %arg7[%c0_130, %c0_131, %c0_132] : memref<3x32x32xf32, #tpu.memory_space<vmem>>, vector<1x32x32xf32>
    %368 = vector.shape_cast %367 : vector<1x32x32xf32> to vector<32x32xf32>
    %c1_133 = arith.constant 1 : index
    %c0_134 = arith.constant 0 : index
    %c0_135 = arith.constant 0 : index
    %369 = vector.load %arg7[%c1_133, %c0_134, %c0_135] : memref<3x32x32xf32, #tpu.memory_space<vmem>>, vector<1x32x32xf32>
    %370 = vector.shape_cast %369 : vector<1x32x32xf32> to vector<32x32xf32>
    %c2_136 = arith.constant 2 : index
    %c0_137 = arith.constant 0 : index
    %c0_138 = arith.constant 0 : index
    %371 = vector.load %arg7[%c2_136, %c0_137, %c0_138] : memref<3x32x32xf32, #tpu.memory_space<vmem>>, vector<1x32x32xf32>
    %372 = vector.shape_cast %371 : vector<1x32x32xf32> to vector<32x32xf32>
    %c0_139 = arith.constant 0 : index
    %c0_140 = arith.constant 0 : index
    %c0_141 = arith.constant 0 : index
    %373 = vector.load %arg9[%c0_139, %c0_140, %c0_141] : memref<3x1x32xf32, #tpu.memory_space<vmem>>, vector<1x1x32xf32>
    %374 = vector.shape_cast %373 : vector<1x1x32xf32> to vector<1x32xf32>
    %c1_142 = arith.constant 1 : index
    %c0_143 = arith.constant 0 : index
    %c0_144 = arith.constant 0 : index
    %375 = vector.load %arg9[%c1_142, %c0_143, %c0_144] : memref<3x1x32xf32, #tpu.memory_space<vmem>>, vector<1x1x32xf32>
    %376 = vector.shape_cast %375 : vector<1x1x32xf32> to vector<1x32xf32>
    %c2_145 = arith.constant 2 : index
    %c0_146 = arith.constant 0 : index
    %c0_147 = arith.constant 0 : index
    %377 = vector.load %arg9[%c2_145, %c0_146, %c0_147] : memref<3x1x32xf32, #tpu.memory_space<vmem>>, vector<1x1x32xf32>
    %378 = vector.shape_cast %377 : vector<1x1x32xf32> to vector<1x32xf32>
    %cst_148 = arith.constant 0.000000e+00 : f32
    %379 = vector.broadcast %cst_148 : f32 to vector<2x32xf32>
    %380 = vector.extract_strided_slice %350 {offsets = [0, 0, 0], sizes = [2, 1, 32], strides = [1, 1, 1]} : vector<2x8x32xf32> to vector<2x1x32xf32>
    %381 = vector.shape_cast %380 : vector<2x1x32xf32> to vector<2x32xf32>
    %382 = vector.extract_strided_slice %358 {offsets = [0, 0, 0], sizes = [2, 1, 32], strides = [1, 1, 1]} : vector<2x8x32xf32> to vector<2x1x32xf32>
    %383 = vector.shape_cast %382 : vector<2x1x32xf32> to vector<2x32xf32>
    %384 = vector.extract_strided_slice %366 {offsets = [0, 0, 0], sizes = [2, 1, 32], strides = [1, 1, 1]} : vector<2x8x32xf32> to vector<2x1x32xf32>
    %385 = vector.shape_cast %384 : vector<2x1x32xf32> to vector<2x32xf32>
    %cst_149 = arith.constant dense<0.000000e+00> : vector<2x32xf32>
    %386 = tpu.matmul %379, %368, %cst_149 {dimension_numbers = #tpu.dot_dimension_numbers<[1], [0], [0], [1], [0, 0, 1, 1], [], []>} : vector<2x32xf32>, vector<32x32xf32>, vector<2x32xf32> -> vector<2x32xf32>
    %387 = vector.broadcast %374 : vector<1x32xf32> to vector<2x32xf32>
    %388 = arith.addf %386, %387 : vector<2x32xf32>
    %cst_150 = arith.constant dense<0.000000e+00> : vector<2x32xf32>
    %389 = tpu.matmul %379, %370, %cst_150 {dimension_numbers = #tpu.dot_dimension_numbers<[1], [0], [0], [1], [0, 0, 1, 1], [], []>} : vector<2x32xf32>, vector<32x32xf32>, vector<2x32xf32> -> vector<2x32xf32>
    %390 = vector.broadcast %376 : vector<1x32xf32> to vector<2x32xf32>
    %391 = arith.addf %389, %390 : vector<2x32xf32>
    %cst_151 = arith.constant dense<0.000000e+00> : vector<2x32xf32>
    %392 = tpu.matmul %379, %372, %cst_151 {dimension_numbers = #tpu.dot_dimension_numbers<[1], [0], [0], [1], [0, 0, 1, 1], [], []>} : vector<2x32xf32>, vector<32x32xf32>, vector<2x32xf32> -> vector<2x32xf32>
    %393 = vector.broadcast %378 : vector<1x32xf32> to vector<2x32xf32>
    %394 = arith.addf %392, %393 : vector<2x32xf32>
    %395 = arith.addf %381, %388 : vector<2x32xf32>
    %396 = arith.negf %395 : vector<2x32xf32>
    %397 = math.exp %396 : vector<2x32xf32>
    %cst_152 = arith.constant 1.000000e+00 : f32
    %398 = vector.broadcast %cst_152 : f32 to vector<2x32xf32>
    %399 = arith.addf %398, %397 : vector<2x32xf32>
    %400 = arith.divf %398, %399 : vector<2x32xf32>
    %401 = arith.addf %383, %391 : vector<2x32xf32>
    %402 = arith.negf %401 : vector<2x32xf32>
    %403 = math.exp %402 : vector<2x32xf32>
    %cst_153 = arith.constant 1.000000e+00 : f32
    %404 = vector.broadcast %cst_153 : f32 to vector<2x32xf32>
    %405 = arith.addf %404, %403 : vector<2x32xf32>
    %406 = arith.divf %404, %405 : vector<2x32xf32>
    %407 = arith.mulf %400, %394 : vector<2x32xf32>
    %408 = arith.addf %385, %407 : vector<2x32xf32>
    %409 = math.tanh %408 : vector<2x32xf32>
    %cst_154 = arith.constant 1.000000e+00 : f32
    %410 = vector.broadcast %cst_154 : f32 to vector<2x32xf32>
    %411 = arith.subf %410, %406 : vector<2x32xf32>
    %412 = arith.mulf %411, %409 : vector<2x32xf32>
    %413 = arith.mulf %406, %379 : vector<2x32xf32>
    %414 = arith.addf %412, %413 : vector<2x32xf32>
    %415 = vector.extract_strided_slice %350 {offsets = [0, 1, 0], sizes = [2, 1, 32], strides = [1, 1, 1]} : vector<2x8x32xf32> to vector<2x1x32xf32>
    %416 = vector.shape_cast %415 : vector<2x1x32xf32> to vector<2x32xf32>
    %417 = vector.extract_strided_slice %358 {offsets = [0, 1, 0], sizes = [2, 1, 32], strides = [1, 1, 1]} : vector<2x8x32xf32> to vector<2x1x32xf32>
    %418 = vector.shape_cast %417 : vector<2x1x32xf32> to vector<2x32xf32>
    %419 = vector.extract_strided_slice %366 {offsets = [0, 1, 0], sizes = [2, 1, 32], strides = [1, 1, 1]} : vector<2x8x32xf32> to vector<2x1x32xf32>
    %420 = vector.shape_cast %419 : vector<2x1x32xf32> to vector<2x32xf32>
    %cst_155 = arith.constant dense<0.000000e+00> : vector<2x32xf32>
    %421 = tpu.matmul %414, %368, %cst_155 {dimension_numbers = #tpu.dot_dimension_numbers<[1], [0], [0], [1], [0, 0, 1, 1], [], []>} : vector<2x32xf32>, vector<32x32xf32>, vector<2x32xf32> -> vector<2x32xf32>
    %422 = vector.broadcast %374 : vector<1x32xf32> to vector<2x32xf32>
    %423 = arith.addf %421, %422 : vector<2x32xf32>
    %cst_156 = arith.constant dense<0.000000e+00> : vector<2x32xf32>
    %424 = tpu.matmul %414, %370, %cst_156 {dimension_numbers = #tpu.dot_dimension_numbers<[1], [0], [0], [1], [0, 0, 1, 1], [], []>} : vector<2x32xf32>, vector<32x32xf32>, vector<2x32xf32> -> vector<2x32xf32>
    %425 = vector.broadcast %376 : vector<1x32xf32> to vector<2x32xf32>
    %426 = arith.addf %424, %425 : vector<2x32xf32>
    %cst_157 = arith.constant dense<0.000000e+00> : vector<2x32xf32>
    %427 = tpu.matmul %414, %372, %cst_157 {dimension_numbers = #tpu.dot_dimension_numbers<[1], [0], [0], [1], [0, 0, 1, 1], [], []>} : vector<2x32xf32>, vector<32x32xf32>, vector<2x32xf32> -> vector<2x32xf32>
    %428 = vector.broadcast %378 : vector<1x32xf32> to vector<2x32xf32>
    %429 = arith.addf %427, %428 : vector<2x32xf32>
    %430 = arith.addf %416, %423 : vector<2x32xf32>
    %431 = arith.negf %430 : vector<2x32xf32>
    %432 = math.exp %431 : vector<2x32xf32>
    %cst_158 = arith.constant 1.000000e+00 : f32
    %433 = vector.broadcast %cst_158 : f32 to vector<2x32xf32>
    %434 = arith.addf %433, %432 : vector<2x32xf32>
    %435 = arith.divf %433, %434 : vector<2x32xf32>
    %436 = arith.addf %418, %426 : vector<2x32xf32>
    %437 = arith.negf %436 : vector<2x32xf32>
    %438 = math.exp %437 : vector<2x32xf32>
    %cst_159 = arith.constant 1.000000e+00 : f32
    %439 = vector.broadcast %cst_159 : f32 to vector<2x32xf32>
    %440 = arith.addf %439, %438 : vector<2x32xf32>
    %441 = arith.divf %439, %440 : vector<2x32xf32>
    %442 = arith.mulf %435, %429 : vector<2x32xf32>
    %443 = arith.addf %420, %442 : vector<2x32xf32>
    %444 = math.tanh %443 : vector<2x32xf32>
    %cst_160 = arith.constant 1.000000e+00 : f32
    %445 = vector.broadcast %cst_160 : f32 to vector<2x32xf32>
    %446 = arith.subf %445, %441 : vector<2x32xf32>
    %447 = arith.mulf %446, %444 : vector<2x32xf32>
    %448 = arith.mulf %441, %414 : vector<2x32xf32>
    %449 = arith.addf %447, %448 : vector<2x32xf32>
    %450 = vector.extract_strided_slice %350 {offsets = [0, 2, 0], sizes = [2, 1, 32], strides = [1, 1, 1]} : vector<2x8x32xf32> to vector<2x1x32xf32>
    %451 = vector.shape_cast %450 : vector<2x1x32xf32> to vector<2x32xf32>
    %452 = vector.extract_strided_slice %358 {offsets = [0, 2, 0], sizes = [2, 1, 32], strides = [1, 1, 1]} : vector<2x8x32xf32> to vector<2x1x32xf32>
    %453 = vector.shape_cast %452 : vector<2x1x32xf32> to vector<2x32xf32>
    %454 = vector.extract_strided_slice %366 {offsets = [0, 2, 0], sizes = [2, 1, 32], strides = [1, 1, 1]} : vector<2x8x32xf32> to vector<2x1x32xf32>
    %455 = vector.shape_cast %454 : vector<2x1x32xf32> to vector<2x32xf32>
    %cst_161 = arith.constant dense<0.000000e+00> : vector<2x32xf32>
    %456 = tpu.matmul %449, %368, %cst_161 {dimension_numbers = #tpu.dot_dimension_numbers<[1], [0], [0], [1], [0, 0, 1, 1], [], []>} : vector<2x32xf32>, vector<32x32xf32>, vector<2x32xf32> -> vector<2x32xf32>
    %457 = vector.broadcast %374 : vector<1x32xf32> to vector<2x32xf32>
    %458 = arith.addf %456, %457 : vector<2x32xf32>
    %cst_162 = arith.constant dense<0.000000e+00> : vector<2x32xf32>
    %459 = tpu.matmul %449, %370, %cst_162 {dimension_numbers = #tpu.dot_dimension_numbers<[1], [0], [0], [1], [0, 0, 1, 1], [], []>} : vector<2x32xf32>, vector<32x32xf32>, vector<2x32xf32> -> vector<2x32xf32>
    %460 = vector.broadcast %376 : vector<1x32xf32> to vector<2x32xf32>
    %461 = arith.addf %459, %460 : vector<2x32xf32>
    %cst_163 = arith.constant dense<0.000000e+00> : vector<2x32xf32>
    %462 = tpu.matmul %449, %372, %cst_163 {dimension_numbers = #tpu.dot_dimension_numbers<[1], [0], [0], [1], [0, 0, 1, 1], [], []>} : vector<2x32xf32>, vector<32x32xf32>, vector<2x32xf32> -> vector<2x32xf32>
    %463 = vector.broadcast %378 : vector<1x32xf32> to vector<2x32xf32>
    %464 = arith.addf %462, %463 : vector<2x32xf32>
    %465 = arith.addf %451, %458 : vector<2x32xf32>
    %466 = arith.negf %465 : vector<2x32xf32>
    %467 = math.exp %466 : vector<2x32xf32>
    %cst_164 = arith.constant 1.000000e+00 : f32
    %468 = vector.broadcast %cst_164 : f32 to vector<2x32xf32>
    %469 = arith.addf %468, %467 : vector<2x32xf32>
    %470 = arith.divf %468, %469 : vector<2x32xf32>
    %471 = arith.addf %453, %461 : vector<2x32xf32>
    %472 = arith.negf %471 : vector<2x32xf32>
    %473 = math.exp %472 : vector<2x32xf32>
    %cst_165 = arith.constant 1.000000e+00 : f32
    %474 = vector.broadcast %cst_165 : f32 to vector<2x32xf32>
    %475 = arith.addf %474, %473 : vector<2x32xf32>
    %476 = arith.divf %474, %475 : vector<2x32xf32>
    %477 = arith.mulf %470, %464 : vector<2x32xf32>
    %478 = arith.addf %455, %477 : vector<2x32xf32>
    %479 = math.tanh %478 : vector<2x32xf32>
    %cst_166 = arith.constant 1.000000e+00 : f32
    %480 = vector.broadcast %cst_166 : f32 to vector<2x32xf32>
    %481 = arith.subf %480, %476 : vector<2x32xf32>
    %482 = arith.mulf %481, %479 : vector<2x32xf32>
    %483 = arith.mulf %476, %449 : vector<2x32xf32>
    %484 = arith.addf %482, %483 : vector<2x32xf32>
    %485 = vector.extract_strided_slice %350 {offsets = [0, 3, 0], sizes = [2, 1, 32], strides = [1, 1, 1]} : vector<2x8x32xf32> to vector<2x1x32xf32>
    %486 = vector.shape_cast %485 : vector<2x1x32xf32> to vector<2x32xf32>
    %487 = vector.extract_strided_slice %358 {offsets = [0, 3, 0], sizes = [2, 1, 32], strides = [1, 1, 1]} : vector<2x8x32xf32> to vector<2x1x32xf32>
    %488 = vector.shape_cast %487 : vector<2x1x32xf32> to vector<2x32xf32>
    %489 = vector.extract_strided_slice %366 {offsets = [0, 3, 0], sizes = [2, 1, 32], strides = [1, 1, 1]} : vector<2x8x32xf32> to vector<2x1x32xf32>
    %490 = vector.shape_cast %489 : vector<2x1x32xf32> to vector<2x32xf32>
    %cst_167 = arith.constant dense<0.000000e+00> : vector<2x32xf32>
    %491 = tpu.matmul %484, %368, %cst_167 {dimension_numbers = #tpu.dot_dimension_numbers<[1], [0], [0], [1], [0, 0, 1, 1], [], []>} : vector<2x32xf32>, vector<32x32xf32>, vector<2x32xf32> -> vector<2x32xf32>
    %492 = vector.broadcast %374 : vector<1x32xf32> to vector<2x32xf32>
    %493 = arith.addf %491, %492 : vector<2x32xf32>
    %cst_168 = arith.constant dense<0.000000e+00> : vector<2x32xf32>
    %494 = tpu.matmul %484, %370, %cst_168 {dimension_numbers = #tpu.dot_dimension_numbers<[1], [0], [0], [1], [0, 0, 1, 1], [], []>} : vector<2x32xf32>, vector<32x32xf32>, vector<2x32xf32> -> vector<2x32xf32>
    %495 = vector.broadcast %376 : vector<1x32xf32> to vector<2x32xf32>
    %496 = arith.addf %494, %495 : vector<2x32xf32>
    %cst_169 = arith.constant dense<0.000000e+00> : vector<2x32xf32>
    %497 = tpu.matmul %484, %372, %cst_169 {dimension_numbers = #tpu.dot_dimension_numbers<[1], [0], [0], [1], [0, 0, 1, 1], [], []>} : vector<2x32xf32>, vector<32x32xf32>, vector<2x32xf32> -> vector<2x32xf32>
    %498 = vector.broadcast %378 : vector<1x32xf32> to vector<2x32xf32>
    %499 = arith.addf %497, %498 : vector<2x32xf32>
    %500 = arith.addf %486, %493 : vector<2x32xf32>
    %501 = arith.negf %500 : vector<2x32xf32>
    %502 = math.exp %501 : vector<2x32xf32>
    %cst_170 = arith.constant 1.000000e+00 : f32
    %503 = vector.broadcast %cst_170 : f32 to vector<2x32xf32>
    %504 = arith.addf %503, %502 : vector<2x32xf32>
    %505 = arith.divf %503, %504 : vector<2x32xf32>
    %506 = arith.addf %488, %496 : vector<2x32xf32>
    %507 = arith.negf %506 : vector<2x32xf32>
    %508 = math.exp %507 : vector<2x32xf32>
    %cst_171 = arith.constant 1.000000e+00 : f32
    %509 = vector.broadcast %cst_171 : f32 to vector<2x32xf32>
    %510 = arith.addf %509, %508 : vector<2x32xf32>
    %511 = arith.divf %509, %510 : vector<2x32xf32>
    %512 = arith.mulf %505, %499 : vector<2x32xf32>
    %513 = arith.addf %490, %512 : vector<2x32xf32>
    %514 = math.tanh %513 : vector<2x32xf32>
    %cst_172 = arith.constant 1.000000e+00 : f32
    %515 = vector.broadcast %cst_172 : f32 to vector<2x32xf32>
    %516 = arith.subf %515, %511 : vector<2x32xf32>
    %517 = arith.mulf %516, %514 : vector<2x32xf32>
    %518 = arith.mulf %511, %484 : vector<2x32xf32>
    %519 = arith.addf %517, %518 : vector<2x32xf32>
    %520 = vector.extract_strided_slice %350 {offsets = [0, 4, 0], sizes = [2, 1, 32], strides = [1, 1, 1]} : vector<2x8x32xf32> to vector<2x1x32xf32>
    %521 = vector.shape_cast %520 : vector<2x1x32xf32> to vector<2x32xf32>
    %522 = vector.extract_strided_slice %358 {offsets = [0, 4, 0], sizes = [2, 1, 32], strides = [1, 1, 1]} : vector<2x8x32xf32> to vector<2x1x32xf32>
    %523 = vector.shape_cast %522 : vector<2x1x32xf32> to vector<2x32xf32>
    %524 = vector.extract_strided_slice %366 {offsets = [0, 4, 0], sizes = [2, 1, 32], strides = [1, 1, 1]} : vector<2x8x32xf32> to vector<2x1x32xf32>
    %525 = vector.shape_cast %524 : vector<2x1x32xf32> to vector<2x32xf32>
    %cst_173 = arith.constant dense<0.000000e+00> : vector<2x32xf32>
    %526 = tpu.matmul %519, %368, %cst_173 {dimension_numbers = #tpu.dot_dimension_numbers<[1], [0], [0], [1], [0, 0, 1, 1], [], []>} : vector<2x32xf32>, vector<32x32xf32>, vector<2x32xf32> -> vector<2x32xf32>
    %527 = vector.broadcast %374 : vector<1x32xf32> to vector<2x32xf32>
    %528 = arith.addf %526, %527 : vector<2x32xf32>
    %cst_174 = arith.constant dense<0.000000e+00> : vector<2x32xf32>
    %529 = tpu.matmul %519, %370, %cst_174 {dimension_numbers = #tpu.dot_dimension_numbers<[1], [0], [0], [1], [0, 0, 1, 1], [], []>} : vector<2x32xf32>, vector<32x32xf32>, vector<2x32xf32> -> vector<2x32xf32>
    %530 = vector.broadcast %376 : vector<1x32xf32> to vector<2x32xf32>
    %531 = arith.addf %529, %530 : vector<2x32xf32>
    %cst_175 = arith.constant dense<0.000000e+00> : vector<2x32xf32>
    %532 = tpu.matmul %519, %372, %cst_175 {dimension_numbers = #tpu.dot_dimension_numbers<[1], [0], [0], [1], [0, 0, 1, 1], [], []>} : vector<2x32xf32>, vector<32x32xf32>, vector<2x32xf32> -> vector<2x32xf32>
    %533 = vector.broadcast %378 : vector<1x32xf32> to vector<2x32xf32>
    %534 = arith.addf %532, %533 : vector<2x32xf32>
    %535 = arith.addf %521, %528 : vector<2x32xf32>
    %536 = arith.negf %535 : vector<2x32xf32>
    %537 = math.exp %536 : vector<2x32xf32>
    %cst_176 = arith.constant 1.000000e+00 : f32
    %538 = vector.broadcast %cst_176 : f32 to vector<2x32xf32>
    %539 = arith.addf %538, %537 : vector<2x32xf32>
    %540 = arith.divf %538, %539 : vector<2x32xf32>
    %541 = arith.addf %523, %531 : vector<2x32xf32>
    %542 = arith.negf %541 : vector<2x32xf32>
    %543 = math.exp %542 : vector<2x32xf32>
    %cst_177 = arith.constant 1.000000e+00 : f32
    %544 = vector.broadcast %cst_177 : f32 to vector<2x32xf32>
    %545 = arith.addf %544, %543 : vector<2x32xf32>
    %546 = arith.divf %544, %545 : vector<2x32xf32>
    %547 = arith.mulf %540, %534 : vector<2x32xf32>
    %548 = arith.addf %525, %547 : vector<2x32xf32>
    %549 = math.tanh %548 : vector<2x32xf32>
    %cst_178 = arith.constant 1.000000e+00 : f32
    %550 = vector.broadcast %cst_178 : f32 to vector<2x32xf32>
    %551 = arith.subf %550, %546 : vector<2x32xf32>
    %552 = arith.mulf %551, %549 : vector<2x32xf32>
    %553 = arith.mulf %546, %519 : vector<2x32xf32>
    %554 = arith.addf %552, %553 : vector<2x32xf32>
    %555 = vector.extract_strided_slice %350 {offsets = [0, 5, 0], sizes = [2, 1, 32], strides = [1, 1, 1]} : vector<2x8x32xf32> to vector<2x1x32xf32>
    %556 = vector.shape_cast %555 : vector<2x1x32xf32> to vector<2x32xf32>
    %557 = vector.extract_strided_slice %358 {offsets = [0, 5, 0], sizes = [2, 1, 32], strides = [1, 1, 1]} : vector<2x8x32xf32> to vector<2x1x32xf32>
    %558 = vector.shape_cast %557 : vector<2x1x32xf32> to vector<2x32xf32>
    %559 = vector.extract_strided_slice %366 {offsets = [0, 5, 0], sizes = [2, 1, 32], strides = [1, 1, 1]} : vector<2x8x32xf32> to vector<2x1x32xf32>
    %560 = vector.shape_cast %559 : vector<2x1x32xf32> to vector<2x32xf32>
    %cst_179 = arith.constant dense<0.000000e+00> : vector<2x32xf32>
    %561 = tpu.matmul %554, %368, %cst_179 {dimension_numbers = #tpu.dot_dimension_numbers<[1], [0], [0], [1], [0, 0, 1, 1], [], []>} : vector<2x32xf32>, vector<32x32xf32>, vector<2x32xf32> -> vector<2x32xf32>
    %562 = vector.broadcast %374 : vector<1x32xf32> to vector<2x32xf32>
    %563 = arith.addf %561, %562 : vector<2x32xf32>
    %cst_180 = arith.constant dense<0.000000e+00> : vector<2x32xf32>
    %564 = tpu.matmul %554, %370, %cst_180 {dimension_numbers = #tpu.dot_dimension_numbers<[1], [0], [0], [1], [0, 0, 1, 1], [], []>} : vector<2x32xf32>, vector<32x32xf32>, vector<2x32xf32> -> vector<2x32xf32>
    %565 = vector.broadcast %376 : vector<1x32xf32> to vector<2x32xf32>
    %566 = arith.addf %564, %565 : vector<2x32xf32>
    %cst_181 = arith.constant dense<0.000000e+00> : vector<2x32xf32>
    %567 = tpu.matmul %554, %372, %cst_181 {dimension_numbers = #tpu.dot_dimension_numbers<[1], [0], [0], [1], [0, 0, 1, 1], [], []>} : vector<2x32xf32>, vector<32x32xf32>, vector<2x32xf32> -> vector<2x32xf32>
    %568 = vector.broadcast %378 : vector<1x32xf32> to vector<2x32xf32>
    %569 = arith.addf %567, %568 : vector<2x32xf32>
    %570 = arith.addf %556, %563 : vector<2x32xf32>
    %571 = arith.negf %570 : vector<2x32xf32>
    %572 = math.exp %571 : vector<2x32xf32>
    %cst_182 = arith.constant 1.000000e+00 : f32
    %573 = vector.broadcast %cst_182 : f32 to vector<2x32xf32>
    %574 = arith.addf %573, %572 : vector<2x32xf32>
    %575 = arith.divf %573, %574 : vector<2x32xf32>
    %576 = arith.addf %558, %566 : vector<2x32xf32>
    %577 = arith.negf %576 : vector<2x32xf32>
    %578 = math.exp %577 : vector<2x32xf32>
    %cst_183 = arith.constant 1.000000e+00 : f32
    %579 = vector.broadcast %cst_183 : f32 to vector<2x32xf32>
    %580 = arith.addf %579, %578 : vector<2x32xf32>
    %581 = arith.divf %579, %580 : vector<2x32xf32>
    %582 = arith.mulf %575, %569 : vector<2x32xf32>
    %583 = arith.addf %560, %582 : vector<2x32xf32>
    %584 = math.tanh %583 : vector<2x32xf32>
    %cst_184 = arith.constant 1.000000e+00 : f32
    %585 = vector.broadcast %cst_184 : f32 to vector<2x32xf32>
    %586 = arith.subf %585, %581 : vector<2x32xf32>
    %587 = arith.mulf %586, %584 : vector<2x32xf32>
    %588 = arith.mulf %581, %554 : vector<2x32xf32>
    %589 = arith.addf %587, %588 : vector<2x32xf32>
    %590 = vector.extract_strided_slice %350 {offsets = [0, 6, 0], sizes = [2, 1, 32], strides = [1, 1, 1]} : vector<2x8x32xf32> to vector<2x1x32xf32>
    %591 = vector.shape_cast %590 : vector<2x1x32xf32> to vector<2x32xf32>
    %592 = vector.extract_strided_slice %358 {offsets = [0, 6, 0], sizes = [2, 1, 32], strides = [1, 1, 1]} : vector<2x8x32xf32> to vector<2x1x32xf32>
    %593 = vector.shape_cast %592 : vector<2x1x32xf32> to vector<2x32xf32>
    %594 = vector.extract_strided_slice %366 {offsets = [0, 6, 0], sizes = [2, 1, 32], strides = [1, 1, 1]} : vector<2x8x32xf32> to vector<2x1x32xf32>
    %595 = vector.shape_cast %594 : vector<2x1x32xf32> to vector<2x32xf32>
    %cst_185 = arith.constant dense<0.000000e+00> : vector<2x32xf32>
    %596 = tpu.matmul %589, %368, %cst_185 {dimension_numbers = #tpu.dot_dimension_numbers<[1], [0], [0], [1], [0, 0, 1, 1], [], []>} : vector<2x32xf32>, vector<32x32xf32>, vector<2x32xf32> -> vector<2x32xf32>
    %597 = vector.broadcast %374 : vector<1x32xf32> to vector<2x32xf32>
    %598 = arith.addf %596, %597 : vector<2x32xf32>
    %cst_186 = arith.constant dense<0.000000e+00> : vector<2x32xf32>
    %599 = tpu.matmul %589, %370, %cst_186 {dimension_numbers = #tpu.dot_dimension_numbers<[1], [0], [0], [1], [0, 0, 1, 1], [], []>} : vector<2x32xf32>, vector<32x32xf32>, vector<2x32xf32> -> vector<2x32xf32>
    %600 = vector.broadcast %376 : vector<1x32xf32> to vector<2x32xf32>
    %601 = arith.addf %599, %600 : vector<2x32xf32>
    %cst_187 = arith.constant dense<0.000000e+00> : vector<2x32xf32>
    %602 = tpu.matmul %589, %372, %cst_187 {dimension_numbers = #tpu.dot_dimension_numbers<[1], [0], [0], [1], [0, 0, 1, 1], [], []>} : vector<2x32xf32>, vector<32x32xf32>, vector<2x32xf32> -> vector<2x32xf32>
    %603 = vector.broadcast %378 : vector<1x32xf32> to vector<2x32xf32>
    %604 = arith.addf %602, %603 : vector<2x32xf32>
    %605 = arith.addf %591, %598 : vector<2x32xf32>
    %606 = arith.negf %605 : vector<2x32xf32>
    %607 = math.exp %606 : vector<2x32xf32>
    %cst_188 = arith.constant 1.000000e+00 : f32
    %608 = vector.broadcast %cst_188 : f32 to vector<2x32xf32>
    %609 = arith.addf %608, %607 : vector<2x32xf32>
    %610 = arith.divf %608, %609 : vector<2x32xf32>
    %611 = arith.addf %593, %601 : vector<2x32xf32>
    %612 = arith.negf %611 : vector<2x32xf32>
    %613 = math.exp %612 : vector<2x32xf32>
    %cst_189 = arith.constant 1.000000e+00 : f32
    %614 = vector.broadcast %cst_189 : f32 to vector<2x32xf32>
    %615 = arith.addf %614, %613 : vector<2x32xf32>
    %616 = arith.divf %614, %615 : vector<2x32xf32>
    %617 = arith.mulf %610, %604 : vector<2x32xf32>
    %618 = arith.addf %595, %617 : vector<2x32xf32>
    %619 = math.tanh %618 : vector<2x32xf32>
    %cst_190 = arith.constant 1.000000e+00 : f32
    %620 = vector.broadcast %cst_190 : f32 to vector<2x32xf32>
    %621 = arith.subf %620, %616 : vector<2x32xf32>
    %622 = arith.mulf %621, %619 : vector<2x32xf32>
    %623 = arith.mulf %616, %589 : vector<2x32xf32>
    %624 = arith.addf %622, %623 : vector<2x32xf32>
    %625 = vector.extract_strided_slice %350 {offsets = [0, 7, 0], sizes = [2, 1, 32], strides = [1, 1, 1]} : vector<2x8x32xf32> to vector<2x1x32xf32>
    %626 = vector.shape_cast %625 : vector<2x1x32xf32> to vector<2x32xf32>
    %627 = vector.extract_strided_slice %358 {offsets = [0, 7, 0], sizes = [2, 1, 32], strides = [1, 1, 1]} : vector<2x8x32xf32> to vector<2x1x32xf32>
    %628 = vector.shape_cast %627 : vector<2x1x32xf32> to vector<2x32xf32>
    %629 = vector.extract_strided_slice %366 {offsets = [0, 7, 0], sizes = [2, 1, 32], strides = [1, 1, 1]} : vector<2x8x32xf32> to vector<2x1x32xf32>
    %630 = vector.shape_cast %629 : vector<2x1x32xf32> to vector<2x32xf32>
    %cst_191 = arith.constant dense<0.000000e+00> : vector<2x32xf32>
    %631 = tpu.matmul %624, %368, %cst_191 {dimension_numbers = #tpu.dot_dimension_numbers<[1], [0], [0], [1], [0, 0, 1, 1], [], []>} : vector<2x32xf32>, vector<32x32xf32>, vector<2x32xf32> -> vector<2x32xf32>
    %632 = vector.broadcast %374 : vector<1x32xf32> to vector<2x32xf32>
    %633 = arith.addf %631, %632 : vector<2x32xf32>
    %cst_192 = arith.constant dense<0.000000e+00> : vector<2x32xf32>
    %634 = tpu.matmul %624, %370, %cst_192 {dimension_numbers = #tpu.dot_dimension_numbers<[1], [0], [0], [1], [0, 0, 1, 1], [], []>} : vector<2x32xf32>, vector<32x32xf32>, vector<2x32xf32> -> vector<2x32xf32>
    %635 = vector.broadcast %376 : vector<1x32xf32> to vector<2x32xf32>
    %636 = arith.addf %634, %635 : vector<2x32xf32>
    %cst_193 = arith.constant dense<0.000000e+00> : vector<2x32xf32>
    %637 = tpu.matmul %624, %372, %cst_193 {dimension_numbers = #tpu.dot_dimension_numbers<[1], [0], [0], [1], [0, 0, 1, 1], [], []>} : vector<2x32xf32>, vector<32x32xf32>, vector<2x32xf32> -> vector<2x32xf32>
    %638 = vector.broadcast %378 : vector<1x32xf32> to vector<2x32xf32>
    %639 = arith.addf %637, %638 : vector<2x32xf32>
    %640 = arith.addf %626, %633 : vector<2x32xf32>
    %641 = arith.negf %640 : vector<2x32xf32>
    %642 = math.exp %641 : vector<2x32xf32>
    %cst_194 = arith.constant 1.000000e+00 : f32
    %643 = vector.broadcast %cst_194 : f32 to vector<2x32xf32>
    %644 = arith.addf %643, %642 : vector<2x32xf32>
    %645 = arith.divf %643, %644 : vector<2x32xf32>
    %646 = arith.addf %628, %636 : vector<2x32xf32>
    %647 = arith.negf %646 : vector<2x32xf32>
    %648 = math.exp %647 : vector<2x32xf32>
    %cst_195 = arith.constant 1.000000e+00 : f32
    %649 = vector.broadcast %cst_195 : f32 to vector<2x32xf32>
    %650 = arith.addf %649, %648 : vector<2x32xf32>
    %651 = arith.divf %649, %650 : vector<2x32xf32>
    %652 = arith.mulf %645, %639 : vector<2x32xf32>
    %653 = arith.addf %630, %652 : vector<2x32xf32>
    %654 = math.tanh %653 : vector<2x32xf32>
    %cst_196 = arith.constant 1.000000e+00 : f32
    %655 = vector.broadcast %cst_196 : f32 to vector<2x32xf32>
    %656 = arith.subf %655, %651 : vector<2x32xf32>
    %657 = arith.mulf %656, %654 : vector<2x32xf32>
    %658 = arith.mulf %651, %624 : vector<2x32xf32>
    %659 = arith.addf %657, %658 : vector<2x32xf32>
    %c0_197 = arith.constant 0 : index
    %c0_198 = arith.constant 0 : index
    %660 = vector.load %arg10[%c0_197, %c0_198] : memref<32x3xf32, #tpu.memory_space<vmem>>, vector<32x3xf32>
    %cst_199 = arith.constant dense<0.000000e+00> : vector<2x3xf32>
    %661 = tpu.matmul %659, %660, %cst_199 {dimension_numbers = #tpu.dot_dimension_numbers<[1], [0], [0], [1], [0, 0, 1, 1], [], []>} : vector<2x32xf32>, vector<32x3xf32>, vector<2x3xf32> -> vector<2x3xf32>
    %c0_200 = arith.constant 0 : index
    %c0_201 = arith.constant 0 : index
    %662 = vector.load %arg11[%c0_200, %c0_201] : memref<1x3xf32, #tpu.memory_space<vmem>>, vector<1x3xf32>
    %663 = vector.broadcast %662 : vector<1x3xf32> to vector<2x3xf32>
    %664 = arith.addf %661, %663 : vector<2x3xf32>
    %c0_202 = arith.constant 0 : index
    %c0_203 = arith.constant 0 : index
    %665 = vector.load %arg12[%c0_202, %c0_203] : memref<2x3xf32, #tpu.memory_space<vmem>>, vector<2x3xf32>
    tpu.vector_store %arg12[%c0_202, %c0_203], %664 {strides = array<i32>} : memref<2x3xf32, #tpu.memory_space<vmem>>, vector<2x3xf32>,
    return
  }
  func.func @transform_0(%arg0: i32) -> (i32, i32, i32) {
    %c0_i32 = arith.constant 0 : i32
    %c0_i32_0 = arith.constant 0 : i32
    %c0_i32_1 = arith.constant 0 : i32
    %c0_i32_2 = arith.constant 0 : i32
    return %c0_i32, %c0_i32_0, %c0_i32_1 : i32, i32, i32
  }
  func.func @transform_1(%arg0: i32) -> (i32, i32, i32) {
    %c0_i32 = arith.constant 0 : i32
    %c0_i32_0 = arith.constant 0 : i32
    %c0_i32_1 = arith.constant 0 : i32
    %c0_i32_2 = arith.constant 0 : i32
    return %c0_i32, %c0_i32_0, %c0_i32_1 : i32, i32, i32
  }
  func.func @transform_2(%arg0: i32) -> (i32, i32, i32) {
    %c0_i32 = arith.constant 0 : i32
    %c0_i32_0 = arith.constant 0 : i32
    %c0_i32_1 = arith.constant 0 : i32
    %c0_i32_2 = arith.constant 0 : i32
    return %c0_i32, %c0_i32_0, %c0_i32_1 : i32, i32, i32
  }
  func.func @transform_3(%arg0: i32) -> (i32, i32, i32) {
    %c0_i32 = arith.constant 0 : i32
    %c0_i32_0 = arith.constant 0 : i32
    %c0_i32_1 = arith.constant 0 : i32
    %c0_i32_2 = arith.constant 0 : i32
    return %c0_i32, %c0_i32_0, %c0_i32_1 : i32, i32, i32
  }
  func.func @transform_4(%arg0: i32) -> (i32, i32, i32) {
    %c0_i32 = arith.constant 0 : i32
    %c0_i32_0 = arith.constant 0 : i32
    %c0_i32_1 = arith.constant 0 : i32
    %c0_i32_2 = arith.constant 0 : i32
    return %c0_i32, %c0_i32_0, %c0_i32_1 : i32, i32, i32
  }
  func.func @transform_5(%arg0: i32) -> (i32, i32, i32) {
    %c0_i32 = arith.constant 0 : i32
    %c0_i32_0 = arith.constant 0 : i32
    %c0_i32_1 = arith.constant 0 : i32
    %c0_i32_2 = arith.constant 0 : i32
    return %c0_i32, %c0_i32_0, %c0_i32_1 : i32, i32, i32
  }
  func.func @transform_6(%arg0: i32) -> (i32, i32, i32) {
    %c0_i32 = arith.constant 0 : i32
    %c0_i32_0 = arith.constant 0 : i32
    %c0_i32_1 = arith.constant 0 : i32
    %c0_i32_2 = arith.constant 0 : i32
    return %c0_i32, %c0_i32_0, %c0_i32_1 : i32, i32, i32
  }
  func.func @transform_7(%arg0: i32) -> (i32, i32, i32) {
    %c0_i32 = arith.constant 0 : i32
    %c0_i32_0 = arith.constant 0 : i32
    %c0_i32_1 = arith.constant 0 : i32
    %c0_i32_2 = arith.constant 0 : i32
    return %c0_i32, %c0_i32_0, %c0_i32_1 : i32, i32, i32
  }
  func.func @transform_8(%arg0: i32) -> (i32, i32, i32) {
    %c0_i32 = arith.constant 0 : i32
    %c0_i32_0 = arith.constant 0 : i32
    %c0_i32_1 = arith.constant 0 : i32
    %c0_i32_2 = arith.constant 0 : i32
    return %c0_i32, %c0_i32_0, %c0_i32_1 : i32, i32, i32
  }
  func.func @transform_9(%arg0: i32) -> (i32, i32) {
    %c0_i32 = arith.constant 0 : i32
    %c0_i32_0 = arith.constant 0 : i32
    %c0_i32_1 = arith.constant 0 : i32
    return %c0_i32, %c0_i32_0 : i32, i32
  }
  func.func @transform_10(%arg0: i32) -> (i32, i32) {
    %c0_i32 = arith.constant 0 : i32
    %c0_i32_0 = arith.constant 0 : i32
    %c0_i32_1 = arith.constant 0 : i32
    return %c0_i32, %c0_i32_0 : i32, i32
  }
  func.func @transform_11(%arg0: i32) -> (i32, i32) {
    %c0_i32 = arith.constant 0 : i32
    %c0_i32_0 = arith.constant 0 : i32
    %c0_i32_1 = arith.constant 0 : i32
    return %c0_i32, %c0_i32_0 : i32, i32
  }
}

</mosaic_0001>

<bundles_post_ra>
// kernel: tpu_custom_call.1
= control target key start
LH: loop header
LB: loop body
LE: loop exit
PB: predicated region body
PF: predicated region fallthrough
CT: control target
= control target key end

     0   :  { %16 = vsyncpa [#allocation4], 0  ;;  %s7872_s0 = inlined_call_operand.hbm [shape: f32[2,8,8], index: 0, kind: input, shape index: {}]   ;;  %s7873_s1 = inlined_call_operand.vmem [shape: f32[3,8,32], index: 1, kind: input, shape index: {}]   ;;  %s7874_s2 = inlined_call_operand.hbm [shape: f32[3,32,32], index: 2, kind: input, shape index: {}]   ;;  %s7875_s3 = inlined_call_operand.vmem [shape: f32[3,1,32], index: 3, kind: input, shape index: {}]   ;;  %s7876_s4 = inlined_call_operand.vmem [shape: f32[3,1,32], index: 4, kind: input, shape index: {}]   ;;  %s7877_s5 = inlined_call_operand.hbm [shape: f32[3,32,32], index: 5, kind: input, shape index: {}]   ;;  %s7878_s6 = inlined_call_operand.hbm [shape: f32[3,32,32], index: 6, kind: input, shape index: {}]   ;;  %s7879_s7 = inlined_call_operand.vmem [shape: f32[3,1,32], index: 7, kind: input, shape index: {}]   ;;  %s7880_s8 = inlined_call_operand.vmem [shape: f32[3,1,32], index: 8, kind: input, shape index: {}]   ;;  %s7881_s9 = inlined_call_operand.vmem [shape: f32[32,3], index: 9, kind: input, shape index: {}]   ;;  %s7882_s10 = inlined_call_operand.vmem [shape: f32[1,3], index: 10, kind: input, shape index: {}]   ;;  %s7883_s11 = inlined_call_operand.hbm [shape: f32[2,3], index: 11, kind: output, shape index: {}]  }
   0x1   :  { %17 = vsyncpa [#allocation7], 0 }
   0x2   :  { %18 = vsyncpa [#allocation10], 0 }
   0x3   :  { %19 = vsyncpa [#allocation5], 0  ;;  %s6712_s17 = smov [#allocation6]   ;;  %s6713_s19 = smov [#allocation3]  }
   0x4   :  { %s39_s18 = sshll.u32 %s6712_s17, 4  ;;  %s25_s20 = sshll.u32 %s6713_s19, 4  ;;  %s40_s18 = int_to_ptr.vmem [resolvable:$true] %s39_s18  ;;  %s26_s20 = int_to_ptr.vmem [resolvable:$true] %s25_s20 }
   0x5   :  { %s6612_s21 = scalar_lea.vmem %s40_s18, 1536  ;;  %p6617_p1 = scmp.lt.s32.totalorder %s40_s18, %s40_s18 }
   0x6   :  { %p6613_p0 = scmp.ne.s32.totalorder %s40_s18, %s6612_s21  ;;  %p6618_p2 = scmp.lt.s32.totalorder %s6612_s21, %s6612_s21 }
   0x8   :  { %p6619_p3 = por %p6618_p2, %p6617_p1 }
   0xa   :  { %p6620_p4 = pnand %p6619_p3, %p6613_p0 }
   0xc   :  { %6623 = shalt.err (!%p6620_p4)
}
   0xd   :  { %s6714_s22 = smov 128   ;;  %s6715_s23 = smov 8  }
   0xe   :  { %45 = dma.hbm_to_vmem [thread:$0]  %s7874_s2, 1536, %s40_s18, [#allocation7], %s6714_s22, %s6714_s22, %s6715_s23  }
   0xf   :  { %s6632_s26 = scalar_lea.vmem %s26_s20, 256  ;;  %p6637_p6 = scmp.lt.s32.totalorder %s26_s20, %s26_s20 }
  0x10   :  { %p6633_p5 = scmp.ne.s32.totalorder %s26_s20, %s6632_s26  ;;  %p6638_p7 = scmp.lt.s32.totalorder %s6632_s26, %s6632_s26 }
  0x12   :  { %p6639_p8 = por %p6638_p7, %p6637_p6 }
  0x14   :  { %p6640_p9 = pnand %p6639_p8, %p6633_p5 }
  0x16   :  { %6643 = shalt.err (!%p6640_p9)
}
  0x17   :  { %31 = dma.hbm_to_vmem [thread:$0]  %s7872_s0, 256, %s26_s20, [#allocation4], %s6714_s22, %s6714_s22, %s6715_s23  }
  0x18   :  { %s6716_s29 = smov [#allocation8]   ;;  %s6717_s12 = smov [#allocation9]  }
  0x19   :  { %s55_s30 = sshll.u32 %s6716_s29, 4  ;;  %s67_s13 = sshll.u32 %s6717_s12, 4  ;;  %s56_s30 = int_to_ptr.vmem [resolvable:$true] %s55_s30  ;;  %s68_s13 = int_to_ptr.vmem [resolvable:$true] %s67_s13 }
  0x1a   :  { %s6652_s2 = scalar_lea.vmem %s56_s30, 1536  ;;  %p6657_p11 = scmp.lt.s32.totalorder %s56_s30, %s56_s30 }
  0x1b   :  { %p6653_p10 = scmp.ne.s32.totalorder %s56_s30, %s6652_s2  ;;  %p6658_p12 = scmp.lt.s32.totalorder %s6652_s2, %s6652_s2 }
  0x1d   :  { %p6659_p13 = por %p6658_p12, %p6657_p11 }
  0x1f   :  { %p6660_p0 = pnand %p6659_p13, %p6653_p10 }
  0x21   :  { %6663 = shalt.err (!%p6660_p0)
}
  0x22   :  { %61 = dma.hbm_to_vmem [thread:$0]  %s7877_s5, 1536, %s56_s30, [#allocation7], %s6714_s22, %s6714_s22, %s6715_s23  }
  0x23   :  { %s6672_s0 = scalar_lea.vmem %s68_s13, 1536  ;;  %p6677_p2 = scmp.lt.s32.totalorder %s68_s13, %s68_s13 }
  0x24   :  { %p6673_p1 = scmp.ne.s32.totalorder %s68_s13, %s6672_s0  ;;  %p6678_p3 = scmp.lt.s32.totalorder %s6672_s0, %s6672_s0 }
  0x26   :  { %p6679_p4 = por %p6678_p3, %p6677_p2 }
  0x28   :  { %p6680_p5 = pnand %p6679_p4, %p6673_p1 }
  0x2a   :  { %6683 = shalt.err (!%p6680_p5)
}
  0x2b   :  { %73 = dma.hbm_to_vmem [thread:$0]  %s7878_s6, 1536, %s68_s13, [#allocation10], %s6714_s22, %s6714_s22, %s6715_s23  }
  0x2c   :  { %6704 = dma.done.wait [#allocation4], 256  }
  0x2d   :  { %6705 = vsyncadd [#allocation4], 4294967040 }
  0x2e   :  { %6706 = dma.done.wait [#allocation7], 3072  }
  0x2f   :  { %6707 = vsyncadd [#allocation7], 4294964224 }
  0x30   :  { %6708 = dma.done.wait [#allocation10], 1536  }
  0x31   :  { %6709 = vsyncadd [#allocation10], 4294965760  ;;  %vm104_vm0 = vcmask 64512   ;;  %v96_v0 = vld [vmem:[%s7873_s1] sm:$0xff]  ;;  %v5247_v1 = vld [vmem:[%s7873_s1 + $0x8] sm:$0xff]  ;;  %v6718_v6 = vmov 0.0  }
  0x32   :  { %v94_v2 = vld [vmem:[#allocation3] sm:$0xff]  ;;  %5658 = vmatprep.subr.mxu0 %v96_v0  ;;  %5663 = vmatprep.subr.mxu1 %v5247_v1  ;;  %v95_v3 = vld [vmem:[#allocation3 + $0x8] sm:$0xff]  ;;  %v6828_v9 = vld [vmem:[#allocation6 + $0x8] sm:$0xff]  ;;  %vm6719_vm1 = vmmov 0   ;;  %vm664_vm2 = vcmask 261127   ;;  %vm671_vm3 = vcmask 1041409  }
  0x33   :  { %5659 = vmatpush3.msra.mxu0 %v96_v0  ;;  %5660 = vmatprep.mubr.msk.f32.mxu0 %vm104_vm0, %v94_v2  ;;  %v5252_v4 = vld [vmem:[%s7873_s1 + $0x10] sm:$0xff]  ;;  %v6816_v5 = vld [vmem:[#allocation6 + $0x18] sm:$0xff]  ;;  %v6836_v11 = vld [vmem:[#allocation6] sm:$0xff]  ;;  %vm381_vm4 = vcmask 261120   ;;  %vm946_vm5 = vcmask 260102   ;;  %vm1227_vm6 = vcmask 259077  }
  0x34   :  { %5664 = vmatpush3.msra.mxu1 %v5247_v1  ;;  %5665 = vmatprep.mubr.msk.f32.mxu1 %vm104_vm0, %v94_v2  ;;  %v6821_v7 = vld [vmem:[#allocation6 + $0x10] sm:$0xff]  ;;  %v6826_v8 = vld [vmem:[#allocation6 + $0x38] sm:$0xff]  ;;  %v6842_v12 = vld [vmem:[#allocation6 + $0x28] sm:$0xff]  ;;  %vm1508_vm7 = vcmask 258052   ;;  %vm1789_vm8 = vcmask 257027   ;;  %vm2070_vm9 = vcmask 256002  }
  0x35   :  { %5661 = vmatmul.mubr.msk.f32.vlgmr.msra.gmra.mxu0 %vm104_vm0, %v95_v3  ;;  %5666 = vmatmul.mubr.msk.f32.vlgmr.msra.gmra.mxu1 %vm104_vm0, %v95_v3  ;;  %v6834_v10 = vld [vmem:[#allocation6 + $0x30] sm:$0xff]  ;;  %v6849_v13 = vld [vmem:[#allocation6 + $0x20] sm:$0xff]  ;;  %v6853_v14 = vld [vmem:[#allocation6 + $0x58] sm:$0xff]  ;;  %vm2347_vm10 = vcmask 254977   ;;  %vm2623_vm11 = vcmask 253952   ;;  %s6720_s16 = smov [#allocation11]  }
  0x36   :  { %5673 = vmatprep.subr.mxu1 %v6718_v6  ;;  %5668 = vmatprep.subr.mxu0 %v5252_v4  ;;  %v6860_v15 = vld [vmem:[#allocation6 + $0x50] sm:$0xff]  ;;  %v6865_v16 = vld [vmem:[#allocation6 + $0x48] sm:$0xff]  ;;  %v6872_v17 = vld [vmem:[#allocation6 + $0x40] sm:$0xff]  ;;  %vm5225_vm12 = vcmask 17408  }
  0x37   :  { %5674 = vmatpush3.msra.mxu1 %v6816_v5  ;;  %5669 = vmatpush3.msra.mxu0 %v5252_v4  ;;  %v6902_v23 = vld [vmem:[%s7876_s4] ss:$0 sm:$0xff]  ;;  %v6911_v28 = vld [vmem:[%s7876_s4 + $0x1] ss:$0 sm:$0xff]  ;;  %v6932_v56 = vld [vmem:[%s7876_s4 + $0x2] ss:$0 sm:$0xff] }
  0x38   :  { %5675 = vmatprep.subr.mxu1 %v6718_v6  ;;  %5670 = vmatprep.mubr.msk.f32.mxu0 %vm104_vm0, %v94_v2  ;;  %v5244_v25 = vld [vmem:[%s7875_s3] ss:$0 sm:$0xff]  ;;  %v5249_v39 = vld [vmem:[%s7875_s3 + $0x1] ss:$0 sm:$0xff]  ;;  %v5254_v62 = vld [vmem:[%s7875_s3 + $0x2] ss:$0 sm:$0xff] }
  0x39   :  { %5676 = vmatpush3.msra.mxu1 %v6821_v7  ;;  %5684 = vmatprep.subr.mxu0 %v6718_v6 }
  0x3a   :  { %5671 = vmatmul.mubr.msk.f32.vlgmr.msra.gmra.mxu0 %vm104_vm0, %v95_v3  ;;  %5677 = vmatprep.subr.mxu1 %v6718_v6 }
  0x3b   :  { %5685 = vmatpush3.msra.mxu0 %v6826_v8  ;;  %5678 = vmatpush3.msra.mxu1 %v6828_v9 }
  0x3c   :  { %5686 = vmatprep.subr.mxu0 %v6718_v6  ;;  %5679 = vmatprep.subr.mxu1 %v6718_v6 }
  0x3d   :  { %5687 = vmatpush3.msra.mxu0 %v6834_v10  ;;  %5680 = vmatpush3.msra.mxu1 %v6836_v11 }
  0x3e   :  { %5681 = vmatprep.mubr.msk.f32.mxu1 %vm6719_vm1, %v6718_v6  ;;  %5688 = vmatprep.subr.mxu0 %v6718_v6 }
  0x3f   :  { %5682 = vmatmul.mubr.f32.vlgmr.msra.gmra.mxu1 %v6718_v6  ;;  %5689 = vmatpush3.msra.mxu0 %v6842_v12 }
  0x40   :  { %5690 = vmatprep.subr.mxu0 %v6718_v6  ;;  %5692 = vmatprep.mubr.msk.f32.mxu0 %vm6719_vm1, %v6718_v6 }
  0x41   :  { %5691 = vmatpush3.msra.mxu0 %v6849_v13  ;;  %5695 = vmatprep.subr.mxu1 %v6718_v6 }
  0x42   :  { %5693 = vmatmul.mubr.f32.vlgmr.msra.gmra.mxu0 %v6718_v6  ;;  %5696 = vmatpush3.msra.mxu1 %v6853_v14 }
  0x43   :  { %5697 = vmatprep.subr.mxu1 %v6718_v6  ;;  %5703 = vmatprep.mubr.msk.f32.mxu1 %vm6719_vm1, %v6718_v6 }
  0x44   :  { %5698 = vmatpush3.msra.mxu1 %v6860_v15  ;;  %5706 = vmatprep.subr.mxu0 %v6718_v6 }
  0x45   :  { %5699 = vmatprep.subr.mxu1 %v6718_v6  ;;  %5707 = vmatpush3.msra.mxu0 %v6816_v5 }
  0x46   :  { %5700 = vmatpush3.msra.mxu1 %v6865_v16  ;;  %5708 = vmatprep.subr.mxu0 %v6718_v6 }
  0x47   :  { %5701 = vmatprep.subr.mxu1 %v6718_v6  ;;  %5709 = vmatpush3.msra.mxu0 %v6821_v7 }
  0x48   :  { %5702 = vmatpush3.msra.mxu1 %v6872_v17  ;;  %5710 = vmatprep.subr.mxu0 %v6718_v6 }
  0x49   :  { %5704 = vmatmul.mubr.f32.vlgmr.msra.gmra.mxu1 %v6718_v6  ;;  %5717 = vmatprep.subr.mxu1 %v6718_v6 }
  0x4a   :  { %5718 = vmatpush3.msra.mxu1 %v6826_v8  ;;  %5711 = vmatpush3.msra.mxu0 %v6828_v9 }
  0x4b   :  { %5719 = vmatprep.subr.mxu1 %v6718_v6  ;;  %5712 = vmatprep.subr.mxu0 %v6718_v6 }
  0x4c   :  { %5720 = vmatpush3.msra.mxu1 %v6834_v10  ;;  %5713 = vmatpush3.msra.mxu0 %v6836_v11 }
  0x4d   :  { %5721 = vmatprep.subr.mxu1 %v6718_v6  ;;  %5714 = vmatprep.mubr.msk.f32.mxu0 %vm6719_vm1, %v6718_v6 }
  0x4e   :  { %5722 = vmatpush3.msra.mxu1 %v6842_v12  ;;  %5725 = vmatprep.mubr.msk.f32.mxu1 %vm6719_vm1, %v6718_v6 }
  0x4f   :  { %5723 = vmatprep.subr.mxu1 %v6718_v6  ;;  %5728 = vmatprep.subr.mxu0 %v6718_v6 }
  0x50   :  { %5724 = vmatpush3.msra.mxu1 %v6849_v13 }
  0x51   :  { %5739 = vmatprep.subr.mxu1 %v6718_v6 }
  0xf5   :  { %v5662_v18 = vpop.f32.mrf.mxu0  ;;  %v5667_v20 = vpop.f32.mrf.mxu1 }
  0xf6   :  { %v6913_v30 = vadd.f32 %v5662_v18, %v5244_v25  ;;  %v6925_v45 = vadd.f32 %v5667_v20, %v5249_v39 }
  0xf7   :  { %v177_v19 = vpop.f32.mrf.mxu0  ;;  %v262_v22 = vpop.f32.mrf.mxu1 }
  0xf8   :  { %v6915_v31 = vadd.f32 %v5244_v25, %v177_v19  ;;  %v6923_v44 = vadd.f32 %v5249_v39, %v262_v22 }
  0xfa   :  { %v5672_v21 = vpop.f32.mrf.mxu0 }
  0xfb   :  { %v6940_v18 = vadd.f32 %v5672_v21, %v5254_v62 }
  0xfc   :  { %v347_v24 = vpop.f32.mrf.mxu0 }
  0xfd   :  { %v6938_v3 = vadd.f32 %v5254_v62, %v347_v24 }
  0xff   :  { %v451_v26 = vpop.f32.mrf.mxu1 }
 0x100   :  { %v452_v27 = vadd.f32 %v6902_v23, %v451_v26 }
 0x101   :  { %v5683_v29 = vpop.f32.mrf.mxu1 }
 0x102   :  { %v608_v32 = vrot.slane %v452_v27, 1  ;;  %v609_v33 = vrot.slane %v452_v27, 2  ;;  %v527_v34 = vpop.f32.mrf.mxu0 }
 0x103   :  { %v528_v35 = vadd.f32 %v6911_v28, %v527_v34 }
 0x104   :  { %v612_v36 = vadd.f32 %v608_v32, %v6915_v31  ;;  %v613_v37 = vadd.f32 %v609_v33, %v6913_v30  ;;  %v5694_v38 = vpop.f32.mrf.mxu0 }
 0x105   :  { %v627_v42 = vrot.slane %v528_v35, 1  ;;  %v628_v43 = vrot.slane %v528_v35, 2 }
 0x106   :  { %v5262_v40 = vmul.f32 -1.442695, %v612_v36  ;;  %v5263_v41 = vmul.f32 -1.442695, %v613_v37 }
 0x107   :  { %v631_v47 = vadd.f32 %v627_v42, %v6923_v44  ;;  %v632_v48 = vadd.f32 %v628_v43, %v6925_v45 }
 0x108   :  { %6254 = vpow2.f32 %v5262_v40 }
 0x109   :  { %6256 = vpow2.f32 %v5263_v41  ;;  %v603_v46 = vpop.f32.mrf.mxu1  ;;  %v5264_v50 = vmul.f32 -1.442695, %v631_v47  ;;  %v5265_v51 = vmul.f32 -1.442695, %v632_v48 }
 0x10a   :  { %v604_v57 = vadd.f32 %v6932_v56, %v603_v46 }
 0x10b   :  { %v5705_v49 = vpop.f32.mrf.mxu1  ;;  %6258 = vpow2.f32 %v5264_v50 }
 0x10c   :  { %6260 = vpow2.f32 %v5265_v51  ;;  %v646_v61 = vrot.slane %v604_v57, 1  ;;  %v647_v0 = vrot.slane %v604_v57, 2 }
 0x115   :  { %v6255_v52 = vpop.eup %6254 }
 0x116   :  { %v6257_v53 = vpop.eup %6256  ;;  %v620_v54 = vadd.f32 1.0, %v6255_v52 }
 0x117   :  { %v621_v55 = vadd.f32 1.0, %v6257_v53 }
 0x118   :  { %6262 = vrcp.f32 %v620_v54  ;;  %v6259_v58 = vpop.eup %6258 }
 0x119   :  { %6264 = vrcp.f32 %v621_v55  ;;  %v6261_v59 = vpop.eup %6260  ;;  %v639_v60 = vadd.f32 1.0, %v6259_v58 }
 0x11a   :  { %v640_v63 = vadd.f32 1.0, %v6261_v59 }
 0x11b   :  { %6266 = vrcp.f32 %v639_v60 }
 0x11c   :  { %6268 = vrcp.f32 %v640_v63 }
 0x125   :  { %v6263_v1 = vpop.eup %6262 }
 0x126   :  { %v6265_v2 = vpop.eup %6264  ;;  %v650_v4 = vmul.f32 %v6263_v1, %v646_v61 }
 0x127   :  { %v651_v19 = vmul.f32 %v6265_v2, %v647_v0 }
 0x128   :  { %v652_v20 = vadd.f32 %v650_v4, %v6938_v3  ;;  %v6267_v25 = vpop.eup %6266 }
 0x129   :  { %v653_v22 = vadd.f32 %v651_v19, %v6940_v18  ;;  %v6269_v26 = vpop.eup %6268  ;;  %v656_v27 = vsub.f32 1.0, %v6267_v25  ;;  %v660_v34 = vmul.f32 0.0, %v6267_v25 }
 0x12a   :  { %6270 = vtanh.f32 %v652_v20  ;;  %v657_v32 = vsub.f32 1.0, %v6269_v26  ;;  %v661_v36 = vmul.f32 0.0, %v6269_v26 }
 0x12b   :  { %6272 = vtanh.f32 %v653_v22 }
 0x137   :  { %v6271_v29 = vpop.eup %6270 }
 0x138   :  { %v6273_v33 = vpop.eup %6272  ;;  %v658_v24 = vmul.f32 %v6271_v29, %v656_v27 }
 0x139   :  { %v659_v35 = vmul.f32 %v6273_v33, %v657_v32 }
 0x13a   :  { %v6944_v21 = vadd.f32 %v660_v34, %v658_v24 }
 0x13b   :  { %v6946_v37 = vadd.f32 %v661_v36, %v659_v35 }
 0x13c   :  { %665 = vst.msk [vmem:[#allocation2 - $0x7] sm:$0x80] %vm664_vm2, %v6944_v21  ;;  %v669_v38 = vrot.slane %v6944_v21, 7 }
 0x13d   :  { %666 = vst.msk [vmem:[#allocation2 + $0x1] sm:$0x80] %vm664_vm2, %v6946_v37  ;;  %v670_v39 = vrot.slane %v6946_v37, 6 }
 0x13f   :  { %v672_v40 = vsel %vm671_vm3, %v670_v39, %v669_v38 }
 0x140   :  { %5715 = vmatmul.mubr.msk.f32.vlgmr.msra.gmra.mxu0 %vm381_vm4, %v672_v40  ;;  %5726 = vmatmul.mubr.msk.f32.vlgmr.msra.gmra.mxu1 %vm381_vm4, %v672_v40 }
 0x141   :  { %5729 = vmatpush3.msra.mxu0 %v6853_v14  ;;  %5736 = vmatprep.mubr.msk.f32.mxu0 %vm6719_vm1, %v6718_v6 }
 0x142   :  { %5730 = vmatprep.subr.mxu0 %v6718_v6  ;;  %5740 = vmatpush3.msra.mxu1 %v6816_v5 }
 0x143   :  { %5731 = vmatpush3.msra.mxu0 %v6860_v15  ;;  %5741 = vmatprep.subr.mxu1 %v6718_v6 }
 0x144   :  { %5732 = vmatprep.subr.mxu0 %v6718_v6  ;;  %5742 = vmatpush3.msra.mxu1 %v6821_v7 }
 0x145   :  { %5733 = vmatpush3.msra.mxu0 %v6865_v16  ;;  %5743 = vmatprep.subr.mxu1 %v6718_v6 }
 0x146   :  { %5734 = vmatprep.subr.mxu0 %v6718_v6  ;;  %5744 = vmatpush3.msra.mxu1 %v6828_v9 }
 0x147   :  { %5735 = vmatpush3.msra.mxu0 %v6872_v17  ;;  %5745 = vmatprep.subr.mxu1 %v6718_v6 }
 0x148   :  { %5737 = vmatmul.mubr.msk.f32.vlgmr.msra.gmra.mxu0 %vm381_vm4, %v672_v40  ;;  %5750 = vmatprep.subr.mxu0 %v6718_v6 }
 0x149   :  { %5751 = vmatpush3.msra.mxu0 %v6826_v8  ;;  %5746 = vmatpush3.msra.mxu1 %v6836_v11 }
 0x14a   :  { %5752 = vmatprep.subr.mxu0 %v6718_v6  ;;  %5747 = vmatprep.mubr.msk.f32.mxu1 %vm6719_vm1, %v6718_v6 }
 0x14b   :  { %5753 = vmatpush3.msra.mxu0 %v6834_v10  ;;  %5758 = vmatprep.mubr.msk.f32.mxu0 %vm6719_vm1, %v6718_v6 }
 0x14c   :  { %5754 = vmatprep.subr.mxu0 %v6718_v6  ;;  %5761 = vmatprep.subr.mxu1 %v6718_v6 }
 0x14d   :  { %5755 = vmatpush3.msra.mxu0 %v6842_v12 }
 0x14e   :  { %5756 = vmatprep.subr.mxu0 %v6718_v6 }
 0x14f   :  { %5757 = vmatpush3.msra.mxu0 %v6849_v13 }
 0x150   :  { %5772 = vmatprep.subr.mxu0 %v6718_v6 }
 0x200   :  { %v741_v41 = vpop.f32.mrf.mxu0  ;;  %v811_v42 = vpop.f32.mrf.mxu1 }
 0x201   :  { %v742_v43 = vadd.f32 %v6902_v23, %v741_v41  ;;  %v812_v50 = vadd.f32 %v6911_v28, %v811_v42  ;;  %v938_v41 = vrot.slane %v6944_v21, 1 }
 0x202   :  { %v5716_v46 = vpop.f32.mrf.mxu0  ;;  %v5727_v47 = vpop.f32.mrf.mxu1 }
 0x203   :  { %v886_v48 = vrot.slane %v742_v43, 2  ;;  %v887_v49 = vrot.slane %v742_v43, 3  ;;  %v905_v55 = vrot.slane %v812_v50, 2  ;;  %v906_v57 = vrot.slane %v812_v50, 3 }
 0x204   :  { %v939_v46 = vrot.slane %v6946_v37, 1 }
 0x205   :  { %v890_v51 = vadd.f32 %v886_v48, %v6915_v31  ;;  %v891_v52 = vadd.f32 %v887_v49, %v6913_v30  ;;  %v909_v60 = vadd.f32 %v905_v55, %v6923_v44  ;;  %v910_v61 = vadd.f32 %v906_v57, %v6925_v45 }
 0x207   :  { %v5269_v53 = vmul.f32 -1.442695, %v890_v51  ;;  %v5270_v54 = vmul.f32 -1.442695, %v891_v52  ;;  %v5271_v62 = vmul.f32 -1.442695, %v909_v60 }
 0x208   :  { %v881_v58 = vpop.f32.mrf.mxu0  ;;  %v5272_v63 = vmul.f32 -1.442695, %v910_v61 }
 0x209   :  { %6274 = vpow2.f32 %v5269_v53  ;;  %v882_v22 = vadd.f32 %v6932_v56, %v881_v58 }
 0x20a   :  { %6276 = vpow2.f32 %v5270_v54  ;;  %v5738_v59 = vpop.f32.mrf.mxu0 }
 0x20b   :  { %6278 = vpow2.f32 %v5271_v62  ;;  %v924_v27 = vrot.slane %v882_v22, 2  ;;  %v925_v32 = vrot.slane %v882_v22, 3 }
 0x20c   :  { %6280 = vpow2.f32 %v5272_v63 }
 0x216   :  { %v6275_v0 = vpop.eup %6274 }
 0x217   :  { %v6277_v1 = vpop.eup %6276  ;;  %v898_v2 = vadd.f32 1.0, %v6275_v0 }
 0x218   :  { %v899_v4 = vadd.f32 1.0, %v6277_v1  ;;  %v6279_v19 = vpop.eup %6278 }
 0x219   :  { %6282 = vrcp.f32 %v898_v2  ;;  %v6281_v20 = vpop.eup %6280  ;;  %v917_v25 = vadd.f32 1.0, %v6279_v19 }
 0x21a   :  { %6284 = vrcp.f32 %v899_v4  ;;  %v918_v26 = vadd.f32 1.0, %v6281_v20 }
 0x21b   :  { %6286 = vrcp.f32 %v917_v25 }
 0x21c   :  { %6288 = vrcp.f32 %v918_v26 }
 0x226   :  { %v6283_v29 = vpop.eup %6282 }
 0x227   :  { %v6285_v33 = vpop.eup %6284  ;;  %v928_v24 = vmul.f32 %v6283_v29, %v924_v27 }
 0x228   :  { %v929_v34 = vmul.f32 %v6285_v33, %v925_v32  ;;  %v6287_v38 = vpop.eup %6286 }
 0x229   :  { %v930_v35 = vadd.f32 %v928_v24, %v6938_v3  ;;  %v6289_v39 = vpop.eup %6288  ;;  %v934_v40 = vsub.f32 1.0, %v6287_v38  ;;  %v942_v49 = vmul.f32 %v6287_v38, %v938_v41 }
 0x22a   :  { %v931_v36 = vadd.f32 %v929_v34, %v6940_v18  ;;  %v935_v43 = vsub.f32 1.0, %v6289_v39  ;;  %v943_v51 = vmul.f32 %v6289_v39, %v939_v46 }
 0x22b   :  { %6290 = vtanh.f32 %v930_v35 }
 0x22c   :  { %6292 = vtanh.f32 %v931_v36 }
 0x238   :  { %v6291_v42 = vpop.eup %6290 }
 0x239   :  { %v6293_v47 = vpop.eup %6292  ;;  %v936_v48 = vmul.f32 %v6291_v42, %v934_v40 }
 0x23a   :  { %v937_v50 = vmul.f32 %v6293_v47, %v935_v43 }
 0x23b   :  { %v6997_v52 = vadd.f32 %v942_v49, %v936_v48 }
 0x23c   :  { %v6999_v53 = vadd.f32 %v943_v51, %v937_v50 }
 0x23d   :  { %947 = vst.msk [vmem:[#allocation2 - $0x5] sm:$0x40] %vm946_vm5, %v6997_v52  ;;  %v951_v54 = vrot.slane %v6997_v52, 6 }
 0x23e   :  { %948 = vst.msk [vmem:[#allocation2 + $0x3] sm:$0x40] %vm946_vm5, %v6999_v53  ;;  %v952_v21 = vrot.slane %v6999_v53, 5 }
 0x240   :  { %v953_v37 = vsel %vm671_vm3, %v952_v21, %v951_v54 }
 0x241   :  { %5748 = vmatmul.mubr.msk.f32.vlgmr.msra.gmra.mxu1 %vm381_vm4, %v953_v37  ;;  %5759 = vmatmul.mubr.msk.f32.vlgmr.msra.gmra.mxu0 %vm381_vm4, %v953_v37 }
 0x242   :  { %5762 = vmatpush3.msra.mxu1 %v6853_v14  ;;  %5769 = vmatprep.mubr.msk.f32.mxu1 %vm6719_vm1, %v6718_v6 }
 0x243   :  { %5763 = vmatprep.subr.mxu1 %v6718_v6  ;;  %5773 = vmatpush3.msra.mxu0 %v6816_v5 }
 0x244   :  { %5764 = vmatpush3.msra.mxu1 %v6860_v15  ;;  %5774 = vmatprep.subr.mxu0 %v6718_v6 }
 0x245   :  { %5765 = vmatprep.subr.mxu1 %v6718_v6  ;;  %5775 = vmatpush3.msra.mxu0 %v6821_v7 }
 0x246   :  { %5766 = vmatpush3.msra.mxu1 %v6865_v16  ;;  %5776 = vmatprep.subr.mxu0 %v6718_v6 }
 0x247   :  { %5767 = vmatprep.subr.mxu1 %v6718_v6  ;;  %5777 = vmatpush3.msra.mxu0 %v6828_v9 }
 0x248   :  { %5768 = vmatpush3.msra.mxu1 %v6872_v17  ;;  %5778 = vmatprep.subr.mxu0 %v6718_v6 }
 0x249   :  { %5770 = vmatmul.mubr.msk.f32.vlgmr.msra.gmra.mxu1 %vm381_vm4, %v953_v37  ;;  %5783 = vmatprep.subr.mxu1 %v6718_v6 }
 0x24a   :  { %5784 = vmatpush3.msra.mxu1 %v6826_v8  ;;  %5779 = vmatpush3.msra.mxu0 %v6836_v11 }
 0x24b   :  { %5785 = vmatprep.subr.mxu1 %v6718_v6  ;;  %5780 = vmatprep.mubr.msk.f32.mxu0 %vm6719_vm1, %v6718_v6 }
 0x24c   :  { %5786 = vmatpush3.msra.mxu1 %v6834_v10  ;;  %5791 = vmatprep.mubr.msk.f32.mxu1 %vm6719_vm1, %v6718_v6 }
 0x24d   :  { %5787 = vmatprep.subr.mxu1 %v6718_v6  ;;  %5794 = vmatprep.subr.mxu0 %v6718_v6 }
 0x24e   :  { %5788 = vmatpush3.msra.mxu1 %v6842_v12 }
 0x24f   :  { %5789 = vmatprep.subr.mxu1 %v6718_v6 }
 0x250   :  { %5790 = vmatpush3.msra.mxu1 %v6849_v13 }
 0x251   :  { %5805 = vmatprep.subr.mxu1 %v6718_v6 }
 0x301   :  { %v1022_v55 = vpop.f32.mrf.mxu1  ;;  %v1092_v57 = vpop.f32.mrf.mxu0 }
 0x302   :  { %v1023_v58 = vadd.f32 %v6902_v23, %v1022_v55  ;;  %v1093_v63 = vadd.f32 %v6911_v28, %v1092_v57  ;;  %v1219_v55 = vrot.slane %v6997_v52, 1 }
 0x303   :  { %v5749_v59 = vpop.f32.mrf.mxu1  ;;  %v5760_v60 = vpop.f32.mrf.mxu0 }
 0x304   :  { %v1167_v61 = vrot.slane %v1023_v58, 3  ;;  %v1168_v62 = vrot.slane %v1023_v58, 4  ;;  %v1186_v19 = vrot.slane %v1093_v63, 3  ;;  %v1187_v20 = vrot.slane %v1093_v63, 4 }
 0x305   :  { %v1220_v59 = vrot.slane %v6999_v53, 1 }
 0x306   :  { %v1171_v0 = vadd.f32 %v1167_v61, %v6915_v31  ;;  %v1172_v1 = vadd.f32 %v1168_v62, %v6913_v30  ;;  %v1190_v26 = vadd.f32 %v1186_v19, %v6923_v44  ;;  %v1191_v27 = vadd.f32 %v1187_v20, %v6925_v45 }
 0x308   :  { %v5276_v2 = vmul.f32 -1.442695, %v1171_v0  ;;  %v5277_v4 = vmul.f32 -1.442695, %v1172_v1  ;;  %v5278_v29 = vmul.f32 -1.442695, %v1190_v26 }
 0x309   :  { %v1162_v22 = vpop.f32.mrf.mxu1  ;;  %v5279_v32 = vmul.f32 -1.442695, %v1191_v27 }
 0x30a   :  { %6294 = vpow2.f32 %v5276_v2  ;;  %v1163_v39 = vadd.f32 %v6932_v56, %v1162_v22 }
 0x30b   :  { %6296 = vpow2.f32 %v5277_v4  ;;  %v5771_v25 = vpop.f32.mrf.mxu1 }
 0x30c   :  { %6298 = vpow2.f32 %v5278_v29  ;;  %v1205_v42 = vrot.slane %v1163_v39, 3  ;;  %v1206_v46 = vrot.slane %v1163_v39, 4 }
 0x30d   :  { %6300 = vpow2.f32 %v5279_v32 }
 0x317   :  { %v6295_v33 = vpop.eup %6294 }
 0x318   :  { %v6297_v24 = vpop.eup %6296  ;;  %v1179_v34 = vadd.f32 1.0, %v6295_v33 }
 0x319   :  { %v1180_v35 = vadd.f32 1.0, %v6297_v24  ;;  %v6299_v36 = vpop.eup %6298 }
 0x31a   :  { %6302 = vrcp.f32 %v1179_v34  ;;  %v6301_v38 = vpop.eup %6300  ;;  %v1198_v40 = vadd.f32 1.0, %v6299_v36 }
 0x31b   :  { %6304 = vrcp.f32 %v1180_v35  ;;  %v1199_v41 = vadd.f32 1.0, %v6301_v38 }
 0x31c   :  { %6306 = vrcp.f32 %v1198_v40 }
 0x31d   :  { %6308 = vrcp.f32 %v1199_v41 }
 0x327   :  { %v6303_v43 = vpop.eup %6302 }
 0x328   :  { %v6305_v47 = vpop.eup %6304  ;;  %v1209_v48 = vmul.f32 %v6303_v43, %v1205_v42 }
 0x329   :  { %v1210_v49 = vmul.f32 %v6305_v47, %v1206_v46  ;;  %v6307_v54 = vpop.eup %6306 }
 0x32a   :  { %v1211_v50 = vadd.f32 %v1209_v48, %v6938_v3  ;;  %v6309_v21 = vpop.eup %6308  ;;  %v1215_v37 = vsub.f32 1.0, %v6307_v54  ;;  %v1223_v62 = vmul.f32 %v6307_v54, %v1219_v55 }
 0x32b   :  { %v1212_v51 = vadd.f32 %v1210_v49, %v6940_v18  ;;  %v1216_v58 = vsub.f32 1.0, %v6309_v21  ;;  %v1224_v0 = vmul.f32 %v6309_v21, %v1220_v59 }
 0x32c   :  { %6310 = vtanh.f32 %v1211_v50 }
 0x32d   :  { %6312 = vtanh.f32 %v1212_v51 }
 0x339   :  { %v6311_v57 = vpop.eup %6310 }
 0x33a   :  { %v6313_v60 = vpop.eup %6312  ;;  %v1217_v61 = vmul.f32 %v6311_v57, %v1215_v37 }
 0x33b   :  { %v1218_v63 = vmul.f32 %v6313_v60, %v1216_v58 }
 0x33c   :  { %v7050_v1 = vadd.f32 %v1223_v62, %v1217_v61 }
 0x33d   :  { %v7052_v2 = vadd.f32 %v1224_v0, %v1218_v63 }
 0x33e   :  { %1228 = vst.msk [vmem:[#allocation2 - $0x3] sm:$0x20] %vm1227_vm6, %v7050_v1  ;;  %v1232_v4 = vrot.slane %v7050_v1, 5 }
 0x33f   :  { %1229 = vst.msk [vmem:[#allocation2 + $0x5] sm:$0x20] %vm1227_vm6, %v7052_v2  ;;  %v1233_v52 = vrot.slane %v7052_v2, 4 }
 0x341   :  { %v1234_v53 = vsel %vm671_vm3, %v1233_v52, %v1232_v4 }
 0x342   :  { %5781 = vmatmul.mubr.msk.f32.vlgmr.msra.gmra.mxu0 %vm381_vm4, %v1234_v53  ;;  %5792 = vmatmul.mubr.msk.f32.vlgmr.msra.gmra.mxu1 %vm381_vm4, %v1234_v53 }
 0x343   :  { %5795 = vmatpush3.msra.mxu0 %v6853_v14  ;;  %5802 = vmatprep.mubr.msk.f32.mxu0 %vm6719_vm1, %v6718_v6 }
 0x344   :  { %5796 = vmatprep.subr.mxu0 %v6718_v6  ;;  %5806 = vmatpush3.msra.mxu1 %v6816_v5 }
 0x345   :  { %5797 = vmatpush3.msra.mxu0 %v6860_v15  ;;  %5807 = vmatprep.subr.mxu1 %v6718_v6 }
 0x346   :  { %5798 = vmatprep.subr.mxu0 %v6718_v6  ;;  %5808 = vmatpush3.msra.mxu1 %v6821_v7 }
 0x347   :  { %5799 = vmatpush3.msra.mxu0 %v6865_v16  ;;  %5809 = vmatprep.subr.mxu1 %v6718_v6 }
 0x348   :  { %5800 = vmatprep.subr.mxu0 %v6718_v6  ;;  %5810 = vmatpush3.msra.mxu1 %v6828_v9 }
 0x349   :  { %5801 = vmatpush3.msra.mxu0 %v6872_v17  ;;  %5811 = vmatprep.subr.mxu1 %v6718_v6 }
 0x34a   :  { %5803 = vmatmul.mubr.msk.f32.vlgmr.msra.gmra.mxu0 %vm381_vm4, %v1234_v53  ;;  %5816 = vmatprep.subr.mxu0 %v6718_v6 }
 0x34b   :  { %5817 = vmatpush3.msra.mxu0 %v6826_v8  ;;  %5812 = vmatpush3.msra.mxu1 %v6836_v11 }
 0x34c   :  { %5818 = vmatprep.subr.mxu0 %v6718_v6  ;;  %5813 = vmatprep.mubr.msk.f32.mxu1 %vm6719_vm1, %v6718_v6 }
 0x34d   :  { %5819 = vmatpush3.msra.mxu0 %v6834_v10  ;;  %5824 = vmatprep.mubr.msk.f32.mxu0 %vm6719_vm1, %v6718_v6 }
 0x34e   :  { %5820 = vmatprep.subr.mxu0 %v6718_v6  ;;  %5827 = vmatprep.subr.mxu1 %v6718_v6 }
 0x34f   :  { %5821 = vmatpush3.msra.mxu0 %v6842_v12 }
 0x350   :  { %5822 = vmatprep.subr.mxu0 %v6718_v6 }
 0x351   :  { %5823 = vmatpush3.msra.mxu0 %v6849_v13 }
 0x352   :  { %5838 = vmatprep.subr.mxu0 %v6718_v6 }
 0x402   :  { %v1303_v19 = vpop.f32.mrf.mxu0  ;;  %v1373_v20 = vpop.f32.mrf.mxu1 }
 0x403   :  { %v1304_v22 = vadd.f32 %v6902_v23, %v1303_v19  ;;  %v1374_v32 = vadd.f32 %v6911_v28, %v1373_v20  ;;  %v1500_v19 = vrot.slane %v7050_v1, 1 }
 0x404   :  { %v5782_v25 = vpop.f32.mrf.mxu0  ;;  %v5793_v26 = vpop.f32.mrf.mxu1 }
 0x405   :  { %v1448_v27 = vrot.slane %v1304_v22, 4  ;;  %v1449_v29 = vrot.slane %v1304_v22, 5  ;;  %v1467_v36 = vrot.slane %v1374_v32, 4  ;;  %v1468_v38 = vrot.slane %v1374_v32, 5 }
 0x406   :  { %v1501_v25 = vrot.slane %v7052_v2, 1 }
 0x407   :  { %v1452_v33 = vadd.f32 %v1448_v27, %v6915_v31  ;;  %v1453_v24 = vadd.f32 %v1449_v29, %v6913_v30  ;;  %v1471_v41 = vadd.f32 %v1467_v36, %v6923_v44  ;;  %v1472_v42 = vadd.f32 %v1468_v38, %v6925_v45 }
 0x409   :  { %v5283_v34 = vmul.f32 -1.442695, %v1452_v33  ;;  %v5284_v35 = vmul.f32 -1.442695, %v1453_v24  ;;  %v5285_v43 = vmul.f32 -1.442695, %v1471_v41 }
 0x40a   :  { %v1443_v39 = vpop.f32.mrf.mxu0  ;;  %v5286_v46 = vmul.f32 -1.442695, %v1472_v42 }
 0x40b   :  { %6314 = vpow2.f32 %v5283_v34  ;;  %v1444_v21 = vadd.f32 %v6932_v56, %v1443_v39 }
 0x40c   :  { %6316 = vpow2.f32 %v5284_v35  ;;  %v5804_v40 = vpop.f32.mrf.mxu0 }
 0x40d   :  { %6318 = vpow2.f32 %v5285_v43  ;;  %v1486_v57 = vrot.slane %v1444_v21, 4  ;;  %v1487_v59 = vrot.slane %v1444_v21, 5 }
 0x40e   :  { %6320 = vpow2.f32 %v5286_v46 }
 0x418   :  { %v6315_v47 = vpop.eup %6314 }
 0x419   :  { %v6317_v48 = vpop.eup %6316  ;;  %v1460_v49 = vadd.f32 1.0, %v6315_v47 }
 0x41a   :  { %v1461_v50 = vadd.f32 1.0, %v6317_v48  ;;  %v6319_v51 = vpop.eup %6318 }
 0x41b   :  { %6322 = vrcp.f32 %v1460_v49  ;;  %v6321_v54 = vpop.eup %6320  ;;  %v1479_v37 = vadd.f32 1.0, %v6319_v51 }
 0x41c   :  { %6324 = vrcp.f32 %v1461_v50  ;;  %v1480_v55 = vadd.f32 1.0, %v6321_v54 }
 0x41d   :  { %6326 = vrcp.f32 %v1479_v37 }
 0x41e   :  { %6328 = vrcp.f32 %v1480_v55 }
 0x428   :  { %v6323_v58 = vpop.eup %6322 }
 0x429   :  { %v6325_v60 = vpop.eup %6324  ;;  %v1490_v61 = vmul.f32 %v6323_v58, %v1486_v57 }
 0x42a   :  { %v1491_v62 = vmul.f32 %v6325_v60, %v1487_v59  ;;  %v6327_v4 = vpop.eup %6326 }
 0x42b   :  { %v1492_v63 = vadd.f32 %v1490_v61, %v6938_v3  ;;  %v6329_v52 = vpop.eup %6328  ;;  %v1496_v53 = vsub.f32 1.0, %v6327_v4  ;;  %v1504_v29 = vmul.f32 %v6327_v4, %v1500_v19 }
 0x42c   :  { %v1493_v0 = vadd.f32 %v1491_v62, %v6940_v18  ;;  %v1497_v22 = vsub.f32 1.0, %v6329_v52  ;;  %v1505_v33 = vmul.f32 %v6329_v52, %v1501_v25 }
 0x42d   :  { %6330 = vtanh.f32 %v1492_v63 }
 0x42e   :  { %6332 = vtanh.f32 %v1493_v0 }
 0x43a   :  { %v6331_v20 = vpop.eup %6330 }
 0x43b   :  { %v6333_v26 = vpop.eup %6332  ;;  %v1498_v27 = vmul.f32 %v6331_v20, %v1496_v53 }
 0x43c   :  { %v1499_v32 = vmul.f32 %v6333_v26, %v1497_v22 }
 0x43d   :  { %v7103_v24 = vadd.f32 %v1504_v29, %v1498_v27 }
 0x43e   :  { %v7105_v34 = vadd.f32 %v1505_v33, %v1499_v32 }
 0x43f   :  { %1509 = vst.msk [vmem:[#allocation2 - $0x1] sm:$0x10] %vm1508_vm7, %v7103_v24  ;;  %v1513_v35 = vrot.slane %v7103_v24, 4  ;;  %v1781_v20 = vrot.slane %v7103_v24, 1 }
 0x440   :  { %1510 = vst.msk [vmem:[#allocation2 + $0x7] sm:$0x10] %vm1508_vm7, %v7105_v34  ;;  %v1514_v1 = vrot.slane %v7105_v34, 3  ;;  %v1782_v26 = vrot.slane %v7105_v34, 1 }
 0x442   :  { %v1515_v2 = vsel %vm671_vm3, %v1514_v1, %v1513_v35 }
 0x443   :  { %5814 = vmatmul.mubr.msk.f32.vlgmr.msra.gmra.mxu1 %vm381_vm4, %v1515_v2  ;;  %5825 = vmatmul.mubr.msk.f32.vlgmr.msra.gmra.mxu0 %vm381_vm4, %v1515_v2 }
 0x444   :  { %5828 = vmatpush3.msra.mxu1 %v6853_v14  ;;  %5835 = vmatprep.mubr.msk.f32.mxu1 %vm6719_vm1, %v6718_v6 }
 0x445   :  { %5829 = vmatprep.subr.mxu1 %v6718_v6  ;;  %5839 = vmatpush3.msra.mxu0 %v6816_v5 }
 0x446   :  { %5830 = vmatpush3.msra.mxu1 %v6860_v15  ;;  %5840 = vmatprep.subr.mxu0 %v6718_v6 }
 0x447   :  { %5831 = vmatprep.subr.mxu1 %v6718_v6  ;;  %5841 = vmatpush3.msra.mxu0 %v6821_v7 }
 0x448   :  { %5832 = vmatpush3.msra.mxu1 %v6865_v16  ;;  %5842 = vmatprep.subr.mxu0 %v6718_v6 }
 0x449   :  { %5833 = vmatprep.subr.mxu1 %v6718_v6  ;;  %5843 = vmatpush3.msra.mxu0 %v6828_v9 }
 0x44a   :  { %5834 = vmatpush3.msra.mxu1 %v6872_v17  ;;  %5844 = vmatprep.subr.mxu0 %v6718_v6 }
 0x44b   :  { %5836 = vmatmul.mubr.msk.f32.vlgmr.msra.gmra.mxu1 %vm381_vm4, %v1515_v2  ;;  %5849 = vmatprep.subr.mxu1 %v6718_v6 }
 0x44c   :  { %5850 = vmatpush3.msra.mxu1 %v6826_v8  ;;  %5845 = vmatpush3.msra.mxu0 %v6836_v11 }
 0x44d   :  { %5851 = vmatprep.subr.mxu1 %v6718_v6  ;;  %5846 = vmatprep.mubr.msk.f32.mxu0 %vm6719_vm1, %v6718_v6 }
 0x44e   :  { %5852 = vmatpush3.msra.mxu1 %v6834_v10  ;;  %5857 = vmatprep.mubr.msk.f32.mxu1 %vm6719_vm1, %v6718_v6 }
 0x44f   :  { %5853 = vmatprep.subr.mxu1 %v6718_v6  ;;  %5860 = vmatprep.subr.mxu0 %v6718_v6 }
 0x450   :  { %5854 = vmatpush3.msra.mxu1 %v6842_v12 }
 0x451   :  { %5855 = vmatprep.subr.mxu1 %v6718_v6 }
 0x452   :  { %5856 = vmatpush3.msra.mxu1 %v6849_v13 }
 0x453   :  { %5871 = vmatprep.subr.mxu1 %v6718_v6 }
 0x503   :  { %v1584_v5 = vpop.f32.mrf.mxu1  ;;  %v1654_v7 = vpop.f32.mrf.mxu0 }
 0x504   :  { %v1585_v8 = vadd.f32 %v6902_v23, %v1584_v5  ;;  %v1655_v15 = vadd.f32 %v6911_v28, %v1654_v7  ;;  %v7167_v7 = vld [vmem:[#allocation6 + $0x58] sm:$0xff] }
 0x505   :  { %v5815_v9 = vpop.f32.mrf.mxu1  ;;  %v5826_v10 = vpop.f32.mrf.mxu0 }
 0x506   :  { %v1729_v11 = vrot.slane %v1585_v8, 5  ;;  %v1730_v14 = vrot.slane %v1585_v8, 6  ;;  %v1748_v39 = vrot.slane %v1655_v15, 5  ;;  %v1749_v13 = vrot.slane %v1655_v15, 6  ;;  %v7173_v8 = vld [vmem:[#allocation6 + $0x18] sm:$0xff]  ;;  %v7176_v9 = vld [vmem:[#allocation6 + $0x50] sm:$0xff] }
 0x507   :  { %v7181_v10 = vld [vmem:[#allocation6 + $0x10] sm:$0xff]  ;;  %v7196_v15 = vld [vmem:[#allocation6 + $0x38] sm:$0xff] }
 0x508   :  { %v1733_v16 = vadd.f32 %v1729_v11, %v6915_v31  ;;  %v1734_v12 = vadd.f32 %v1730_v14, %v6913_v30  ;;  %v1752_v42 = vadd.f32 %v1748_v39, %v6923_v44  ;;  %v1753_v43 = vadd.f32 %v1749_v13, %v6925_v45  ;;  %v7184_v11 = vld [vmem:[#allocation6 + $0x48] sm:$0xff] }
 0x509   :  { %v7189_v14 = vld [vmem:[#allocation6 + $0x8] sm:$0xff] }
 0x50a   :  { %v5290_v36 = vmul.f32 -1.442695, %v1733_v16  ;;  %v5291_v38 = vmul.f32 -1.442695, %v1734_v12  ;;  %v5292_v46 = vmul.f32 -1.442695, %v1752_v42 }
 0x50b   :  { %v1724_v40 = vpop.f32.mrf.mxu1  ;;  %v5293_v47 = vmul.f32 -1.442695, %v1753_v43  ;;  %v7199_v16 = vld [vmem:[#allocation6] sm:$0xff]  ;;  %v7212_v12 = vld [vmem:[#allocation6 + $0x28] sm:$0xff] }
 0x50c   :  { %6334 = vpow2.f32 %v5290_v36  ;;  %v1725_v37 = vadd.f32 %v6932_v56, %v1724_v40  ;;  %v7216_v36 = vld [vmem:[#allocation6 + $0x20] sm:$0xff] }
 0x50d   :  { %6336 = vpow2.f32 %v5291_v38  ;;  %v5837_v41 = vpop.f32.mrf.mxu1 }
 0x50e   :  { %6338 = vpow2.f32 %v5292_v46  ;;  %v1767_v58 = vrot.slane %v1725_v37, 5  ;;  %v1768_v60 = vrot.slane %v1725_v37, 6 }
 0x50f   :  { %6340 = vpow2.f32 %v5293_v47 }
 0x519   :  { %v6335_v48 = vpop.eup %6334 }
 0x51a   :  { %v6337_v49 = vpop.eup %6336  ;;  %v1741_v50 = vadd.f32 1.0, %v6335_v48 }
 0x51b   :  { %v1742_v51 = vadd.f32 1.0, %v6337_v49  ;;  %v6339_v54 = vpop.eup %6338 }
 0x51c   :  { %6342 = vrcp.f32 %v1741_v50  ;;  %v6341_v21 = vpop.eup %6340  ;;  %v1760_v55 = vadd.f32 1.0, %v6339_v54 }
 0x51d   :  { %6344 = vrcp.f32 %v1742_v51  ;;  %v1761_v57 = vadd.f32 1.0, %v6341_v21 }
 0x51e   :  { %6346 = vrcp.f32 %v1760_v55 }
 0x51f   :  { %6348 = vrcp.f32 %v1761_v57 }
 0x529   :  { %v6343_v59 = vpop.eup %6342 }
 0x52a   :  { %v6345_v61 = vpop.eup %6344  ;;  %v1771_v62 = vmul.f32 %v6343_v59, %v1767_v58 }
 0x52b   :  { %v1772_v63 = vmul.f32 %v6345_v61, %v1768_v60  ;;  %v6347_v52 = vpop.eup %6346 }
 0x52c   :  { %v1773_v0 = vadd.f32 %v1771_v62, %v6938_v3  ;;  %v6349_v53 = vpop.eup %6348  ;;  %v1777_v19 = vsub.f32 1.0, %v6347_v52  ;;  %v1785_v32 = vmul.f32 %v6347_v52, %v1781_v20 }
 0x52d   :  { %v1774_v4 = vadd.f32 %v1772_v63, %v6940_v18  ;;  %v1778_v25 = vsub.f32 1.0, %v6349_v53  ;;  %v1786_v35 = vmul.f32 %v6349_v53, %v1782_v26 }
 0x52e   :  { %6350 = vtanh.f32 %v1773_v0 }
 0x52f   :  { %6352 = vtanh.f32 %v1774_v4 }
 0x53b   :  { %v6351_v22 = vpop.eup %6350 }
 0x53c   :  { %v6353_v27 = vpop.eup %6352  ;;  %v1779_v29 = vmul.f32 %v6351_v22, %v1777_v19 }
 0x53d   :  { %v1780_v33 = vmul.f32 %v6353_v27, %v1778_v25 }
 0x53e   :  { %v7156_v1 = vadd.f32 %v1785_v32, %v1779_v29 }
 0x53f   :  { %v7158_v2 = vadd.f32 %v1786_v35, %v1780_v33 }
 0x540   :  { %1790 = vst.msk [vmem:[#allocation2 + $0x1] sm:$0x8] %vm1789_vm8, %v7156_v1  ;;  %v1794_v5 = vrot.slane %v7156_v1, 3 }
 0x541   :  { %1791 = vst.msk [vmem:[#allocation2 + $0x9] sm:$0x8] %vm1789_vm8, %v7158_v2  ;;  %v1795_v24 = vrot.slane %v7158_v2, 2 }
 0x543   :  { %v1796_v34 = vsel %vm671_vm3, %v1795_v24, %v1794_v5 }
 0x544   :  { %5847 = vmatmul.mubr.msk.f32.vlgmr.msra.gmra.mxu0 %vm381_vm4, %v1796_v34  ;;  %5858 = vmatmul.mubr.msk.f32.vlgmr.msra.gmra.mxu1 %vm381_vm4, %v1796_v34 }
 0x545   :  { %5861 = vmatpush3.msra.mxu0 %v7167_v7  ;;  %5868 = vmatprep.mubr.msk.f32.mxu0 %vm6719_vm1, %v6718_v6 }
 0x546   :  { %5862 = vmatprep.subr.mxu0 %v6718_v6  ;;  %5872 = vmatpush3.msra.mxu1 %v7173_v8 }
 0x547   :  { %5863 = vmatpush3.msra.mxu0 %v7176_v9  ;;  %5873 = vmatprep.subr.mxu1 %v6718_v6 }
 0x548   :  { %5864 = vmatprep.subr.mxu0 %v6718_v6  ;;  %5874 = vmatpush3.msra.mxu1 %v7181_v10 }
 0x549   :  { %5865 = vmatpush3.msra.mxu0 %v7184_v11  ;;  %5875 = vmatprep.subr.mxu1 %v6718_v6 }
 0x54a   :  { %5866 = vmatprep.subr.mxu0 %v6718_v6  ;;  %5876 = vmatpush3.msra.mxu1 %v7189_v14 }
 0x54b   :  { %5867 = vmatpush3.msra.mxu0 %v6872_v17  ;;  %5877 = vmatprep.subr.mxu1 %v6718_v6  ;;  %v7205_v17 = vld [vmem:[#allocation6 + $0x30] sm:$0xff] }
 0x54c   :  { %5869 = vmatmul.mubr.msk.f32.vlgmr.msra.gmra.mxu0 %vm381_vm4, %v1796_v34  ;;  %5882 = vmatprep.subr.mxu0 %v6718_v6  ;;  %v2063_v34 = vrot.slane %v7158_v2, 1 }
 0x54d   :  { %5883 = vmatpush3.msra.mxu0 %v7196_v15  ;;  %5878 = vmatpush3.msra.mxu1 %v7199_v16 }
 0x54e   :  { %5884 = vmatprep.subr.mxu0 %v6718_v6  ;;  %5879 = vmatprep.mubr.msk.f32.mxu1 %vm6719_vm1, %v6718_v6 }
 0x54f   :  { %5885 = vmatpush3.msra.mxu0 %v7205_v17  ;;  %5890 = vmatprep.mubr.msk.f32.mxu0 %vm6719_vm1, %v6718_v6 }
 0x550   :  { %5886 = vmatprep.subr.mxu0 %v6718_v6  ;;  %5893 = vmatprep.subr.mxu1 %v6718_v6 }
 0x551   :  { %5887 = vmatpush3.msra.mxu0 %v7212_v12 }
 0x552   :  { %5888 = vmatprep.subr.mxu0 %v6718_v6 }
 0x553   :  { %5889 = vmatpush3.msra.mxu0 %v7216_v36 }
 0x554   :  { %5904 = vmatprep.subr.mxu0 %v6718_v6 }
 0x604   :  { %v1865_v38 = vpop.f32.mrf.mxu0  ;;  %v1935_v39 = vpop.f32.mrf.mxu1 }
 0x605   :  { %v1866_v13 = vadd.f32 %v6902_v23, %v1865_v38  ;;  %v1936_v46 = vadd.f32 %v6911_v28, %v1935_v39 }
 0x606   :  { %v5848_v40 = vpop.f32.mrf.mxu0  ;;  %v5859_v41 = vpop.f32.mrf.mxu1 }
 0x607   :  { %v2010_v42 = vrot.slane %v1866_v13, 6  ;;  %v2011_v43 = vrot.slane %v1866_v13, 7  ;;  %v2029_v51 = vrot.slane %v1936_v46, 6  ;;  %v2030_v54 = vrot.slane %v1936_v46, 7 }
 0x609   :  { %v2014_v47 = vadd.f32 %v2010_v42, %v6915_v31  ;;  %v2015_v48 = vadd.f32 %v2011_v43, %v6913_v30  ;;  %v2033_v23 = vadd.f32 %v2029_v51, %v6923_v44  ;;  %v2034_v55 = vadd.f32 %v2030_v54, %v6925_v45 }
 0x60b   :  { %v5297_v49 = vmul.f32 -1.442695, %v2014_v47  ;;  %v5298_v50 = vmul.f32 -1.442695, %v2015_v48  ;;  %v5299_v57 = vmul.f32 -1.442695, %v2033_v23 }
 0x60c   :  { %v2005_v21 = vpop.f32.mrf.mxu0  ;;  %v5300_v58 = vmul.f32 -1.442695, %v2034_v55  ;;  %v7257_v47 = vld [vmem:[#allocation6 + $0x40] sm:$0xff] }
 0x60d   :  { %6354 = vpow2.f32 %v5297_v49  ;;  %v2006_v0 = vadd.f32 %v6932_v56, %v2005_v21  ;;  %v2062_v56 = vrot.slane %v7156_v1, 1 }
 0x60e   :  { %6356 = vpow2.f32 %v5298_v50  ;;  %v5870_v37 = vpop.f32.mrf.mxu0 }
 0x60f   :  { %6358 = vpow2.f32 %v5299_v57  ;;  %v2048_v53 = vrot.slane %v2006_v0, 6  ;;  %v2049_v20 = vrot.slane %v2006_v0, 7 }
 0x610   :  { %6360 = vpow2.f32 %v5300_v58 }
 0x61a   :  { %v6355_v28 = vpop.eup %6354 }
 0x61b   :  { %v6357_v59 = vpop.eup %6356  ;;  %v2022_v60 = vadd.f32 1.0, %v6355_v28 }
 0x61c   :  { %v2023_v61 = vadd.f32 1.0, %v6357_v59  ;;  %v6359_v62 = vpop.eup %6358 }
 0x61d   :  { %6362 = vrcp.f32 %v2022_v60  ;;  %v6361_v63 = vpop.eup %6360  ;;  %v2041_v4 = vadd.f32 1.0, %v6359_v62 }
 0x61e   :  { %6364 = vrcp.f32 %v2023_v61  ;;  %v2042_v52 = vadd.f32 1.0, %v6361_v63 }
 0x61f   :  { %6366 = vrcp.f32 %v2041_v4 }
 0x620   :  { %6368 = vrcp.f32 %v2042_v52  ;;  %v7295_v52 = vld [vmem:[%s7876_s4 + $0x2] ss:$0 sm:$0xff] }
 0x62a   :  { %v6363_v19 = vpop.eup %6362 }
 0x62b   :  { %v6365_v22 = vpop.eup %6364  ;;  %v2052_v25 = vmul.f32 %v6363_v19, %v2048_v53 }
 0x62c   :  { %v2053_v26 = vmul.f32 %v6365_v22, %v2049_v20  ;;  %v6367_v32 = vpop.eup %6366 }
 0x62d   :  { %v2054_v27 = vadd.f32 %v2052_v25, %v6938_v3  ;;  %v6369_v33 = vpop.eup %6368  ;;  %v2058_v35 = vsub.f32 1.0, %v6367_v32  ;;  %v2066_v13 = vmul.f32 %v6367_v32, %v2062_v56 }
 0x62e   :  { %v2055_v29 = vadd.f32 %v2053_v26, %v6940_v18  ;;  %v2059_v24 = vsub.f32 1.0, %v6369_v33  ;;  %v2067_v41 = vmul.f32 %v6369_v33, %v2063_v34 }
 0x62f   :  { %6370 = vtanh.f32 %v2054_v27 }
 0x630   :  { %6372 = vtanh.f32 %v2055_v29 }
 0x63c   :  { %v6371_v5 = vpop.eup %6370 }
 0x63d   :  { %v6373_v38 = vpop.eup %6372  ;;  %v2060_v39 = vmul.f32 %v6371_v5, %v2058_v35 }
 0x63e   :  { %v2061_v40 = vmul.f32 %v6373_v38, %v2059_v24 }
 0x63f   :  { %v7231_v42 = vadd.f32 %v2066_v13, %v2060_v39 }
 0x640   :  { %v7233_v43 = vadd.f32 %v2067_v41, %v2061_v40 }
 0x641   :  { %2071 = vst.msk [vmem:[#allocation2 + $0x3] sm:$0x4] %vm2070_vm9, %v7231_v42  ;;  %v2075_v46 = vrot.slane %v7231_v42, 2  ;;  %v2340_v38 = vrot.slane %v7231_v42, 1 }
 0x642   :  { %2072 = vst.msk [vmem:[#allocation2 + $0xb] sm:$0x4] %vm2070_vm9, %v7233_v43  ;;  %v2076_v1 = vrot.slane %v7233_v43, 1  ;;  %v2631_v43 = vld [vmem:[#allocation8 + $0x18] sm:$0xff] }
 0x644   :  { %v2077_v2 = vsel %vm671_vm3, %v2076_v1, %v2075_v46 }
 0x645   :  { %5880 = vmatmul.mubr.msk.f32.vlgmr.msra.gmra.mxu1 %vm381_vm4, %v2077_v2  ;;  %5891 = vmatmul.mubr.msk.f32.vlgmr.msra.gmra.mxu0 %vm381_vm4, %v2077_v2 }
 0x646   :  { %5894 = vmatpush3.msra.mxu1 %v7167_v7  ;;  %5901 = vmatprep.mubr.msk.f32.mxu1 %vm6719_vm1, %v6718_v6 }
 0x647   :  { %5895 = vmatprep.subr.mxu1 %v6718_v6  ;;  %5905 = vmatpush3.msra.mxu0 %v7173_v8 }
 0x648   :  { %5896 = vmatpush3.msra.mxu1 %v7176_v9  ;;  %5906 = vmatprep.subr.mxu0 %v6718_v6 }
 0x649   :  { %5897 = vmatprep.subr.mxu1 %v6718_v6  ;;  %5907 = vmatpush3.msra.mxu0 %v7181_v10 }
 0x64a   :  { %5898 = vmatpush3.msra.mxu1 %v7184_v11  ;;  %5908 = vmatprep.subr.mxu0 %v6718_v6 }
 0x64b   :  { %5899 = vmatprep.subr.mxu1 %v6718_v6  ;;  %5909 = vmatpush3.msra.mxu0 %v7189_v14  ;;  %v7279_v14 = vld [vmem:[%s7876_s4] ss:$0 sm:$0xff] }
 0x64c   :  { %5900 = vmatpush3.msra.mxu1 %v7257_v47  ;;  %5910 = vmatprep.subr.mxu0 %v6718_v6 }
 0x64d   :  { %5902 = vmatmul.mubr.msk.f32.vlgmr.msra.gmra.mxu1 %vm381_vm4, %v2077_v2  ;;  %5915 = vmatprep.subr.mxu1 %v6718_v6 }
 0x64e   :  { %5916 = vmatpush3.msra.mxu1 %v7196_v15  ;;  %5911 = vmatpush3.msra.mxu0 %v7199_v16 }
 0x64f   :  { %5917 = vmatprep.subr.mxu1 %v6718_v6  ;;  %5912 = vmatprep.mubr.msk.f32.mxu0 %vm6719_vm1, %v6718_v6 }
 0x650   :  { %5918 = vmatpush3.msra.mxu1 %v7205_v17  ;;  %5923 = vmatprep.mubr.msk.f32.mxu1 %vm6719_vm1, %v6718_v6 }
 0x651   :  { %5919 = vmatprep.subr.mxu1 %v6718_v6  ;;  %5926 = vmatprep.subr.mxu0 %v6718_v6 }
 0x652   :  { %5920 = vmatpush3.msra.mxu1 %v7212_v12  ;;  %v7286_v12 = vld [vmem:[%s7876_s4 + $0x1] ss:$0 sm:$0xff]  ;;  %s5233_s4 = sshll.u32 %s6720_s16, 4  ;;  %s5234_s4 = int_to_ptr.vmem [resolvable:$true] %s5233_s4 }
 0x653   :  { %5921 = vmatprep.subr.mxu1 %v6718_v6  ;;  %s6684_s17 = scalar_lea.vmem %s5234_s4, 32  ;;  %p6689_p7 = scmp.lt.s32.totalorder %s5234_s4, %s5234_s4 }
 0x654   :  { %5922 = vmatpush3.msra.mxu1 %v7216_v36  ;;  %p6685_p6 = scmp.ne.s32.totalorder %s5234_s4, %s6684_s17  ;;  %p6690_p8 = scmp.lt.s32.totalorder %s6684_s17, %s6684_s17 }
 0x655   :  { %5937 = vmatprep.subr.mxu1 %v2631_v43 }
 0x656   :  { %p6691_p9 = por %p6690_p8, %p6689_p7 }
 0x658   :  { %p6692_p10 = pnand %p6691_p9, %p6685_p6 }
 0x705   :  { %v2146_v8 = vpop.f32.mrf.mxu1  ;;  %v2216_v10 = vpop.f32.mrf.mxu0 }
 0x706   :  { %v2147_v15 = vadd.f32 %v7279_v14, %v2146_v8  ;;  %v2217_v36 = vadd.f32 %v7286_v12, %v2216_v10  ;;  %v2723_v10 = vld [vmem:[#allocation8 + $0x30] sm:$0xff] }
 0x707   :  { %v5881_v16 = vpop.f32.mrf.mxu1  ;;  %v5892_v17 = vpop.f32.mrf.mxu0 }
 0x708   :  { %v2291_v48 = vrot.slane %v2147_v15, 7  ;;  %v2295_v49 = vadd.f32 %v2147_v15, %v6913_v30  ;;  %v2309_v21 = vrot.slane %v2217_v36, 7  ;;  %v2313_v23 = vadd.f32 %v2217_v36, %v6925_v45  ;;  %v2629_v15 = vld [vmem:[#allocation8 + $0x8] sm:$0xff]  ;;  %v2721_v16 = vld [vmem:[#allocation8 + $0x20] sm:$0xff] }
 0x70a   :  { %v2294_v50 = vadd.f32 %v2291_v48, %v6915_v31  ;;  %v5305_v51 = vmul.f32 -1.442695, %v2295_v49  ;;  %v2312_v57 = vadd.f32 %v2309_v21, %v6923_v44  ;;  %v5307_v58 = vmul.f32 -1.442695, %v2313_v23 }
 0x70c   :  { %v5304_v54 = vmul.f32 -1.442695, %v2294_v50  ;;  %6374 = vpow2.f32 %v5305_v51  ;;  %v5306_v28 = vmul.f32 -1.442695, %v2312_v57 }
 0x70d   :  { %v2286_v37 = vpop.f32.mrf.mxu1 }
 0x70e   :  { %6376 = vpow2.f32 %v5304_v54  ;;  %v2287_v53 = vadd.f32 %v7295_v52, %v2286_v37 }
 0x70f   :  { %v5903_v55 = vpop.f32.mrf.mxu1  ;;  %6378 = vpow2.f32 %v5307_v58 }
 0x710   :  { %6380 = vpow2.f32 %v5306_v28  ;;  %v2327_v22 = vrot.slane %v2287_v53, 7 }
 0x719   :  { %v6375_v59 = vpop.eup %6374 }
 0x71a   :  { %v2303_v60 = vadd.f32 1.0, %v6375_v59 }
 0x71b   :  { %v6377_v61 = vpop.eup %6376 }
 0x71c   :  { %v2302_v62 = vadd.f32 1.0, %v6377_v61  ;;  %6382 = vrcp.f32 %v2303_v60  ;;  %v6379_v63 = vpop.eup %6378 }
 0x71d   :  { %v6381_v0 = vpop.eup %6380  ;;  %v2321_v4 = vadd.f32 1.0, %v6379_v63 }
 0x71e   :  { %6384 = vrcp.f32 %v2302_v62  ;;  %v2320_v19 = vadd.f32 1.0, %v6381_v0 }
 0x71f   :  { %6386 = vrcp.f32 %v2321_v4 }
 0x720   :  { %6388 = vrcp.f32 %v2320_v19 }
 0x729   :  { %v6383_v20 = vpop.eup %6382 }
 0x72a   :  { %v2331_v25 = vmul.f32 %v6383_v20, %v2287_v53 }
 0x72b   :  { %v6385_v26 = vpop.eup %6384 }
 0x72c   :  { %v2330_v27 = vmul.f32 %v6385_v26, %v2327_v22  ;;  %v2333_v29 = vadd.f32 %v2331_v25, %v6940_v18  ;;  %v6387_v33 = vpop.eup %6386 }
 0x72d   :  { %v6389_v35 = vpop.eup %6388  ;;  %v2337_v56 = vsub.f32 1.0, %v6387_v33  ;;  %v2344_v39 = vmul.f32 %v6387_v33, %v2076_v1  ;;  %v2724_v1 = vld [vmem:[#allocation8 + $0x38] sm:$0xff] }
 0x72e   :  { %v2332_v32 = vadd.f32 %v2330_v27, %v6938_v3  ;;  %6390 = vtanh.f32 %v2333_v29  ;;  %v2336_v24 = vsub.f32 1.0, %v6389_v35  ;;  %v2343_v41 = vmul.f32 %v6389_v35, %v2340_v38 }
 0x730   :  { %6392 = vtanh.f32 %v2332_v32 }
 0x73b   :  { %v6391_v5 = vpop.eup %6390 }
 0x73c   :  { %v2339_v34 = vmul.f32 %v6391_v5, %v2337_v56 }
 0x73d   :  { %v6393_v13 = vpop.eup %6392 }
 0x73e   :  { %v2338_v40 = vmul.f32 %v6393_v13, %v2336_v24  ;;  %v7303_v46 = vadd.f32 %v2344_v39, %v2339_v34 }
 0x740   :  { %v7305_v2 = vadd.f32 %v2343_v41, %v2338_v40  ;;  %2349 = vst.msk [vmem:[#allocation2 + $0xd] sm:$0x2] %vm2347_vm10, %v7303_v46  ;;  %v7344_v40 = vld [vmem:[#allocation9 + $0x18] sm:$0xff] }
 0x742   :  { %2348 = vst.msk [vmem:[#allocation2 + $0x5] sm:$0x2] %vm2347_vm10, %v7305_v2  ;;  %v2352_v8 = vrot.slane %v7305_v2, 1  ;;  %v7350_v2 = vld [vmem:[#allocation9 + $0x10] sm:$0xff] }
 0x744   :  { %v2353_v42 = vsel %vm671_vm3, %v7303_v46, %v2352_v8 }
 0x745   :  { %5913 = vmatmul.mubr.msk.f32.vlgmr.msra.gmra.mxu0 %vm381_vm4, %v2353_v42  ;;  %5924 = vmatmul.mubr.msk.f32.vlgmr.msra.gmra.mxu1 %vm381_vm4, %v2353_v42 }
 0x746   :  { %5927 = vmatpush3.msra.mxu0 %v7167_v7  ;;  %5934 = vmatprep.mubr.msk.f32.mxu0 %vm6719_vm1, %v6718_v6  ;;  %v2630_v7 = vld [vmem:[#allocation8 + $0x10] sm:$0xff] }
 0x747   :  { %5928 = vmatprep.subr.mxu0 %v6718_v6  ;;  %5938 = vmatpush3.msra.mxu1 %v2631_v43  ;;  %v2809_v43 = vld [vmem:[#allocation8 + $0x40] sm:$0xff] }
 0x748   :  { %5929 = vmatpush3.msra.mxu0 %v7176_v9  ;;  %v2722_v9 = vld [vmem:[#allocation8 + $0x28] sm:$0xff]  ;;  %5939 = vmatprep.subr.mxu1 %v2630_v7 }
 0x749   :  { %5930 = vmatprep.subr.mxu0 %v6718_v6  ;;  %5940 = vmatpush3.msra.mxu1 %v2630_v7  ;;  %v7365_v7 = vld [vmem:[#allocation9 + $0x38] sm:$0xff] }
 0x74a   :  { %5931 = vmatpush3.msra.mxu0 %v7184_v11  ;;  %v2628_v11 = vld [vmem:[#allocation8] sm:$0xff]  ;;  %5941 = vmatprep.subr.mxu1 %v2629_v15 }
 0x74b   :  { %5932 = vmatprep.subr.mxu0 %v6718_v6  ;;  %5942 = vmatpush3.msra.mxu1 %v2629_v15  ;;  %v7372_v15 = vld [vmem:[#allocation9 + $0x30] sm:$0xff] }
 0x74c   :  { %5933 = vmatpush3.msra.mxu0 %v7257_v47  ;;  %v7326_v47 = vld [vmem:[#allocation8 + $0x58] sm:$0xff]  ;;  %5943 = vmatprep.subr.mxu1 %v2628_v11 }
 0x74d   :  { %5935 = vmatmul.mubr.msk.f32.vlgmr.msra.gmra.mxu0 %vm381_vm4, %v2353_v42  ;;  %5948 = vmatprep.subr.mxu0 %v2724_v1  ;;  %v7354_v42 = vld [vmem:[#allocation9 + $0x8] sm:$0xff] }
 0x74e   :  { %5949 = vmatpush3.msra.mxu0 %v2724_v1  ;;  %5944 = vmatpush3.msra.mxu1 %v2628_v11  ;;  %v7358_v1 = vld [vmem:[#allocation9] sm:$0xff]  ;;  %v7381_v11 = vld [vmem:[#allocation9 + $0x28] sm:$0xff] }
 0x74f   :  { %5950 = vmatprep.subr.mxu0 %v2723_v10  ;;  %5959 = vmatprep.subr.mxu1 %v7326_v47 }
 0x750   :  { %5951 = vmatpush3.msra.mxu0 %v2723_v10  ;;  %v7369_v10 = vld [vmem:[#allocation9 + $0x58] sm:$0xff] }
 0x751   :  { %5952 = vmatprep.subr.mxu0 %v2722_v9 }
 0x752   :  { %5953 = vmatpush3.msra.mxu0 %v2722_v9  ;;  %v7378_v9 = vld [vmem:[#allocation9 + $0x50] sm:$0xff] }
 0x753   :  { %5954 = vmatprep.subr.mxu0 %v2721_v16 }
 0x754   :  { %5955 = vmatpush3.msra.mxu0 %v2721_v16  ;;  %v7386_v16 = vld [vmem:[#allocation9 + $0x48] sm:$0xff] }
 0x755   :  { %5970 = vmatprep.subr.mxu0 %v6718_v6 }
 0x805   :  { %v2422_v17 = vpop.f32.mrf.mxu0  ;;  %v2492_v48 = vpop.f32.mrf.mxu1 }
 0x806   :  { %v2423_v49 = vadd.f32 %v7279_v14, %v2422_v17  ;;  %v2493_v21 = vadd.f32 %v7286_v12, %v2492_v48  ;;  %v7394_v17 = vld [vmem:[#allocation9 + $0x40] sm:$0xff] }
 0x807   :  { %v5914_v36 = vpop.f32.mrf.mxu0  ;;  %v5925_v50 = vpop.f32.mrf.mxu1 }
 0x808   :  { %v2567_v51 = vrot.slane %v2423_v49, 1  ;;  %v2570_v54 = vadd.f32 %v2423_v49, %v6915_v31  ;;  %v2585_v57 = vrot.slane %v2493_v21, 1  ;;  %v2588_v28 = vadd.f32 %v2493_v21, %v6923_v44 }
 0x80a   :  { %v2571_v37 = vadd.f32 %v2567_v51, %v6913_v30  ;;  %v5311_v23 = vmul.f32 -1.442695, %v2570_v54  ;;  %v2589_v14 = vadd.f32 %v2585_v57, %v6925_v45  ;;  %v5313_v60 = vmul.f32 -1.442695, %v2588_v28  ;;  %v7430_v51 = vld [vmem:[%s7880_s8] ss:$0 sm:$0xff] }
 0x80b   :  { %v5315_v54 = vld [vmem:[%s7879_s7] ss:$0 sm:$0xff] }
 0x80c   :  { %6394 = vpow2.f32 %v5311_v23  ;;  %v5312_v55 = vmul.f32 -1.442695, %v2571_v37  ;;  %v5314_v61 = vmul.f32 -1.442695, %v2589_v14 }
 0x80d   :  { %v2562_v58 = vpop.f32.mrf.mxu0 }
 0x80e   :  { %6396 = vpow2.f32 %v5312_v55  ;;  %v2563_v53 = vadd.f32 %v7295_v52, %v2562_v58  ;;  %v2616_v52 = vrot.slane %v7303_v46, 1  ;;  %v2811_v46 = vld [vmem:[#allocation8 + $0x50] sm:$0xff] }
 0x80f   :  { %v5936_v59 = vpop.f32.mrf.mxu0  ;;  %6398 = vpow2.f32 %v5313_v60 }
 0x810   :  { %6400 = vpow2.f32 %v5314_v61  ;;  %v2603_v20 = vrot.slane %v2563_v53, 1 }
 0x819   :  { %v6395_v31 = vpop.eup %6394 }
 0x81a   :  { %v2578_v62 = vadd.f32 1.0, %v6395_v31 }
 0x81b   :  { %v6397_v12 = vpop.eup %6396 }
 0x81c   :  { %v2579_v63 = vadd.f32 1.0, %v6397_v12  ;;  %6402 = vrcp.f32 %v2578_v62  ;;  %v6399_v30 = vpop.eup %6398  ;;  %v7445_v62 = vld [vmem:[%s7880_s8 + $0x1] ss:$0 sm:$0xff] }
 0x81d   :  { %v6401_v0 = vpop.eup %6400  ;;  %v2596_v4 = vadd.f32 1.0, %v6399_v30  ;;  %v5319_v12 = vld [vmem:[%s7879_s7 + $0x1] ss:$0 sm:$0xff] }
 0x81e   :  { %6404 = vrcp.f32 %v2579_v63  ;;  %v2597_v19 = vadd.f32 1.0, %v6401_v0 }
 0x81f   :  { %6406 = vrcp.f32 %v2596_v4 }
 0x820   :  { %6408 = vrcp.f32 %v2597_v19 }
 0x829   :  { %v6403_v44 = vpop.eup %6402 }
 0x82a   :  { %v2606_v45 = vmul.f32 %v6403_v44, %v2563_v53 }
 0x82b   :  { %v6405_v22 = vpop.eup %6404 }
 0x82c   :  { %v2607_v25 = vmul.f32 %v6405_v22, %v2603_v20  ;;  %v2608_v26 = vadd.f32 %v2606_v45, %v6938_v3  ;;  %v6407_v29 = vpop.eup %6406 }
 0x82d   :  { %v6409_v32 = vpop.eup %6408  ;;  %v2612_v33 = vsub.f32 1.0, %v6407_v29  ;;  %v2619_v56 = vmul.f32 %v6407_v29, %v2352_v8  ;;  %v2810_v8 = vld [vmem:[#allocation8 + $0x48] sm:$0xff] }
 0x82e   :  { %v2609_v27 = vadd.f32 %v2607_v25, %v6940_v18  ;;  %6410 = vtanh.f32 %v2608_v26  ;;  %v2613_v5 = vsub.f32 1.0, %v6409_v32  ;;  %v2620_v38 = vmul.f32 %v6409_v32, %v2616_v52 }
 0x830   :  { %6412 = vtanh.f32 %v2609_v27 }
 0x83b   :  { %v6411_v35 = vpop.eup %6410 }
 0x83c   :  { %v2614_v24 = vmul.f32 %v6411_v35, %v2612_v33  ;;  %v7460_v35 = vld [vmem:[%s7880_s8 + $0x2] ss:$0 sm:$0xff] }
 0x83d   :  { %v6413_v34 = vpop.eup %6412 }
 0x83e   :  { %v2615_v39 = vmul.f32 %v6413_v34, %v2613_v5  ;;  %v2621_v3 = vadd.f32 %v2619_v56, %v2614_v24 }
 0x840   :  { %v2622_v13 = vadd.f32 %v2620_v38, %v2615_v39  ;;  %2624 = vst.msk [vmem:[#allocation2 + $0x7] sm:$0x1] %vm2623_vm11, %v2621_v3  ;;  %v5323_v3 = vld [vmem:[%s7879_s7 + $0x2] ss:$0 sm:$0xff] }
 0x842   :  { %2625 = vst.msk [vmem:[#allocation2 + $0xf] sm:$0x1] %vm2623_vm11, %v2622_v13 }
 0x847   :  { %v2626_v18 = vld [vmem:[#allocation2] sm:$0xff] }
 0x848   :  { %5945 = vmatprep.mubr.msk.f32.mxu1 %vm381_vm4, %v2626_v18  ;;  %5956 = vmatprep.mubr.msk.f32.mxu0 %vm381_vm4, %v2626_v18 }
 0x849   :  { %v2627_v41 = vld [vmem:[#allocation2 + $0x8] sm:$0xff] }
 0x84a   :  { %5946 = vmatmul.mubr.msk.f32.vlgmr.msra.gmra.mxu1 %vm381_vm4, %v2627_v41  ;;  %5957 = vmatmul.mubr.msk.f32.vlgmr.msra.gmra.mxu0 %vm381_vm4, %v2627_v41 }
 0x84b   :  { %5960 = vmatpush3.msra.mxu1 %v7326_v47  ;;  %5971 = vmatpush3.msra.mxu0 %v7344_v40  ;;  %v7389_v47 = vld [vmem:[#allocation9 + $0x20] sm:$0xff] }
 0x84c   :  { %5961 = vmatprep.subr.mxu1 %v2811_v46  ;;  %5967 = vmatprep.mubr.msk.f32.mxu1 %vm381_vm4, %v2626_v18 }
 0x84d   :  { %5972 = vmatprep.subr.mxu0 %v6718_v6  ;;  %5962 = vmatpush3.msra.mxu1 %v2811_v46 }
 0x84e   :  { %5973 = vmatpush3.msra.mxu0 %v7350_v2  ;;  %5963 = vmatprep.subr.mxu1 %v2810_v8 }
 0x84f   :  { %5974 = vmatprep.subr.mxu0 %v6718_v6  ;;  %5964 = vmatpush3.msra.mxu1 %v2810_v8 }
 0x850   :  { %5975 = vmatpush3.msra.mxu0 %v7354_v42  ;;  %5965 = vmatprep.subr.mxu1 %v2809_v43 }
 0x851   :  { %5976 = vmatprep.subr.mxu0 %v6718_v6  ;;  %5966 = vmatpush3.msra.mxu1 %v2809_v43 }
 0x852   :  { %5977 = vmatpush3.msra.mxu0 %v7358_v1  ;;  %5978 = vmatprep.mubr.msk.f32.mxu0 %vm6719_vm1, %v6718_v6 }
 0x853   :  { %5968 = vmatmul.mubr.msk.f32.vlgmr.msra.gmra.mxu1 %vm381_vm4, %v2627_v41  ;;  %5979 = vmatmul.mubr.f32.vlgmr.msra.gmra.mxu0 %v6718_v6 }
 0x854   :  { %5981 = vmatprep.subr.mxu1 %v6718_v6  ;;  %5989 = vmatprep.mubr.msk.f32.mxu1 %vm6719_vm1, %v6718_v6 }
 0x855   :  { %5982 = vmatpush3.msra.mxu1 %v7365_v7  ;;  %5992 = vmatprep.subr.mxu0 %v6718_v6 }
 0x856   :  { %5983 = vmatprep.subr.mxu1 %v6718_v6  ;;  %5993 = vmatpush3.msra.mxu0 %v7369_v10 }
 0x857   :  { %5984 = vmatpush3.msra.mxu1 %v7372_v15  ;;  %5994 = vmatprep.subr.mxu0 %v6718_v6 }
 0x858   :  { %5985 = vmatprep.subr.mxu1 %v6718_v6  ;;  %5995 = vmatpush3.msra.mxu0 %v7378_v9 }
 0x859   :  { %5986 = vmatpush3.msra.mxu1 %v7381_v11  ;;  %5996 = vmatprep.subr.mxu0 %v6718_v6 }
 0x85a   :  { %5987 = vmatprep.subr.mxu1 %v6718_v6  ;;  %5997 = vmatpush3.msra.mxu0 %v7386_v16 }
 0x85b   :  { %5988 = vmatpush3.msra.mxu1 %v7389_v47  ;;  %5998 = vmatprep.subr.mxu0 %v6718_v6 }
 0x85c   :  { %5990 = vmatmul.mubr.f32.vlgmr.msra.gmra.mxu1 %v6718_v6  ;;  %5999 = vmatpush3.msra.mxu0 %v7394_v17 }
 0x85d   :  { %6000 = vmatprep.mubr.msk.f32.mxu0 %vm6719_vm1, %v6718_v6  ;;  %6003 = vmatprep.subr.mxu1 %v6718_v6 }
 0x85e   :  { %6001 = vmatmul.mubr.f32.vlgmr.msra.gmra.mxu0 %v6718_v6  ;;  %6004 = vmatpush3.msra.mxu1 %v7344_v40 }
 0x85f   :  { %6014 = vmatprep.subr.mxu0 %v6718_v6  ;;  %6005 = vmatprep.subr.mxu1 %v6718_v6 }
 0x860   :  { %6015 = vmatpush3.msra.mxu0 %v7365_v7  ;;  %6006 = vmatpush3.msra.mxu1 %v7350_v2 }
 0x861   :  { %6016 = vmatprep.subr.mxu0 %v6718_v6  ;;  %6007 = vmatprep.subr.mxu1 %v6718_v6 }
 0x862   :  { %6017 = vmatpush3.msra.mxu0 %v7372_v15  ;;  %6008 = vmatpush3.msra.mxu1 %v7354_v42 }
 0x863   :  { %6018 = vmatprep.subr.mxu0 %v6718_v6  ;;  %6009 = vmatprep.subr.mxu1 %v6718_v6 }
 0x864   :  { %6019 = vmatpush3.msra.mxu0 %v7381_v11  ;;  %6010 = vmatpush3.msra.mxu1 %v7358_v1 }
 0x865   :  { %6020 = vmatprep.subr.mxu0 %v6718_v6  ;;  %6011 = vmatprep.mubr.msk.f32.mxu1 %vm6719_vm1, %v6718_v6 }
 0x866   :  { %6021 = vmatpush3.msra.mxu0 %v7389_v47  ;;  %6022 = vmatprep.mubr.msk.f32.mxu0 %vm6719_vm1, %v6718_v6 }
 0x867   :  { %6025 = vmatprep.subr.mxu1 %v6718_v6  ;;  %6036 = vmatprep.subr.mxu0 %v6718_v6 }
 0x90a   :  { %v5947_v48 = vpop.f32.mrf.mxu1  ;;  %v5958_v49 = vpop.f32.mrf.mxu0 }
 0x90b   :  { %v7438_v57 = vadd.f32 %v5947_v48, %v5315_v54  ;;  %v7453_v19 = vadd.f32 %v5958_v49, %v5319_v12 }
 0x90c   :  { %v2711_v36 = vpop.f32.mrf.mxu1  ;;  %v2799_v50 = vpop.f32.mrf.mxu0 }
 0x90d   :  { %v7435_v37 = vadd.f32 %v5315_v54, %v2711_v36  ;;  %v7450_v30 = vadd.f32 %v5319_v12, %v2799_v50 }
 0x913   :  { %v2987_v21 = vpop.f32.mrf.mxu0  ;;  %v5969_v58 = vpop.f32.mrf.mxu1 }
 0x914   :  { %v2988_v23 = vadd.f32 %v7430_v51, %v2987_v21  ;;  %v7468_v46 = vadd.f32 %v5969_v58, %v5323_v3 }
 0x915   :  { %v5980_v55 = vpop.f32.mrf.mxu0  ;;  %v2887_v31 = vpop.f32.mrf.mxu1 }
 0x916   :  { %v3144_v28 = vrot.slane %v2988_v23, 1  ;;  %v3147_v59 = vadd.f32 %v2988_v23, %v7435_v37  ;;  %v7466_v13 = vadd.f32 %v5323_v3, %v2887_v31 }
 0x918   :  { %v3148_v14 = vadd.f32 %v3144_v28, %v7438_v57  ;;  %v5331_v60 = vmul.f32 -1.442695, %v3147_v59 }
 0x91a   :  { %6414 = vpow2.f32 %v5331_v60  ;;  %v5332_v61 = vmul.f32 -1.442695, %v3148_v14 }
 0x91c   :  { %6416 = vpow2.f32 %v5332_v61  ;;  %v3063_v63 = vpop.f32.mrf.mxu1 }
 0x91d   :  { %v3064_v0 = vadd.f32 %v7445_v62, %v3063_v63 }
 0x91e   :  { %v5991_v4 = vpop.f32.mrf.mxu1  ;;  %v3139_v53 = vpop.f32.mrf.mxu0 }
 0x91f   :  { %v3162_v44 = vrot.slane %v3064_v0, 1  ;;  %v3165_v20 = vadd.f32 %v3064_v0, %v7450_v30  ;;  %v3140_v56 = vadd.f32 %v7460_v35, %v3139_v53 }
 0x920   :  { %v6002_v45 = vpop.f32.mrf.mxu0 }
 0x921   :  { %v3166_v22 = vadd.f32 %v3162_v44, %v7453_v19  ;;  %v5333_v25 = vmul.f32 -1.442695, %v3165_v20  ;;  %v3180_v38 = vrot.slane %v3140_v56, 1 }
 0x923   :  { %v5334_v26 = vmul.f32 -1.442695, %v3166_v22  ;;  %6418 = vpow2.f32 %v5333_v25 }
 0x925   :  { %6420 = vpow2.f32 %v5334_v26 }
 0x927   :  { %v6415_v27 = vpop.eup %6414 }
 0x928   :  { %v3155_v29 = vadd.f32 1.0, %v6415_v27 }
 0x929   :  { %v6417_v32 = vpop.eup %6416 }
 0x92a   :  { %v3156_v33 = vadd.f32 1.0, %v6417_v32  ;;  %6422 = vrcp.f32 %v3155_v29 }
 0x92c   :  { %6424 = vrcp.f32 %v3156_v33 }
 0x930   :  { %v6419_v52 = vpop.eup %6418 }
 0x931   :  { %v3173_v24 = vadd.f32 1.0, %v6419_v52 }
 0x932   :  { %v6421_v5 = vpop.eup %6420 }
 0x933   :  { %v3174_v34 = vadd.f32 1.0, %v6421_v5  ;;  %6426 = vrcp.f32 %v3173_v24 }
 0x935   :  { %6428 = vrcp.f32 %v3174_v34 }
 0x937   :  { %v6423_v39 = vpop.eup %6422 }
 0x938   :  { %v3183_v18 = vmul.f32 %v6423_v39, %v3140_v56 }
 0x939   :  { %v6425_v41 = vpop.eup %6424 }
 0x93a   :  { %v3184_v8 = vmul.f32 %v6425_v41, %v3180_v38  ;;  %v3185_v43 = vadd.f32 %v3183_v18, %v7466_v13 }
 0x93c   :  { %v3186_v48 = vadd.f32 %v3184_v8, %v7468_v46  ;;  %6430 = vtanh.f32 %v3185_v43 }
 0x93e   :  { %6432 = vtanh.f32 %v3186_v48 }
 0x940   :  { %v6427_v49 = vpop.eup %6426 }
 0x941   :  { %v3189_v54 = vsub.f32 1.0, %v6427_v49  ;;  %v3193_v14 = vmul.f32 0.0, %v6427_v49 }
 0x942   :  { %v6429_v36 = vpop.eup %6428 }
 0x943   :  { %v3190_v21 = vsub.f32 1.0, %v6429_v36  ;;  %v3194_v59 = vmul.f32 0.0, %v6429_v36 }
 0x949   :  { %v6431_v50 = vpop.eup %6430 }
 0x94a   :  { %v3191_v55 = vmul.f32 %v6431_v50, %v3189_v54 }
 0x94b   :  { %v6433_v23 = vpop.eup %6432 }
 0x94c   :  { %v3192_v28 = vmul.f32 %v6433_v23, %v3190_v21  ;;  %v7474_v60 = vadd.f32 %v3193_v14, %v3191_v55 }
 0x94e   :  { %v7472_v58 = vadd.f32 %v3194_v59, %v3192_v28  ;;  %v3463_v14 = vrot.slane %v7474_v60, 7 }
 0x950   :  { %v3199_v61 = vrot.slane %v7472_v58, 7 }
 0x952   :  { %v3200_v31 = vsel %vm671_vm3, %v3199_v61, %v7474_v60 }
 0x953   :  { %6012 = vmatmul.mubr.msk.f32.vlgmr.msra.gmra.mxu1 %vm381_vm4, %v3200_v31  ;;  %6023 = vmatmul.mubr.msk.f32.vlgmr.msra.gmra.mxu0 %vm381_vm4, %v3200_v31 }
 0x954   :  { %6026 = vmatpush3.msra.mxu1 %v7369_v10  ;;  %6033 = vmatprep.mubr.msk.f32.mxu1 %vm6719_vm1, %v6718_v6 }
 0x955   :  { %6027 = vmatprep.subr.mxu1 %v6718_v6  ;;  %6037 = vmatpush3.msra.mxu0 %v7344_v40 }
 0x956   :  { %6028 = vmatpush3.msra.mxu1 %v7378_v9  ;;  %6038 = vmatprep.subr.mxu0 %v6718_v6 }
 0x957   :  { %6029 = vmatprep.subr.mxu1 %v6718_v6  ;;  %6039 = vmatpush3.msra.mxu0 %v7350_v2 }
 0x958   :  { %6030 = vmatpush3.msra.mxu1 %v7386_v16  ;;  %6040 = vmatprep.subr.mxu0 %v6718_v6 }
 0x959   :  { %6031 = vmatprep.subr.mxu1 %v6718_v6  ;;  %6041 = vmatpush3.msra.mxu0 %v7354_v42 }
 0x95a   :  { %6032 = vmatpush3.msra.mxu1 %v7394_v17  ;;  %6042 = vmatprep.subr.mxu0 %v6718_v6 }
 0x95b   :  { %6034 = vmatmul.mubr.msk.f32.vlgmr.msra.gmra.mxu1 %vm381_vm4, %v3200_v31  ;;  %6047 = vmatprep.subr.mxu1 %v6718_v6 }
 0x95c   :  { %6048 = vmatpush3.msra.mxu1 %v7365_v7  ;;  %6043 = vmatpush3.msra.mxu0 %v7358_v1 }
 0x95d   :  { %6049 = vmatprep.subr.mxu1 %v6718_v6  ;;  %6044 = vmatprep.mubr.msk.f32.mxu0 %vm6719_vm1, %v6718_v6 }
 0x95e   :  { %6050 = vmatpush3.msra.mxu1 %v7372_v15  ;;  %6055 = vmatprep.mubr.msk.f32.mxu1 %vm6719_vm1, %v6718_v6 }
 0x95f   :  { %6051 = vmatprep.subr.mxu1 %v6718_v6  ;;  %6058 = vmatprep.subr.mxu0 %v6718_v6 }
 0x960   :  { %6052 = vmatpush3.msra.mxu1 %v7381_v11 }
 0x961   :  { %6053 = vmatprep.subr.mxu1 %v6718_v6 }
 0x962   :  { %6054 = vmatpush3.msra.mxu1 %v7389_v47 }
 0x963   :  { %6069 = vmatprep.subr.mxu1 %v6718_v6 }
 0xa13   :  { %v3269_v12 = vpop.f32.mrf.mxu1  ;;  %v3339_v63 = vpop.f32.mrf.mxu0 }
 0xa14   :  { %v3270_v0 = vadd.f32 %v7430_v51, %v3269_v12  ;;  %v3340_v45 = vadd.f32 %v7445_v62, %v3339_v63 }
 0xa15   :  { %v6013_v4 = vpop.f32.mrf.mxu1  ;;  %v6024_v53 = vpop.f32.mrf.mxu0 }
 0xa16   :  { %v3414_v44 = vrot.slane %v3270_v0, 7  ;;  %v3418_v20 = vadd.f32 %v3270_v0, %v7438_v57  ;;  %v3432_v27 = vrot.slane %v3340_v45, 7  ;;  %v3436_v32 = vadd.f32 %v3340_v45, %v7453_v19 }
 0xa18   :  { %v3417_v22 = vadd.f32 %v3414_v44, %v7435_v37  ;;  %v5339_v25 = vmul.f32 -1.442695, %v3418_v20  ;;  %v3435_v52 = vadd.f32 %v3432_v27, %v7450_v30  ;;  %v5341_v56 = vmul.f32 -1.442695, %v3436_v32 }
 0xa1a   :  { %v5338_v26 = vmul.f32 -1.442695, %v3417_v22  ;;  %6434 = vpow2.f32 %v5339_v25  ;;  %v5340_v5 = vmul.f32 -1.442695, %v3435_v52 }
 0xa1b   :  { %v3409_v29 = vpop.f32.mrf.mxu1 }
 0xa1c   :  { %6436 = vpow2.f32 %v5338_v26  ;;  %v3410_v41 = vadd.f32 %v7460_v35, %v3409_v29 }
 0xa1d   :  { %v6035_v33 = vpop.f32.mrf.mxu1  ;;  %6438 = vpow2.f32 %v5341_v56 }
 0xa1e   :  { %6440 = vpow2.f32 %v5340_v5  ;;  %v3450_v49 = vrot.slane %v3410_v41, 7 }
 0xa27   :  { %v6435_v24 = vpop.eup %6434 }
 0xa28   :  { %v3426_v34 = vadd.f32 1.0, %v6435_v24 }
 0xa29   :  { %v6437_v38 = vpop.eup %6436 }
 0xa2a   :  { %v3425_v39 = vadd.f32 1.0, %v6437_v38  ;;  %6442 = vrcp.f32 %v3426_v34  ;;  %v6439_v3 = vpop.eup %6438 }
 0xa2b   :  { %v6441_v18 = vpop.eup %6440  ;;  %v3444_v8 = vadd.f32 1.0, %v6439_v3 }
 0xa2c   :  { %6444 = vrcp.f32 %v3425_v39  ;;  %v3443_v43 = vadd.f32 1.0, %v6441_v18 }
 0xa2d   :  { %6446 = vrcp.f32 %v3444_v8 }
 0xa2e   :  { %6448 = vrcp.f32 %v3443_v43 }
 0xa37   :  { %v6443_v48 = vpop.eup %6442 }
 0xa38   :  { %v3454_v36 = vmul.f32 %v6443_v48, %v3410_v41 }
 0xa39   :  { %v6445_v50 = vpop.eup %6444 }
 0xa3a   :  { %v3453_v54 = vmul.f32 %v6445_v50, %v3450_v49  ;;  %v3456_v21 = vadd.f32 %v3454_v36, %v7468_v46  ;;  %v6447_v55 = vpop.eup %6446 }
 0xa3b   :  { %v6449_v28 = vpop.eup %6448  ;;  %v3460_v12 = vsub.f32 1.0, %v6447_v55  ;;  %v3467_v44 = vmul.f32 %v6447_v55, %v3199_v61 }
 0xa3c   :  { %v3455_v23 = vadd.f32 %v3453_v54, %v7466_v13  ;;  %6450 = vtanh.f32 %v3456_v21  ;;  %v3459_v31 = vsub.f32 1.0, %v6449_v28  ;;  %v3466_v53 = vmul.f32 %v6449_v28, %v3463_v14 }
 0xa3e   :  { %6452 = vtanh.f32 %v3455_v23 }
 0xa49   :  { %v6451_v59 = vpop.eup %6450 }
 0xa4a   :  { %v3462_v4 = vmul.f32 %v6451_v59, %v3460_v12 }
 0xa4b   :  { %v6453_v63 = vpop.eup %6452 }
 0xa4c   :  { %v3461_v0 = vmul.f32 %v6453_v63, %v3459_v31  ;;  %v7528_v45 = vadd.f32 %v3467_v44, %v3462_v4 }
 0xa4e   :  { %v7526_v20 = vadd.f32 %v3466_v53, %v3461_v0 }
 0xa50   :  { %v3472_v22 = vrot.slane %v7526_v20, 1 }
 0xa52   :  { %v3473_v25 = vsel %vm671_vm3, %v7528_v45, %v3472_v22 }
 0xa53   :  { %6045 = vmatmul.mubr.msk.f32.vlgmr.msra.gmra.mxu0 %vm381_vm4, %v3473_v25  ;;  %6056 = vmatmul.mubr.msk.f32.vlgmr.msra.gmra.mxu1 %vm381_vm4, %v3473_v25 }
 0xa54   :  { %6059 = vmatpush3.msra.mxu0 %v7369_v10  ;;  %6066 = vmatprep.mubr.msk.f32.mxu0 %vm6719_vm1, %v6718_v6 }
 0xa55   :  { %6060 = vmatprep.subr.mxu0 %v6718_v6  ;;  %6070 = vmatpush3.msra.mxu1 %v7344_v40 }
 0xa56   :  { %6061 = vmatpush3.msra.mxu0 %v7378_v9  ;;  %6071 = vmatprep.subr.mxu1 %v6718_v6 }
 0xa57   :  { %6062 = vmatprep.subr.mxu0 %v6718_v6  ;;  %6072 = vmatpush3.msra.mxu1 %v7350_v2 }
 0xa58   :  { %6063 = vmatpush3.msra.mxu0 %v7386_v16  ;;  %6073 = vmatprep.subr.mxu1 %v6718_v6 }
 0xa59   :  { %6064 = vmatprep.subr.mxu0 %v6718_v6  ;;  %6074 = vmatpush3.msra.mxu1 %v7354_v42 }
 0xa5a   :  { %6065 = vmatpush3.msra.mxu0 %v7394_v17  ;;  %6075 = vmatprep.subr.mxu1 %v6718_v6 }
 0xa5b   :  { %6067 = vmatmul.mubr.msk.f32.vlgmr.msra.gmra.mxu0 %vm381_vm4, %v3473_v25  ;;  %6080 = vmatprep.subr.mxu0 %v6718_v6  ;;  %v3739_v25 = vrot.slane %v7526_v20, 7 }
 0xa5c   :  { %6081 = vmatpush3.msra.mxu0 %v7365_v7  ;;  %6076 = vmatpush3.msra.mxu1 %v7358_v1 }
 0xa5d   :  { %6082 = vmatprep.subr.mxu0 %v6718_v6  ;;  %6077 = vmatprep.mubr.msk.f32.mxu1 %vm6719_vm1, %v6718_v6 }
 0xa5e   :  { %6083 = vmatpush3.msra.mxu0 %v7372_v15  ;;  %6088 = vmatprep.mubr.msk.f32.mxu0 %vm6719_vm1, %v6718_v6 }
 0xa5f   :  { %6084 = vmatprep.subr.mxu0 %v6718_v6  ;;  %6091 = vmatprep.subr.mxu1 %v6718_v6 }
 0xa60   :  { %6085 = vmatpush3.msra.mxu0 %v7381_v11 }
 0xa61   :  { %6086 = vmatprep.subr.mxu0 %v6718_v6 }
 0xa62   :  { %6087 = vmatpush3.msra.mxu0 %v7389_v47 }
 0xa63   :  { %6102 = vmatprep.subr.mxu0 %v6718_v6 }
 0xb13   :  { %v3542_v58 = vpop.f32.mrf.mxu0  ;;  %v3612_v60 = vpop.f32.mrf.mxu1 }
 0xb14   :  { %v3543_v61 = vadd.f32 %v7430_v51, %v3542_v58  ;;  %v3613_v33 = vadd.f32 %v7445_v62, %v3612_v60 }
 0xb15   :  { %v6046_v26 = vpop.f32.mrf.mxu0  ;;  %v6057_v27 = vpop.f32.mrf.mxu1 }
 0xb16   :  { %v3687_v29 = vrot.slane %v3543_v61, 6  ;;  %v3688_v32 = vrot.slane %v3543_v61, 7  ;;  %v3706_v34 = vrot.slane %v3613_v33, 6  ;;  %v3707_v38 = vrot.slane %v3613_v33, 7 }
 0xb17   :  { %v3740_v61 = vrot.slane %v7528_v45, 7 }
 0xb18   :  { %v3691_v52 = vadd.f32 %v3687_v29, %v7435_v37  ;;  %v3692_v56 = vadd.f32 %v3688_v32, %v7438_v57  ;;  %v3710_v18 = vadd.f32 %v3706_v34, %v7450_v30  ;;  %v3711_v41 = vadd.f32 %v3707_v38, %v7453_v19 }
 0xb1a   :  { %v5345_v5 = vmul.f32 -1.442695, %v3691_v52  ;;  %v5346_v24 = vmul.f32 -1.442695, %v3692_v56  ;;  %v5347_v8 = vmul.f32 -1.442695, %v3710_v18 }
 0xb1b   :  { %v3682_v39 = vpop.f32.mrf.mxu0  ;;  %v5348_v43 = vmul.f32 -1.442695, %v3711_v41 }
 0xb1c   :  { %6454 = vpow2.f32 %v5345_v5  ;;  %v3683_v23 = vadd.f32 %v7460_v35, %v3682_v39 }
 0xb1d   :  { %6456 = vpow2.f32 %v5346_v24  ;;  %v6068_v3 = vpop.f32.mrf.mxu0 }
 0xb1e   :  { %6458 = vpow2.f32 %v5347_v8  ;;  %v3725_v59 = vrot.slane %v3683_v23, 6  ;;  %v3726_v31 = vrot.slane %v3683_v23, 7 }
 0xb1f   :  { %6460 = vpow2.f32 %v5348_v43 }
 0xb29   :  { %v6455_v48 = vpop.eup %6454 }
 0xb2a   :  { %v6457_v49 = vpop.eup %6456  ;;  %v3699_v36 = vadd.f32 1.0, %v6455_v48 }
 0xb2b   :  { %v3700_v50 = vadd.f32 1.0, %v6457_v49  ;;  %v6459_v54 = vpop.eup %6458 }
 0xb2c   :  { %6462 = vrcp.f32 %v3699_v36  ;;  %v6461_v21 = vpop.eup %6460  ;;  %v3718_v55 = vadd.f32 1.0, %v6459_v54 }
 0xb2d   :  { %6464 = vrcp.f32 %v3700_v50  ;;  %v3719_v28 = vadd.f32 1.0, %v6461_v21 }
 0xb2e   :  { %6466 = vrcp.f32 %v3718_v55 }
 0xb2f   :  { %6468 = vrcp.f32 %v3719_v28 }
 0xb39   :  { %v6463_v14 = vpop.eup %6462 }
 0xb3a   :  { %v6465_v12 = vpop.eup %6464  ;;  %v3729_v63 = vmul.f32 %v6463_v14, %v3725_v59 }
 0xb3b   :  { %v3730_v0 = vmul.f32 %v6465_v12, %v3726_v31  ;;  %v6467_v44 = vpop.eup %6466 }
 0xb3c   :  { %v3731_v4 = vadd.f32 %v3729_v63, %v7466_v13  ;;  %v6469_v22 = vpop.eup %6468  ;;  %v3735_v58 = vsub.f32 1.0, %v6467_v44  ;;  %v3743_v32 = vmul.f32 %v6467_v44, %v3739_v25 }
 0xb3d   :  { %v3732_v53 = vadd.f32 %v3730_v0, %v7468_v46  ;;  %v3736_v26 = vsub.f32 1.0, %v6469_v22  ;;  %v3744_v52 = vmul.f32 %v6469_v22, %v3740_v61 }
 0xb3e   :  { %6470 = vtanh.f32 %v3731_v4 }
 0xb3f   :  { %6472 = vtanh.f32 %v3732_v53 }
 0xb4b   :  { %v6471_v60 = vpop.eup %6470 }
 0xb4c   :  { %v6473_v27 = vpop.eup %6472  ;;  %v3737_v29 = vmul.f32 %v6471_v60, %v3735_v58 }
 0xb4d   :  { %v3738_v33 = vmul.f32 %v6473_v27, %v3736_v26 }
 0xb4e   :  { %v7577_v56 = vadd.f32 %v3743_v32, %v3737_v29 }
 0xb4f   :  { %v7579_v5 = vadd.f32 %v3744_v52, %v3738_v33 }
 0xb50   :  { %v3749_v24 = vrot.slane %v7577_v56, 2 }
 0xb51   :  { %v3750_v34 = vrot.slane %v7579_v5, 1 }
 0xb53   :  { %v3751_v20 = vsel %vm671_vm3, %v3750_v34, %v3749_v24 }
 0xb54   :  { %6078 = vmatmul.mubr.msk.f32.vlgmr.msra.gmra.mxu1 %vm381_vm4, %v3751_v20  ;;  %6089 = vmatmul.mubr.msk.f32.vlgmr.msra.gmra.mxu0 %vm381_vm4, %v3751_v20 }
 0xb55   :  { %6092 = vmatpush3.msra.mxu1 %v7369_v10  ;;  %6099 = vmatprep.mubr.msk.f32.mxu1 %vm6719_vm1, %v6718_v6 }
 0xb56   :  { %6093 = vmatprep.subr.mxu1 %v6718_v6  ;;  %6103 = vmatpush3.msra.mxu0 %v7344_v40 }
 0xb57   :  { %6094 = vmatpush3.msra.mxu1 %v7378_v9  ;;  %6104 = vmatprep.subr.mxu0 %v6718_v6 }
 0xb58   :  { %6095 = vmatprep.subr.mxu1 %v6718_v6  ;;  %6105 = vmatpush3.msra.mxu0 %v7350_v2 }
 0xb59   :  { %6096 = vmatpush3.msra.mxu1 %v7386_v16  ;;  %6106 = vmatprep.subr.mxu0 %v6718_v6 }
 0xb5a   :  { %6097 = vmatprep.subr.mxu1 %v6718_v6  ;;  %6107 = vmatpush3.msra.mxu0 %v7354_v42 }
 0xb5b   :  { %6098 = vmatpush3.msra.mxu1 %v7394_v17  ;;  %6108 = vmatprep.subr.mxu0 %v6718_v6 }
 0xb5c   :  { %6100 = vmatmul.mubr.msk.f32.vlgmr.msra.gmra.mxu1 %vm381_vm4, %v3751_v20  ;;  %6113 = vmatprep.subr.mxu1 %v6718_v6  ;;  %v4017_v20 = vrot.slane %v7577_v56, 7 }
 0xb5d   :  { %6114 = vmatpush3.msra.mxu1 %v7365_v7  ;;  %6109 = vmatpush3.msra.mxu0 %v7358_v1 }
 0xb5e   :  { %6115 = vmatprep.subr.mxu1 %v6718_v6  ;;  %6110 = vmatprep.mubr.msk.f32.mxu0 %vm6719_vm1, %v6718_v6 }
 0xb5f   :  { %6116 = vmatpush3.msra.mxu1 %v7372_v15  ;;  %6121 = vmatprep.mubr.msk.f32.mxu1 %vm6719_vm1, %v6718_v6 }
 0xb60   :  { %6117 = vmatprep.subr.mxu1 %v6718_v6  ;;  %6124 = vmatprep.subr.mxu0 %v6718_v6 }
 0xb61   :  { %6118 = vmatpush3.msra.mxu1 %v7381_v11 }
 0xb62   :  { %6119 = vmatprep.subr.mxu1 %v6718_v6 }
 0xb63   :  { %6120 = vmatpush3.msra.mxu1 %v7389_v47 }
 0xb64   :  { %6135 = vmatprep.subr.mxu1 %v6718_v6 }
 0xc14   :  { %v3820_v45 = vpop.f32.mrf.mxu1  ;;  %v3890_v38 = vpop.f32.mrf.mxu0 }
 0xc15   :  { %v3821_v39 = vadd.f32 %v7430_v51, %v3820_v45  ;;  %v3891_v43 = vadd.f32 %v7445_v62, %v3890_v38 }
 0xc16   :  { %v6079_v3 = vpop.f32.mrf.mxu1  ;;  %v6090_v18 = vpop.f32.mrf.mxu0 }
 0xc17   :  { %v3965_v41 = vrot.slane %v3821_v39, 5  ;;  %v3966_v8 = vrot.slane %v3821_v39, 6  ;;  %v3984_v54 = vrot.slane %v3891_v43, 5  ;;  %v3985_v21 = vrot.slane %v3891_v43, 6 }
 0xc18   :  { %v4018_v39 = vrot.slane %v7579_v5, 7 }
 0xc19   :  { %v3969_v48 = vadd.f32 %v3965_v41, %v7435_v37  ;;  %v3970_v49 = vadd.f32 %v3966_v8, %v7438_v57  ;;  %v3988_v28 = vadd.f32 %v3984_v54, %v7450_v30  ;;  %v3989_v59 = vadd.f32 %v3985_v21, %v7453_v19 }
 0xc1b   :  { %v5352_v36 = vmul.f32 -1.442695, %v3969_v48  ;;  %v5353_v50 = vmul.f32 -1.442695, %v3970_v49  ;;  %v5354_v14 = vmul.f32 -1.442695, %v3988_v28 }
 0xc1c   :  { %v3960_v23 = vpop.f32.mrf.mxu1  ;;  %v5355_v31 = vmul.f32 -1.442695, %v3989_v59 }
 0xc1d   :  { %6474 = vpow2.f32 %v5352_v36  ;;  %v3961_v22 = vadd.f32 %v7460_v35, %v3960_v23 }
 0xc1e   :  { %6476 = vpow2.f32 %v5353_v50  ;;  %v6101_v55 = vpop.f32.mrf.mxu1 }
 0xc1f   :  { %6478 = vpow2.f32 %v5354_v14  ;;  %v4003_v60 = vrot.slane %v3961_v22, 5  ;;  %v4004_v26 = vrot.slane %v3961_v22, 6 }
 0xc20   :  { %6480 = vpow2.f32 %v5355_v31 }
 0xc2a   :  { %v6475_v12 = vpop.eup %6474 }
 0xc2b   :  { %v6477_v63 = vpop.eup %6476  ;;  %v3977_v0 = vadd.f32 1.0, %v6475_v12 }
 0xc2c   :  { %v3978_v4 = vadd.f32 1.0, %v6477_v63  ;;  %v6479_v53 = vpop.eup %6478 }
 0xc2d   :  { %6482 = vrcp.f32 %v3977_v0  ;;  %v6481_v44 = vpop.eup %6480  ;;  %v3996_v25 = vadd.f32 1.0, %v6479_v53 }
 0xc2e   :  { %6484 = vrcp.f32 %v3978_v4  ;;  %v3997_v58 = vadd.f32 1.0, %v6481_v44 }
 0xc2f   :  { %6486 = vrcp.f32 %v3996_v25 }
 0xc30   :  { %6488 = vrcp.f32 %v3997_v58 }
 0xc3a   :  { %v6483_v61 = vpop.eup %6482 }
 0xc3b   :  { %v6485_v27 = vpop.eup %6484  ;;  %v4007_v29 = vmul.f32 %v6483_v61, %v4003_v60 }
 0xc3c   :  { %v4008_v32 = vmul.f32 %v6485_v27, %v4004_v26  ;;  %v6487_v24 = vpop.eup %6486 }
 0xc3d   :  { %v4009_v33 = vadd.f32 %v4007_v29, %v7466_v13  ;;  %v6489_v34 = vpop.eup %6488  ;;  %v4013_v45 = vsub.f32 1.0, %v6487_v24  ;;  %v4021_v8 = vmul.f32 %v6487_v24, %v4017_v20 }
 0xc3e   :  { %v4010_v52 = vadd.f32 %v4008_v32, %v7468_v46  ;;  %v4014_v3 = vsub.f32 1.0, %v6489_v34  ;;  %v4022_v48 = vmul.f32 %v6489_v34, %v4018_v39 }
 0xc3f   :  { %6490 = vtanh.f32 %v4009_v33 }
 0xc40   :  { %6492 = vtanh.f32 %v4010_v52 }
 0xc4c   :  { %v6491_v38 = vpop.eup %6490 }
 0xc4d   :  { %v6493_v18 = vpop.eup %6492  ;;  %v4015_v41 = vmul.f32 %v6491_v38, %v4013_v45 }
 0xc4e   :  { %v4016_v43 = vmul.f32 %v6493_v18, %v4014_v3 }
 0xc4f   :  { %v7628_v49 = vadd.f32 %v4021_v8, %v4015_v41 }
 0xc50   :  { %v7630_v36 = vadd.f32 %v4022_v48, %v4016_v43 }
 0xc51   :  { %v4027_v50 = vrot.slane %v7628_v49, 3  ;;  %v4295_v18 = vrot.slane %v7628_v49, 7 }
 0xc52   :  { %v4028_v54 = vrot.slane %v7630_v36, 2  ;;  %v4296_v43 = vrot.slane %v7630_v36, 7  ;;  %v7692_v36 = vld [vmem:[#allocation9 + $0x18] sm:$0xff] }
 0xc54   :  { %v4029_v56 = vsel %vm671_vm3, %v4028_v54, %v4027_v50 }
 0xc55   :  { %6111 = vmatmul.mubr.msk.f32.vlgmr.msra.gmra.mxu0 %vm381_vm4, %v4029_v56  ;;  %6122 = vmatmul.mubr.msk.f32.vlgmr.msra.gmra.mxu1 %vm381_vm4, %v4029_v56 }
 0xc56   :  { %6125 = vmatpush3.msra.mxu0 %v7369_v10  ;;  %6132 = vmatprep.mubr.msk.f32.mxu0 %vm6719_vm1, %v6718_v6 }
 0xc57   :  { %6126 = vmatprep.subr.mxu0 %v6718_v6  ;;  %6136 = vmatpush3.msra.mxu1 %v7344_v40 }
 0xc58   :  { %6127 = vmatpush3.msra.mxu0 %v7378_v9  ;;  %6137 = vmatprep.subr.mxu1 %v6718_v6 }
 0xc59   :  { %6128 = vmatprep.subr.mxu0 %v6718_v6  ;;  %6138 = vmatpush3.msra.mxu1 %v7350_v2 }
 0xc5a   :  { %6129 = vmatpush3.msra.mxu0 %v7386_v16  ;;  %6139 = vmatprep.subr.mxu1 %v6718_v6 }
 0xc5b   :  { %6130 = vmatprep.subr.mxu0 %v6718_v6  ;;  %6140 = vmatpush3.msra.mxu1 %v7354_v42 }
 0xc5c   :  { %6131 = vmatpush3.msra.mxu0 %v7394_v17  ;;  %6141 = vmatprep.subr.mxu1 %v6718_v6 }
 0xc5d   :  { %6133 = vmatmul.mubr.msk.f32.vlgmr.msra.gmra.mxu0 %vm381_vm4, %v4029_v56  ;;  %6146 = vmatprep.subr.mxu0 %v6718_v6 }
 0xc5e   :  { %6147 = vmatpush3.msra.mxu0 %v7365_v7  ;;  %6142 = vmatpush3.msra.mxu1 %v7358_v1 }
 0xc5f   :  { %6148 = vmatprep.subr.mxu0 %v6718_v6  ;;  %6143 = vmatprep.mubr.msk.f32.mxu1 %vm6719_vm1, %v6718_v6 }
 0xc60   :  { %6149 = vmatpush3.msra.mxu0 %v7372_v15  ;;  %6154 = vmatprep.mubr.msk.f32.mxu0 %vm6719_vm1, %v6718_v6 }
 0xc61   :  { %6150 = vmatprep.subr.mxu0 %v6718_v6  ;;  %6157 = vmatprep.subr.mxu1 %v6718_v6 }
 0xc62   :  { %6151 = vmatpush3.msra.mxu0 %v7381_v11 }
 0xc63   :  { %6152 = vmatprep.subr.mxu0 %v6718_v6 }
 0xc64   :  { %6153 = vmatpush3.msra.mxu0 %v7389_v47 }
 0xc65   :  { %6168 = vmatprep.subr.mxu0 %v6718_v6 }
 0xd15   :  { %v4098_v40 = vpop.f32.mrf.mxu0  ;;  %v4168_v2 = vpop.f32.mrf.mxu1 }
 0xd16   :  { %v4099_v42 = vadd.f32 %v7430_v51, %v4098_v40  ;;  %v4169_v21 = vadd.f32 %v7445_v62, %v4168_v2 }
 0xd17   :  { %v6112_v1 = vpop.f32.mrf.mxu0  ;;  %v6123_v7 = vpop.f32.mrf.mxu1 }
 0xd18   :  { %v4243_v15 = vrot.slane %v4099_v42, 4  ;;  %v4244_v5 = vrot.slane %v4099_v42, 5  ;;  %v4262_v59 = vrot.slane %v4169_v21, 4  ;;  %v4263_v14 = vrot.slane %v4169_v21, 5  ;;  %v7727_v21 = vld [vmem:[#allocation9 + $0x28] sm:$0xff] }
 0xd1a   :  { %v4247_v23 = vadd.f32 %v4243_v15, %v7435_v37  ;;  %v4248_v11 = vadd.f32 %v4244_v5, %v7438_v57  ;;  %v4266_v63 = vadd.f32 %v4262_v59, %v7450_v30  ;;  %v4267_v0 = vadd.f32 %v4263_v14, %v7453_v19  ;;  %v7698_v5 = vld [vmem:[#allocation9 + $0x10] sm:$0xff] }
 0xd1c   :  { %v5359_v55 = vmul.f32 -1.442695, %v4247_v23  ;;  %v5360_v28 = vmul.f32 -1.442695, %v4248_v11  ;;  %v5361_v4 = vmul.f32 -1.442695, %v4266_v63 }
 0xd1d   :  { %v4238_v31 = vpop.f32.mrf.mxu0  ;;  %v5362_v53 = vmul.f32 -1.442695, %v4267_v0 }
 0xd1e   :  { %6494 = vpow2.f32 %v5359_v55  ;;  %v4239_v26 = vadd.f32 %v7460_v35, %v4238_v31 }
 0xd1f   :  { %6496 = vpow2.f32 %v5360_v28  ;;  %v6134_v12 = vpop.f32.mrf.mxu0 }
 0xd20   :  { %6498 = vpow2.f32 %v5361_v4  ;;  %v4281_v32 = vrot.slane %v4239_v26, 4  ;;  %v4282_v52 = vrot.slane %v4239_v26, 5 }
 0xd21   :  { %6500 = vpow2.f32 %v5362_v53 }
 0xd2b   :  { %v6495_v44 = vpop.eup %6494 }
 0xd2c   :  { %v6497_v22 = vpop.eup %6496  ;;  %v4255_v25 = vadd.f32 1.0, %v6495_v44 }
 0xd2d   :  { %v4256_v58 = vadd.f32 1.0, %v6497_v22  ;;  %v6499_v60 = vpop.eup %6498 }
 0xd2e   :  { %6502 = vrcp.f32 %v4255_v25  ;;  %v6501_v61 = vpop.eup %6500  ;;  %v4274_v27 = vadd.f32 1.0, %v6499_v60 }
 0xd2f   :  { %6504 = vrcp.f32 %v4256_v58  ;;  %v4275_v29 = vadd.f32 1.0, %v6501_v61 }
 0xd30   :  { %6506 = vrcp.f32 %v4274_v27 }
 0xd31   :  { %6508 = vrcp.f32 %v4275_v29 }
 0xd3b   :  { %v6503_v33 = vpop.eup %6502 }
 0xd3c   :  { %v6505_v24 = vpop.eup %6504  ;;  %v4285_v34 = vmul.f32 %v6503_v33, %v4281_v32 }
 0xd3d   :  { %v4286_v20 = vmul.f32 %v6505_v24, %v4282_v52  ;;  %v6507_v39 = vpop.eup %6506 }
 0xd3e   :  { %v4287_v45 = vadd.f32 %v4285_v34, %v7466_v13  ;;  %v6509_v3 = vpop.eup %6508  ;;  %v4291_v41 = vsub.f32 1.0, %v6507_v39  ;;  %v4299_v56 = vmul.f32 %v6507_v39, %v4295_v18 }
 0xd3f   :  { %v4288_v38 = vadd.f32 %v4286_v20, %v7468_v46  ;;  %v4292_v48 = vsub.f32 1.0, %v6509_v3  ;;  %v4300_v2 = vmul.f32 %v6509_v3, %v4296_v43 }
 0xd40   :  { %6510 = vtanh.f32 %v4287_v45 }
 0xd41   :  { %6512 = vtanh.f32 %v4288_v38 }
 0xd4d   :  { %v6511_v8 = vpop.eup %6510 }
 0xd4e   :  { %v6513_v50 = vpop.eup %6512  ;;  %v4293_v54 = vmul.f32 %v6511_v8, %v4291_v41 }
 0xd4f   :  { %v4294_v40 = vmul.f32 %v6513_v50, %v4292_v48 }
 0xd50   :  { %v7679_v42 = vadd.f32 %v4299_v56, %v4293_v54 }
 0xd51   :  { %v7681_v1 = vadd.f32 %v4300_v2, %v4294_v40 }
 0xd52   :  { %v4305_v7 = vrot.slane %v7679_v42, 4 }
 0xd53   :  { %v4306_v15 = vrot.slane %v7681_v1, 3  ;;  %v4574_v56 = vrot.slane %v7681_v1, 7  ;;  %v7753_v1 = vld [vmem:[#allocation9 + $0x58] sm:$0xff] }
 0xd55   :  { %v4307_v49 = vsel %vm671_vm3, %v4306_v15, %v4305_v7 }
 0xd56   :  { %6144 = vmatmul.mubr.msk.f32.vlgmr.msra.gmra.mxu1 %vm381_vm4, %v4307_v49  ;;  %6155 = vmatmul.mubr.msk.f32.vlgmr.msra.gmra.mxu0 %vm381_vm4, %v4307_v49 }
 0xd57   :  { %6158 = vmatpush3.msra.mxu1 %v7369_v10  ;;  %6165 = vmatprep.mubr.msk.f32.mxu1 %vm6719_vm1, %v6718_v6  ;;  %v7704_v10 = vld [vmem:[#allocation9 + $0x8] sm:$0xff] }
 0xd58   :  { %6159 = vmatprep.subr.mxu1 %v6718_v6  ;;  %6169 = vmatpush3.msra.mxu0 %v7692_v36 }
 0xd59   :  { %6160 = vmatpush3.msra.mxu1 %v7378_v9  ;;  %6170 = vmatprep.subr.mxu0 %v6718_v6  ;;  %v7711_v9 = vld [vmem:[#allocation9 + $0x38] sm:$0xff] }
 0xd5a   :  { %6161 = vmatprep.subr.mxu1 %v6718_v6  ;;  %6171 = vmatpush3.msra.mxu0 %v7698_v5 }
 0xd5b   :  { %6162 = vmatpush3.msra.mxu1 %v7386_v16  ;;  %6172 = vmatprep.subr.mxu0 %v6718_v6  ;;  %v7714_v16 = vld [vmem:[#allocation9] sm:$0xff] }
 0xd5c   :  { %6163 = vmatprep.subr.mxu1 %v6718_v6  ;;  %6173 = vmatpush3.msra.mxu0 %v7704_v10 }
 0xd5d   :  { %6164 = vmatpush3.msra.mxu1 %v7394_v17  ;;  %6174 = vmatprep.subr.mxu0 %v6718_v6  ;;  %v7720_v17 = vld [vmem:[#allocation9 + $0x30] sm:$0xff] }
 0xd5e   :  { %6166 = vmatmul.mubr.msk.f32.vlgmr.msra.gmra.mxu1 %vm381_vm4, %v4307_v49  ;;  %6179 = vmatprep.subr.mxu1 %v6718_v6 }
 0xd5f   :  { %6180 = vmatpush3.msra.mxu1 %v7711_v9  ;;  %6175 = vmatpush3.msra.mxu0 %v7714_v16 }
 0xd60   :  { %6181 = vmatprep.subr.mxu1 %v6718_v6  ;;  %6176 = vmatprep.mubr.msk.f32.mxu0 %vm6719_vm1, %v6718_v6 }
 0xd61   :  { %6182 = vmatpush3.msra.mxu1 %v7720_v17  ;;  %6187 = vmatprep.mubr.msk.f32.mxu1 %vm6719_vm1, %v6718_v6 }
 0xd62   :  { %6183 = vmatprep.subr.mxu1 %v6718_v6  ;;  %6190 = vmatprep.subr.mxu0 %v6718_v6 }
 0xd63   :  { %6184 = vmatpush3.msra.mxu1 %v7727_v21 }
 0xd64   :  { %6185 = vmatprep.subr.mxu1 %v6718_v6 }
 0xd65   :  { %6186 = vmatpush3.msra.mxu1 %v7389_v47 }
 0xd66   :  { %6201 = vmatprep.subr.mxu1 %v6718_v6 }
 0xe16   :  { %v4376_v23 = vpop.f32.mrf.mxu1  ;;  %v4446_v11 = vpop.f32.mrf.mxu0 }
 0xe17   :  { %v4377_v55 = vadd.f32 %v7430_v51, %v4376_v23  ;;  %v4447_v12 = vadd.f32 %v7445_v62, %v4446_v11 }
 0xe18   :  { %v6145_v28 = vpop.f32.mrf.mxu1  ;;  %v6156_v59 = vpop.f32.mrf.mxu0 }
 0xe19   :  { %v4521_v14 = vrot.slane %v4377_v55, 3  ;;  %v4522_v31 = vrot.slane %v4377_v55, 4  ;;  %v4540_v44 = vrot.slane %v4447_v12, 3  ;;  %v4541_v47 = vrot.slane %v4447_v12, 4 }
 0xe1b   :  { %v4525_v63 = vadd.f32 %v4521_v14, %v7435_v37  ;;  %v4526_v0 = vadd.f32 %v4522_v31, %v7438_v57  ;;  %v4544_v51 = vadd.f32 %v4540_v44, %v7450_v30  ;;  %v4545_v58 = vadd.f32 %v4541_v47, %v7453_v19  ;;  %v7760_v14 = vld [vmem:[#allocation9 + $0x50] sm:$0xff]  ;;  %v7766_v31 = vld [vmem:[#allocation9 + $0x48] sm:$0xff] }
 0xe1d   :  { %v5366_v4 = vmul.f32 -1.442695, %v4525_v63  ;;  %v5367_v53 = vmul.f32 -1.442695, %v4526_v0  ;;  %v5368_v60 = vmul.f32 -1.442695, %v4544_v51 }
 0xe1e   :  { %v4516_v22 = vpop.f32.mrf.mxu1  ;;  %v5369_v61 = vmul.f32 -1.442695, %v4545_v58 }
 0xe1f   :  { %6514 = vpow2.f32 %v5366_v4  ;;  %v4517_v52 = vadd.f32 %v7460_v35, %v4516_v22  ;;  %v4573_v35 = vrot.slane %v7679_v42, 7 }
 0xe20   :  { %6516 = vpow2.f32 %v5367_v53  ;;  %v6167_v25 = vpop.f32.mrf.mxu1 }
 0xe21   :  { %6518 = vpow2.f32 %v5368_v60  ;;  %v4559_v20 = vrot.slane %v4517_v52, 3  ;;  %v4560_v38 = vrot.slane %v4517_v52, 4 }
 0xe22   :  { %6520 = vpow2.f32 %v5369_v61 }
 0xe2c   :  { %v6515_v62 = vpop.eup %6514 }
 0xe2d   :  { %v6517_v26 = vpop.eup %6516  ;;  %v4533_v27 = vadd.f32 1.0, %v6515_v62 }
 0xe2e   :  { %v4534_v29 = vadd.f32 1.0, %v6517_v26  ;;  %v6519_v32 = vpop.eup %6518 }
 0xe2f   :  { %6522 = vrcp.f32 %v4533_v27  ;;  %v6521_v33 = vpop.eup %6520  ;;  %v4552_v24 = vadd.f32 1.0, %v6519_v32 }
 0xe30   :  { %6524 = vrcp.f32 %v4534_v29  ;;  %v4553_v34 = vadd.f32 1.0, %v6521_v33 }
 0xe31   :  { %6526 = vrcp.f32 %v4552_v24 }
 0xe32   :  { %6528 = vrcp.f32 %v4553_v34 }
 0xe3c   :  { %v6523_v45 = vpop.eup %6522 }
 0xe3d   :  { %v6525_v39 = vpop.eup %6524  ;;  %v4563_v3 = vmul.f32 %v6523_v45, %v4559_v20  ;;  %v7810_v45 = vld [vmem:[%s7880_s8 + $0x2] ss:$0 sm:$0xff] }
 0xe3e   :  { %v4564_v18 = vmul.f32 %v6525_v39, %v4560_v38  ;;  %v6527_v43 = vpop.eup %6526 }
 0xe3f   :  { %v4565_v41 = vadd.f32 %v4563_v3, %v7466_v13  ;;  %v6529_v48 = vpop.eup %6528  ;;  %v4569_v50 = vsub.f32 1.0, %v6527_v43  ;;  %v4577_v15 = vmul.f32 %v6527_v43, %v4573_v35 }
 0xe40   :  { %v4566_v8 = vadd.f32 %v4564_v18, %v7468_v46  ;;  %v4570_v40 = vsub.f32 1.0, %v6529_v48  ;;  %v4578_v23 = vmul.f32 %v6529_v48, %v4574_v56 }
 0xe41   :  { %6530 = vtanh.f32 %v4565_v41 }
 0xe42   :  { %6532 = vtanh.f32 %v4566_v8 }
 0xe4e   :  { %v6531_v54 = vpop.eup %6530 }
 0xe4f   :  { %v6533_v2 = vpop.eup %6532  ;;  %v4571_v7 = vmul.f32 %v6531_v54, %v4569_v50 }
 0xe50   :  { %v4572_v49 = vmul.f32 %v6533_v2, %v4570_v40 }
 0xe51   :  { %v7744_v11 = vadd.f32 %v4577_v15, %v4571_v7 }
 0xe52   :  { %v7746_v55 = vadd.f32 %v4578_v23, %v4572_v49 }
 0xe53   :  { %v4583_v28 = vrot.slane %v7744_v11, 5  ;;  %v4851_v2 = vrot.slane %v7744_v11, 7 }
 0xe54   :  { %v4584_v59 = vrot.slane %v7746_v55, 4  ;;  %v4852_v49 = vrot.slane %v7746_v55, 7  ;;  %v5140_v55 = vld [vmem:[%s7881_s9 + $0x18] sm:$0xff] }
 0xe56   :  { %v4585_v42 = vsel %vm671_vm3, %v4584_v59, %v4583_v28 }
 0xe57   :  { %6177 = vmatmul.mubr.msk.f32.vlgmr.msra.gmra.mxu0 %vm381_vm4, %v4585_v42  ;;  %6188 = vmatmul.mubr.msk.f32.vlgmr.msra.gmra.mxu1 %vm381_vm4, %v4585_v42 }
 0xe58   :  { %6191 = vmatpush3.msra.mxu0 %v7753_v1  ;;  %6198 = vmatprep.mubr.msk.f32.mxu0 %vm6719_vm1, %v6718_v6 }
 0xe59   :  { %6192 = vmatprep.subr.mxu0 %v6718_v6  ;;  %6202 = vmatpush3.msra.mxu1 %v7692_v36  ;;  %v7772_v36 = vld [vmem:[#allocation9 + $0x40] sm:$0xff] }
 0xe5a   :  { %6193 = vmatpush3.msra.mxu0 %v7760_v14  ;;  %6203 = vmatprep.subr.mxu1 %v6718_v6 }
 0xe5b   :  { %6194 = vmatprep.subr.mxu0 %v6718_v6  ;;  %6204 = vmatpush3.msra.mxu1 %v7698_v5  ;;  %v6600_v5 = vld [vmem:[#allocation9 + $0x20] sm:$0xff] }
 0xe5c   :  { %6195 = vmatpush3.msra.mxu0 %v7766_v31  ;;  %6205 = vmatprep.subr.mxu1 %v6718_v6 }
 0xe5d   :  { %6196 = vmatprep.subr.mxu0 %v6718_v6  ;;  %6206 = vmatpush3.msra.mxu1 %v7704_v10 }
 0xe5e   :  { %6197 = vmatpush3.msra.mxu0 %v7772_v36  ;;  %6207 = vmatprep.subr.mxu1 %v6718_v6 }
 0xe5f   :  { %6199 = vmatmul.mubr.msk.f32.vlgmr.msra.gmra.mxu0 %vm381_vm4, %v4585_v42  ;;  %6212 = vmatprep.subr.mxu0 %v6718_v6 }
 0xe60   :  { %6213 = vmatpush3.msra.mxu0 %v7711_v9  ;;  %6208 = vmatpush3.msra.mxu1 %v7714_v16  ;;  %v7794_v16 = vld [vmem:[%s7880_s8] ss:$0 sm:$0xff] }
 0xe61   :  { %6214 = vmatprep.subr.mxu0 %v6718_v6  ;;  %6209 = vmatprep.mubr.msk.f32.mxu1 %vm6719_vm1, %v6718_v6 }
 0xe62   :  { %6215 = vmatpush3.msra.mxu0 %v7720_v17  ;;  %6220 = vmatprep.mubr.msk.f32.mxu0 %vm6719_vm1, %v6718_v6 }
 0xe63   :  { %6216 = vmatprep.subr.mxu0 %v6718_v6  ;;  %6223 = vmatprep.subr.mxu1 %v6718_v6 }
 0xe64   :  { %6217 = vmatpush3.msra.mxu0 %v7727_v21  ;;  %v7800_v21 = vld [vmem:[%s7880_s8 + $0x1] ss:$0 sm:$0xff] }
 0xe65   :  { %6218 = vmatprep.subr.mxu0 %v6718_v6 }
 0xe66   :  { %6219 = vmatpush3.msra.mxu0 %v6600_v5 }
 0xe67   :  { %6234 = vmatprep.subr.mxu0 %v6718_v6 }
 0xf17   :  { %v4654_v10 = vpop.f32.mrf.mxu0  ;;  %v4724_v9 = vpop.f32.mrf.mxu1 }
 0xf18   :  { %v4655_v17 = vadd.f32 %v7794_v16, %v4654_v10  ;;  %v4725_v53 = vadd.f32 %v7800_v21, %v4724_v9 }
 0xf19   :  { %v6178_v12 = vpop.f32.mrf.mxu0  ;;  %v6189_v63 = vpop.f32.mrf.mxu1 }
 0xf1a   :  { %v4799_v0 = vrot.slane %v4655_v17, 2  ;;  %v4800_v4 = vrot.slane %v4655_v17, 3  ;;  %v4818_v51 = vrot.slane %v4725_v53, 2  ;;  %v4819_v58 = vrot.slane %v4725_v53, 3 }
 0xf1c   :  { %v4803_v44 = vadd.f32 %v4799_v0, %v7435_v37  ;;  %v4804_v47 = vadd.f32 %v4800_v4, %v7438_v57  ;;  %v4822_v62 = vadd.f32 %v4818_v51, %v7450_v30  ;;  %v4823_v26 = vadd.f32 %v4819_v58, %v7453_v19 }
 0xf1e   :  { %v5373_v22 = vmul.f32 -1.442695, %v4803_v44  ;;  %v5374_v25 = vmul.f32 -1.442695, %v4804_v47  ;;  %v5375_v27 = vmul.f32 -1.442695, %v4822_v62 }
 0xf1f   :  { %v4794_v60 = vpop.f32.mrf.mxu0  ;;  %v5376_v29 = vmul.f32 -1.442695, %v4823_v26 }
 0xf20   :  { %6534 = vpow2.f32 %v5373_v22  ;;  %v4795_v38 = vadd.f32 %v7810_v45, %v4794_v60 }
 0xf21   :  { %6536 = vpow2.f32 %v5374_v25  ;;  %v6200_v61 = vpop.f32.mrf.mxu0 }
 0xf22   :  { %6538 = vpow2.f32 %v5375_v27  ;;  %v4837_v18 = vrot.slane %v4795_v38, 2  ;;  %v4838_v8 = vrot.slane %v4795_v38, 3 }
 0xf23   :  { %6540 = vpow2.f32 %v5376_v29 }
 0xf2d   :  { %v6535_v32 = vpop.eup %6534 }
 0xf2e   :  { %v6537_v33 = vpop.eup %6536  ;;  %v4811_v52 = vadd.f32 1.0, %v6535_v32 }
 0xf2f   :  { %v4812_v24 = vadd.f32 1.0, %v6537_v33  ;;  %v6539_v34 = vpop.eup %6538 }
 0xf30   :  { %6542 = vrcp.f32 %v4811_v52  ;;  %v6541_v20 = vpop.eup %6540  ;;  %v4830_v39 = vadd.f32 1.0, %v6539_v34 }
 0xf31   :  { %6544 = vrcp.f32 %v4812_v24  ;;  %v4831_v3 = vadd.f32 1.0, %v6541_v20 }
 0xf32   :  { %6546 = vrcp.f32 %v4830_v39 }
 0xf33   :  { %6548 = vrcp.f32 %v4831_v3 }
 0xf3d   :  { %v6543_v41 = vpop.eup %6542 }
 0xf3e   :  { %v6545_v43 = vpop.eup %6544  ;;  %v4841_v48 = vmul.f32 %v6543_v41, %v4837_v18 }
 0xf3f   :  { %v4842_v35 = vmul.f32 %v6545_v43, %v4838_v8  ;;  %v6547_v56 = vpop.eup %6546 }
 0xf40   :  { %v4843_v50 = vadd.f32 %v4841_v48, %v7466_v13  ;;  %v6549_v40 = vpop.eup %6548  ;;  %v4847_v7 = vsub.f32 1.0, %v6547_v56  ;;  %v4855_v42 = vmul.f32 %v6547_v56, %v4851_v2 }
 0xf41   :  { %v4844_v54 = vadd.f32 %v4842_v35, %v7468_v46  ;;  %v4848_v23 = vsub.f32 1.0, %v6549_v40  ;;  %v4856_v10 = vmul.f32 %v6549_v40, %v4852_v49 }
 0xf42   :  { %6550 = vtanh.f32 %v4843_v50 }
 0xf43   :  { %6552 = vtanh.f32 %v4844_v54 }
 0xf4f   :  { %v6551_v15 = vpop.eup %6550 }
 0xf50   :  { %v6553_v28 = vpop.eup %6552  ;;  %v4849_v59 = vmul.f32 %v6551_v15, %v4847_v7 }
 0xf51   :  { %v4850_v5 = vmul.f32 %v6553_v28, %v4848_v23 }
 0xf52   :  { %v7817_v9 = vadd.f32 %v4855_v42, %v4849_v59 }
 0xf53   :  { %v7819_v17 = vadd.f32 %v4856_v10, %v4850_v5  ;;  %v5384_v10 = vld [vmem:[%s7882_s10] ss:$0 sm:$0xff] }
 0xf54   :  { %v4861_v12 = vrot.slane %v7817_v9, 6 }
 0xf55   :  { %v4862_v63 = vrot.slane %v7819_v17, 5  ;;  %v5130_v40 = vrot.slane %v7819_v17, 7 }
 0xf57   :  { %v4863_v11 = vsel %vm671_vm3, %v4862_v63, %v4861_v12 }
 0xf58   :  { %6210 = vmatmul.mubr.msk.f32.vlgmr.msra.gmra.mxu1 %vm381_vm4, %v4863_v11  ;;  %6221 = vmatmul.mubr.msk.f32.vlgmr.msra.gmra.mxu0 %vm381_vm4, %v4863_v11 }
 0xf59   :  { %6224 = vmatpush3.msra.mxu1 %v7753_v1  ;;  %6231 = vmatprep.mubr.msk.f32.mxu1 %vm6719_vm1, %v6718_v6  ;;  %v5139_v1 = vld [vmem:[%s7881_s9 + $0x10] sm:$0xff] }
 0xf5a   :  { %6225 = vmatprep.subr.mxu1 %v6718_v6  ;;  %6242 = vmatprep.mubr.msk.f32.mxu0 %vm6719_vm1, %v6718_v6 }
 0xf5b   :  { %6226 = vmatpush3.msra.mxu1 %v7760_v14  ;;  %6235 = vmatpush3.msra.mxu0 %v5140_v55  ;;  %v5138_v14 = vld [vmem:[%s7881_s9 + $0x8] sm:$0xff] }
 0xf5c   :  { %6227 = vmatprep.subr.mxu1 %v6718_v6  ;;  %6236 = vmatprep.subr.mxu0 %v6718_v6 }
 0xf5d   :  { %6228 = vmatpush3.msra.mxu1 %v7766_v31  ;;  %6237 = vmatpush3.msra.mxu0 %v5139_v1  ;;  %v5137_v31 = vld [vmem:[%s7881_s9] sm:$0xff] }
 0xf5e   :  { %6229 = vmatprep.subr.mxu1 %v6718_v6  ;;  %6238 = vmatprep.subr.mxu0 %v6718_v6 }
 0xf5f   :  { %6230 = vmatpush3.msra.mxu1 %v7772_v36  ;;  %6239 = vmatpush3.msra.mxu0 %v5138_v14 }
 0xf60   :  { %6232 = vmatmul.mubr.msk.f32.vlgmr.msra.gmra.mxu1 %vm381_vm4, %v4863_v11  ;;  %6240 = vmatprep.subr.mxu0 %v6718_v6 }
 0xf61   :  { %6241 = vmatpush3.msra.mxu0 %v5137_v31 }
0x1018   :  { %v4932_v36 = vpop.f32.mrf.mxu1  ;;  %v5002_v0 = vpop.f32.mrf.mxu0 }
0x1019   :  { %v4933_v4 = vadd.f32 %v7794_v16, %v4932_v36  ;;  %v5003_v25 = vadd.f32 %v7800_v21, %v5002_v0 }
0x101a   :  { %v6211_v53 = vpop.f32.mrf.mxu1  ;;  %v6222_v44 = vpop.f32.mrf.mxu0 }
0x101b   :  { %v5077_v47 = vrot.slane %v4933_v4, 1  ;;  %v5078_v22 = vrot.slane %v4933_v4, 2  ;;  %v5096_v62 = vrot.slane %v5003_v25, 1  ;;  %v5097_v26 = vrot.slane %v5003_v25, 2 }
0x101d   :  { %v5081_v51 = vadd.f32 %v5077_v47, %v7435_v37  ;;  %v5082_v58 = vadd.f32 %v5078_v22, %v7438_v57  ;;  %v5100_v16 = vadd.f32 %v5096_v62, %v7450_v30  ;;  %v5101_v29 = vadd.f32 %v5097_v26, %v7453_v19 }
0x101f   :  { %v5380_v60 = vmul.f32 -1.442695, %v5081_v51  ;;  %v5381_v61 = vmul.f32 -1.442695, %v5082_v58  ;;  %v5382_v32 = vmul.f32 -1.442695, %v5100_v16 }
0x1020   :  { %v5072_v6 = vpop.f32.mrf.mxu1  ;;  %v5383_v33 = vmul.f32 -1.442695, %v5101_v29 }
0x1021   :  { %6554 = vpow2.f32 %v5380_v60  ;;  %v5073_v20 = vadd.f32 %v7810_v45, %v5072_v6  ;;  %v5129_v45 = vrot.slane %v7817_v9, 7 }
0x1022   :  { %6556 = vpow2.f32 %v5381_v61  ;;  %v6233_v27 = vpop.f32.mrf.mxu1 }
0x1023   :  { %6558 = vpow2.f32 %v5382_v32  ;;  %v5115_v3 = vrot.slane %v5073_v20, 1  ;;  %v5116_v18 = vrot.slane %v5073_v20, 2 }
0x1024   :  { %6560 = vpow2.f32 %v5383_v33 }
0x102e   :  { %v6555_v21 = vpop.eup %6554 }
0x102f   :  { %v6557_v37 = vpop.eup %6556  ;;  %v5089_v52 = vadd.f32 1.0, %v6555_v21 }
0x1030   :  { %v5090_v57 = vadd.f32 1.0, %v6557_v37  ;;  %v6559_v24 = vpop.eup %6558 }
0x1031   :  { %6562 = vrcp.f32 %v5089_v52  ;;  %v6561_v34 = vpop.eup %6560  ;;  %v5108_v38 = vadd.f32 1.0, %v6559_v24 }
0x1032   :  { %6564 = vrcp.f32 %v5090_v57  ;;  %v5109_v39 = vadd.f32 1.0, %v6561_v34 }
0x1033   :  { %6566 = vrcp.f32 %v5108_v38 }
0x1034   :  { %6568 = vrcp.f32 %v5109_v39 }
0x103e   :  { %v6563_v30 = vpop.eup %6562 }
0x103f   :  { %v6565_v19 = vpop.eup %6564  ;;  %v5119_v41 = vmul.f32 %v6563_v30, %v5115_v3 }
0x1040   :  { %v5120_v8 = vmul.f32 %v6565_v19, %v5116_v18  ;;  %v6567_v35 = vpop.eup %6566 }
0x1041   :  { %v5121_v43 = vadd.f32 %v5119_v41, %v7466_v13  ;;  %v6569_v50 = vpop.eup %6568  ;;  %v5125_v54 = vsub.f32 1.0, %v6567_v35  ;;  %v5133_v49 = vmul.f32 %v6567_v35, %v5129_v45 }
0x1042   :  { %v5122_v48 = vadd.f32 %v5120_v8, %v7468_v46  ;;  %v5126_v2 = vsub.f32 1.0, %v6569_v50  ;;  %v5134_v28 = vmul.f32 %v6569_v50, %v5130_v40 }
0x1043   :  { %6570 = vtanh.f32 %v5121_v43 }
0x1044   :  { %6572 = vtanh.f32 %v5122_v48 }
0x1050   :  { %v6571_v56 = vpop.eup %6570 }
0x1051   :  { %v6573_v7 = vpop.eup %6572  ;;  %v5127_v15 = vmul.f32 %v6571_v56, %v5125_v54 }
0x1052   :  { %v5128_v23 = vmul.f32 %v6573_v7, %v5126_v2 }
0x1053   :  { %v5135_v59 = vadd.f32 %v5133_v49, %v5127_v15 }
0x1054   :  { %v5136_v13 = vadd.f32 %v5134_v28, %v5128_v23 }
0x1055   :  { %v5150_v42 = vrot.slane %v5135_v59, 7 }
0x1056   :  { %v5151_v46 = vrot.slane %v5136_v13, 6 }
0x1058   :  { %v5152_v5 = vsel %vm671_vm3, %v5151_v46, %v5150_v42 }
0x1059   :  { %6243 = vmatmul.mubr.msk.f32.vlgmr.msra.gmra.mxu0 %vm381_vm4, %v5152_v5 }
0x1119   :  { %v5221_v9 = vpop.f32.mrf.mxu0 }
0x111a   :  { %v5222_v17 = vadd.f32 %v5384_v10, %v5221_v9 }
0x111b   :  { %v6244_v12 = vpop.f32.mrf.mxu0 }
0x111c   :  { %5226 = vst.msk [vmem:[#allocation11] sm:$0x3] %vm5225_vm12, %v5222_v17 }
0x111d   :  { %6695 = shalt.err (!%p6692_p10)
}
0x111e   :  { %5236 = dma.vmem_to_hbm [thread:$0]  %s5234_s4, 32, %s7883_s11, [#allocation5]  }
0x111f   :  { %6710 = dma.done.wait [#allocation5], 32  }
0x1120   :  { %6711 = vsyncadd [#allocation5], 4294967264 }
0x1121   :  { %5240 = vsyncpa [#allocation4], 1 }
0x1122   :  { %5241 = vsyncpa [#allocation7], 1 }
0x1123   :  { %5242 = vsyncpa [#allocation10], 1 }
0x1124   :  { %5243 = vsyncpa [#allocation5], 1 }

</bundles_post_ra>
